<compile_context>
chip_gen: v7x
topology: tpu7x:2x2x1
jax: 0.10.0
libtpu: 0.0.40
codegen_flags: <defaults>
</compile_context>

<pallas_src>
import jax
import jax.numpy as jnp
from jax import lax
from jax.experimental import pallas as pl
from jax.experimental.pallas import tpu as pltpu


def _net_fwd_kernel(x_ref, w1t_ref, w2t_ref, o_ref):
    # x_ref   : (tm, K)  input rows            (f32 in HBM/VMEM)
    # w1t_ref : (K, K)   first  Linear weight, (in, out) layout (bf16)
    # w2t_ref : (K, K)   second Linear weight, (in, out) layout (bf16)
    w_dtype = w1t_ref.dtype
    x = x_ref[...].astype(w_dtype)
    h = jnp.dot(x, w1t_ref[...], preferred_element_type=jnp.float32)
    y = jnp.dot(h.astype(w_dtype), w2t_ref[...],
                preferred_element_type=jnp.float32)
    o_ref[...] = y.astype(o_ref.dtype)


def prepare_net_weights(w1, w2, *, dtype=jnp.bfloat16):
    """One-time prep of the PyTorch (out_features, in_features) Linear weights.

    Transposes to (in, out) layout and casts to the MXU-native dtype.  Do this
    ONCE (weights are static parameters) and reuse the result for every call —
    do not pay the transpose/cast HBM pass per forward.
    """
    return jnp.asarray(w1.T, dtype=dtype), jnp.asarray(w2.T, dtype=dtype)


def _choose_tm(M, block_m):
    """Batch tile: MXU-friendly (256-multiple) and >=2 grid programs when M>=512
    so v7x's second TensorCore participates."""
    if M <= 256:
        return M                      # single full-extent block
    tm = -(-M // 2)                   # ceil(M/2): guarantee >= 2 programs
    tm = ((tm + 255) // 256) * 256    # round up to a 256-multiple
    return max(256, min(block_m, tm))


def net_forward_pallas(x, w1t, w2t, *, block_m=512):
    """Forward of Net: y = (x @ W1^T) @ W2^T (both Linear layers bias-free).

    x   : (M, K)  input batch (f32)
    w1t : (K, K)  first  weight, already transposed to (in, out) + cast (see
                  prepare_net_weights)
    w2t : (K, K)  second weight, already transposed to (in, out) + cast
    """
    M, K = x.shape
    assert w1t.shape == (K, K) and w2t.shape == (K, K)

    tm = _choose_tm(M, block_m)
    grid = (pl.cdiv(M, tm),)

    # Explicit VMEM budget (Mosaic pads K=911 -> 1024 lanes, tm -> mult. of 8):
    #   weights : single-buffered (Buffered(1)), 2 * 1024*1024 * itemsize
    #   x / out : double-buffered, 2 arrays * 2 bufs * tm * 1024 * 4 B
    #   hidden / casts : ~4 * tm * 1024 * 4 B of in-kernel values
    padded_k = pl.cdiv(K, 128) * 128
    tm_pad = pl.cdiv(tm, 8) * 8
    w_bytes = 2 * padded_k * padded_k * jnp.dtype(w1t.dtype).itemsize
    io_bytes = 2 * 2 * tm_pad * padded_k * jnp.dtype(x.dtype).itemsize
    scratch_bytes = 4 * tm_pad * padded_k * 4
    vmem_limit_bytes = min(56 * 1024 * 1024,
                           w_bytes + io_bytes + scratch_bytes + (6 << 20))

    return pl.pallas_call(
        _net_fwd_kernel,
        out_shape=jax.ShapeDtypeStruct((M, K), x.dtype),
        grid_spec=pltpu.PrefetchScalarGridSpec(
            num_scalar_prefetch=0,
            grid=grid,
            in_specs=[
                pl.BlockSpec((tm, K), lambda i: (i, 0)),      # x rows
                pl.BlockSpec((K, K), lambda i: (0, 0),        # W1^T, resident
                             pipeline_mode=pl.Buffered(1)),
                pl.BlockSpec((K, K), lambda i: (0, 0),        # W2^T, resident
                             pipeline_mode=pl.Buffered(1)),
            ],
            out_specs=pl.BlockSpec((tm, K), lambda i: (i, 0)),
        ),
        compiler_params=pltpu.CompilerParams(
            dimension_semantics=("parallel",),
            vmem_limit_bytes=vmem_limit_bytes,
        ),
    )(x, w1t, w2t)


if __name__ == "__main__":
    key = jax.random.PRNGKey(0)
    k_x, k_w1, k_w2 = jax.random.split(key, 3)

    K = 911          # input_size == k == 911 from the module
    batch = 2        # small batch

    x = jax.random.normal(k_x, (batch, K), dtype=jnp.float32)
    bound = 1.0 / float(K) ** 0.5  # nn.Linear default init scale
    w1 = jax.random.uniform(k_w1, (K, K), minval=-bound, maxval=bound,
                            dtype=jnp.float32)
    w2 = jax.random.uniform(k_w2, (K, K), minval=-bound, maxval=bound,
                            dtype=jnp.float32)

    # One-time weight prep (transpose + bf16 cast), reused across calls.
    w1t, w2t = prepare_net_weights(w1, w2)
    w1t, w2t = jax.block_until_ready((w1t, w2t))

    y = net_forward_pallas(x, w1t, w2t)
    y = jax.block_until_ready(y)

    # Reference: PyTorch Net.forward == x @ W1^T @ W2^T (full f32 semantics).
    h_ref = jnp.dot(x, w1.T, precision=lax.Precision.HIGHEST)
    y_ref = jnp.dot(h_ref, w2.T, precision=lax.Precision.HIGHEST)

    assert y.shape == (batch, K) and y.dtype == x.dtype
    err = float(jnp.max(jnp.abs(y - y_ref)))
    assert jnp.allclose(y, y_ref, atol=2e-2, rtol=2e-2), err

    print("KERNEL_OK")
</pallas_src>

<mosaic_0001>
module attributes {stable_mosaic.version = 11 : i64} {
  func.func @_net_fwd_kernel(%arg0: i32, %arg1: memref<2x911xf32, #tpu.memory_space<vmem>>, %arg2: memref<911x911xbf16, #tpu.memory_space<vmem>>, %arg3: memref<911x911xbf16, #tpu.memory_space<vmem>>, %arg4: memref<2x911xf32, #tpu.memory_space<vmem>>) attributes {dimension_semantics = [#tpu.dimension_semantics<parallel>], iteration_bounds = array<i64: 1>, scalar_prefetch = 0 : i64, scratch_operands = 0 : i64, tpu.core_type = #tpu.core_type<tc>, window_params = [{transform_indices = @transform_0, window_bounds = array<i64: 2, 911>}, {pipeline_mode = #tpu.pipeline_mode<synchronous>, transform_indices = @transform_1, window_bounds = array<i64: 911, 911>}, {pipeline_mode = #tpu.pipeline_mode<synchronous>, transform_indices = @transform_2, window_bounds = array<i64: 911, 911>}, {transform_indices = @transform_3, window_bounds = array<i64: 2, 911>}]} {
    %c0 = arith.constant 0 : index
    %c0_0 = arith.constant 0 : index
    %0 = vector.load %arg1[%c0, %c0_0] : memref<2x911xf32, #tpu.memory_space<vmem>>, vector<2x911xf32>
    %1 = arith.truncf %0 : vector<2x911xf32> to vector<2x911xbf16>
    %c0_1 = arith.constant 0 : index
    %c0_2 = arith.constant 0 : index
    %2 = vector.load %arg2[%c0_1, %c0_2] : memref<911x911xbf16, #tpu.memory_space<vmem>>, vector<911x911xbf16>
    %cst = arith.constant dense<0.000000e+00> : vector<2x911xf32>
    %3 = tpu.matmul %1, %2, %cst {dimension_numbers = #tpu.dot_dimension_numbers<[1], [0], [0], [1], [0, 0, 1, 1], [], []>} : vector<2x911xbf16>, vector<911x911xbf16>, vector<2x911xf32> -> vector<2x911xf32>
    %4 = arith.truncf %3 : vector<2x911xf32> to vector<2x911xbf16>
    %c0_3 = arith.constant 0 : index
    %c0_4 = arith.constant 0 : index
    %5 = vector.load %arg3[%c0_3, %c0_4] : memref<911x911xbf16, #tpu.memory_space<vmem>>, vector<911x911xbf16>
    %cst_5 = arith.constant dense<0.000000e+00> : vector<2x911xf32>
    %6 = tpu.matmul %4, %5, %cst_5 {dimension_numbers = #tpu.dot_dimension_numbers<[1], [0], [0], [1], [0, 0, 1, 1], [], []>} : vector<2x911xbf16>, vector<911x911xbf16>, vector<2x911xf32> -> vector<2x911xf32>
    %c0_6 = arith.constant 0 : index
    %c0_7 = arith.constant 0 : index
    %7 = vector.load %arg4[%c0_6, %c0_7] : memref<2x911xf32, #tpu.memory_space<vmem>>, vector<2x911xf32>
    tpu.vector_store %arg4[%c0_6, %c0_7], %6 {strides = array<i32>} : memref<2x911xf32, #tpu.memory_space<vmem>>, vector<2x911xf32>,
    return
  }
  func.func @transform_0(%arg0: i32) -> (i32, i32) {
    %c0_i32 = arith.constant 0 : i32
    %c0_i32_0 = arith.constant 0 : i32
    return %arg0, %c0_i32 : i32, i32
  }
  func.func @transform_1(%arg0: i32) -> (i32, i32) {
    %c0_i32 = arith.constant 0 : i32
    %c0_i32_0 = arith.constant 0 : i32
    %c0_i32_1 = arith.constant 0 : i32
    return %c0_i32, %c0_i32_0 : i32, i32
  }
  func.func @transform_2(%arg0: i32) -> (i32, i32) {
    %c0_i32 = arith.constant 0 : i32
    %c0_i32_0 = arith.constant 0 : i32
    %c0_i32_1 = arith.constant 0 : i32
    return %c0_i32, %c0_i32_0 : i32, i32
  }
  func.func @transform_3(%arg0: i32) -> (i32, i32) {
    %c0_i32 = arith.constant 0 : i32
    %c0_i32_0 = arith.constant 0 : i32
    return %arg0, %c0_i32 : i32, i32
  }
}

</mosaic_0001>

<bundles_post_ra>
// kernel: tpu_custom_call.1
= control target key start
LH: loop header
LB: loop body
LE: loop exit
PB: predicated region body
PF: predicated region fallthrough
CT: control target
= control target key end

     0   :  { %8 = vsyncpa [#allocation3], 0  ;;  %s8397_s0 = inlined_call_operand.hbm [shape: f32[2,911], index: 0, kind: input, shape index: {}]   ;;  %s8398_s1 = inlined_call_operand.hbm [shape: bf16[911,911], index: 1, kind: input, shape index: {}]   ;;  %s8399_s2 = inlined_call_operand.hbm [shape: bf16[911,911], index: 2, kind: input, shape index: {}]   ;;  %s8400_s3 = inlined_call_operand.hbm [shape: f32[2,911], index: 3, kind: output, shape index: {}]  }
   0x1   :  { %9 = vsyncpa [#allocation6], 0 }
   0x2   :  { %10 = vsyncpa [#allocation4], 0  ;;  %s8133_s12 = smov [#allocation5]   ;;  %s8039_s16 = scalar_lea.hbm %s8398_s1, 58368 }
   0x3   :  { %s26_s13 = sshll.u32 %s8133_s12, 4  ;;  %p8040_p0 = scmp.ne.s32.totalorder %s8398_s1, %s8039_s16  ;;  %s27_s13 = int_to_ptr.vmem [resolvable:$true] %s26_s13 }
   0x4   :  { %p8043_p1 = scmp.lt.u32.totalorder %s8039_s16, %s8398_s1 }
   0x6   :  { %p8045_p2 = pnand %p8043_p1, %p8040_p0 }
   0x8   :  { %8048 = shalt.err (!%p8045_p2)
}
   0x9   :  { %s8049_s21 = scalar_lea.vmem %s27_s13, 58368  ;;  %p8054_p4 = scmp.lt.s32.totalorder %s27_s13, %s27_s13 }
   0xa   :  { %p8050_p3 = scmp.ne.s32.totalorder %s27_s13, %s8049_s21  ;;  %p8055_p5 = scmp.lt.s32.totalorder %s8049_s21, %s8049_s21 }
   0xc   :  { %p8056_p6 = por %p8055_p5, %p8054_p4 }
   0xe   :  { %p8057_p7 = pnand %p8056_p6, %p8050_p3 }
  0x10   :  { %8060 = shalt.err (!%p8057_p7)
}
  0x11   :  { %s8134_s22 = smov 512   ;;  %s8135_s23 = smov 32  }
  0x12   :  { %32 = dma.hbm_to_vmem [thread:$0]  %s8398_s1, 58368, %s27_s13, [#allocation6], %s8134_s22, %s8134_s22, %s8135_s23  }
  0x13   :  { %s8136_s26 = smov [#allocation2]   ;;  %s8137_s28 = smov [#allocation7]  }
  0x14   :  { %s17_s27 = sshll.u32 %s8136_s26, 4  ;;  %s38_s29 = sshll.u32 %s8137_s28, 4  ;;  %s18_s27 = int_to_ptr.vmem [resolvable:$true] %s17_s27  ;;  %s39_s29 = int_to_ptr.vmem [resolvable:$true] %s38_s29 }
  0x15   :  { %s8061_s5 = scalar_lea.hbm %s8397_s0, 256 }
  0x16   :  { %p8062_p8 = scmp.ne.s32.totalorder %s8397_s0, %s8061_s5  ;;  %p8065_p9 = scmp.lt.u32.totalorder %s8061_s5, %s8397_s0 }
  0x18   :  { %p8067_p10 = pnand %p8065_p9, %p8062_p8 }
  0x1a   :  { %8070 = shalt.err (!%p8067_p10)
}
  0x1b   :  { %s8071_s1 = scalar_lea.vmem %s18_s27, 256  ;;  %p8076_p12 = scmp.lt.s32.totalorder %s18_s27, %s18_s27 }
  0x1c   :  { %p8072_p11 = scmp.ne.s32.totalorder %s18_s27, %s8071_s1  ;;  %p8077_p13 = scmp.lt.s32.totalorder %s8071_s1, %s8071_s1 }
  0x1e   :  { %p8078_p0 = por %p8077_p13, %p8076_p12 }
  0x20   :  { %p8079_p1 = pnand %p8078_p0, %p8072_p11 }
  0x22   :  { %8082 = shalt.err (!%p8079_p1)
}
  0x23   :  { %20 = dma.hbm_to_vmem [thread:$0]  %s8397_s0, 256, %s18_s27, [#allocation3]  }
  0x24   :  { %s8083_s14 = scalar_lea.hbm %s8399_s2, 58368 }
  0x25   :  { %p8084_p2 = scmp.ne.s32.totalorder %s8399_s2, %s8083_s14  ;;  %p8087_p3 = scmp.lt.u32.totalorder %s8083_s14, %s8399_s2 }
  0x27   :  { %p8089_p4 = pnand %p8087_p3, %p8084_p2 }
  0x29   :  { %8092 = shalt.err (!%p8089_p4)
}
  0x2a   :  { %s8093_s19 = scalar_lea.vmem %s39_s29, 58368  ;;  %p8098_p6 = scmp.lt.s32.totalorder %s39_s29, %s39_s29 }
  0x2b   :  { %p8094_p5 = scmp.ne.s32.totalorder %s39_s29, %s8093_s19  ;;  %p8099_p7 = scmp.lt.s32.totalorder %s8093_s19, %s8093_s19 }
  0x2d   :  { %p8100_p8 = por %p8099_p7, %p8098_p6 }
  0x2f   :  { %p8101_p9 = pnand %p8100_p8, %p8094_p5 }
  0x31   :  { %8104 = shalt.err (!%p8101_p9)
}
  0x32   :  { %44 = dma.hbm_to_vmem [thread:$0]  %s8399_s2, 58368, %s39_s29, [#allocation6], %s8134_s22, %s8134_s22, %s8135_s23  }
  0x33   :  { %8127 = dma.done.wait [#allocation3], 256  }
  0x34   :  { %8128 = vsyncadd [#allocation3], 4294967040 }
  0x35   :  { %8129 = dma.done.wait [#allocation6], 116736  }
  0x36   :  { %8130 = vsyncadd [#allocation6], 4294850560  ;;  %v109_v0 = vld [vmem:[#allocation5] sm:$0xff]  ;;  %v110_v2 = vld [vmem:[#allocation5 + $0x8] sm:$0xff]  ;;  %v8138_v32 = vmov 1983009808   ;;  %v63_v34 = vlaneseq }
  0x37   :  { %v113_v1 = vld [vmem:[#allocation5 + $0x20] sm:$0xff]  ;;  %v114_v4 = vld [vmem:[#allocation5 + $0x28] sm:$0xff]  ;;  %v61_v33 = vunpack.c.l.s4 %v8138_v32  ;;  %v8205_v59 = vld [vmem:[#allocation2] sm:$0xff]  ;;  %vm2837_vm0 = vcmask 121856   ;;  %vm2841_vm1 = vcmask 1046528   ;;  %vm2842_vm2 = vcmask 1047552  }
  0x38   :  { %v7014_v3 = vcombine.high %v109_v0, %v113_v1  ;;  %v7013_v5 = vcombine.low %v109_v0, %v113_v1  ;;  %v117_v6 = vld [vmem:[#allocation5 + $0x40] sm:$0xff]  ;;  %v7016_v8 = vcombine.high %v110_v2, %v114_v4  ;;  %v7015_v9 = vcombine.low %v110_v2, %v114_v4  ;;  %v118_v11 = vld [vmem:[#allocation5 + $0x48] sm:$0xff]  ;;  %s8140_s2 = smov [#allocation8]  }
  0x39   :  { %v121_v7 = vld [vmem:[#allocation5 + $0x60] sm:$0xff]  ;;  %v122_v12 = vld [vmem:[#allocation5 + $0x68] sm:$0xff]  ;;  %v62_v43 = vunpack.c.0.s8 %v61_v33  ;;  %v64_v44 = vshrl.u32 %v63_v34, 7  ;;  %vm6989_vm3 = vcmask 1041408   ;;  %vm6990_vm4 = vcmask 1043458   ;;  %s7003_s21 = sshll.u32 %s8140_s2, 4  ;;  %s7004_s21 = int_to_ptr.vmem [resolvable:$true] %s7003_s21 }
  0x3a   :  { %v7022_v10 = vcombine.high %v117_v6, %v121_v7  ;;  %v125_v13 = vld [vmem:[#allocation5 + $0x80] sm:$0xff]  ;;  %2869 = vmatprep.subr.bf16.mxu0 %v7014_v3  ;;  %v7024_v14 = vcombine.high %v118_v11, %v122_v12  ;;  %v126_v16 = vld [vmem:[#allocation5 + $0x88] sm:$0xff]  ;;  %3033 = vmatprep.subr.bf16.mxu1 %v7016_v8  ;;  %v7021_v18 = vcombine.low %v117_v6, %v121_v7  ;;  %vm6991_vm5 = vmor %vm6990_vm4, %vm6989_vm3  ;;  %vm6992_vm6 = vcmask 1045508   ;;  %s8105_s22 = scalar_lea.vmem %s7004_s21, 256  ;;  %p8110_p11 = scmp.lt.s32.totalorder %s7004_s21, %s7004_s21 }
  0x3b   :  { %v129_v15 = vld [vmem:[#allocation5 + $0xa0] sm:$0xff]  ;;  %v130_v17 = vld [vmem:[#allocation5 + $0xa8] sm:$0xff]  ;;  %2870 = vmatpush1.bf16.msra.mxu0 %v7013_v5  ;;  %3034 = vmatpush1.bf16.msra.mxu1 %v7015_v9  ;;  %v7023_v19 = vcombine.low %v118_v11, %v122_v12  ;;  %v8203_v53 = vsub.s32 %v62_v43, %v64_v44  ;;  %vm6993_vm7 = vmor %vm6992_vm6, %vm6991_vm5  ;;  %vm6994_vm8 = vcmask 121862   ;;  %p8106_p10 = scmp.ne.s32.totalorder %s7004_s21, %s8105_s22  ;;  %p8111_p12 = scmp.lt.s32.totalorder %s8105_s22, %s8105_s22 }
  0x3c   :  { %2871 = vmatprep.subr.bf16.mxu0 %v7022_v10  ;;  %v7030_v20 = vcombine.high %v125_v13, %v129_v15  ;;  %3035 = vmatprep.subr.bf16.mxu1 %v7024_v14  ;;  %v7032_v21 = vcombine.high %v126_v16, %v130_v17  ;;  %v133_v22 = vld [vmem:[#allocation5 + $0xc0] sm:$0xff]  ;;  %v134_v24 = vld [vmem:[#allocation5 + $0xc8] sm:$0xff]  ;;  %v7029_v26 = vcombine.low %v125_v13, %v129_v15  ;;  %vm6995_vm9 = vmor %vm6994_vm8, %vm6993_vm7 }
  0x3d   :  { %v137_v23 = vld [vmem:[#allocation5 + $0xe0] sm:$0xff]  ;;  %v138_v25 = vld [vmem:[#allocation5 + $0xe8] sm:$0xff]  ;;  %v7031_v27 = vcombine.low %v126_v16, %v130_v17  ;;  %v8209_v63 = vrot.slane %v8205_v59, %v8203_v53  ;;  %p8112_p13 = por %p8111_p12, %p8110_p11 }
  0x3e   :  { %v7038_v28 = vcombine.high %v133_v22, %v137_v23  ;;  %v7040_v29 = vcombine.high %v134_v24, %v138_v25  ;;  %v141_v30 = vld [vmem:[#allocation5 + $0x100] sm:$0xff]  ;;  %v142_v35 = vld [vmem:[#allocation5 + $0x108] sm:$0xff]  ;;  %v7037_v37 = vcombine.low %v133_v22, %v137_v23  ;;  %v7039_v38 = vcombine.low %v134_v24, %v138_v25 }
  0x3f   :  { %2872 = vmatpush1.bf16.msra.mxu0 %v7021_v18  ;;  %3036 = vmatpush1.bf16.msra.mxu1 %v7023_v19  ;;  %v145_v31 = vld [vmem:[#allocation5 + $0x120] sm:$0xff]  ;;  %v146_v36 = vld [vmem:[#allocation5 + $0x128] sm:$0xff]  ;;  %v74_v3 = vcombine.high %v8209_v63, %v8209_v63  ;;  %p8113_p0 = pnand %p8112_p13, %p8106_p10 }
  0x40   :  { %2873 = vmatprep.subr.bf16.mxu0 %v7030_v20  ;;  %3037 = vmatprep.subr.bf16.mxu1 %v7032_v21  ;;  %v7046_v39 = vcombine.high %v141_v30, %v145_v31  ;;  %v7048_v40 = vcombine.high %v142_v35, %v146_v36  ;;  %v149_v41 = vld [vmem:[#allocation5 + $0x140] sm:$0xff]  ;;  %v150_v45 = vld [vmem:[#allocation5 + $0x148] sm:$0xff]  ;;  %v7045_v47 = vcombine.low %v141_v30, %v145_v31 }
  0x41   :  { %v153_v42 = vld [vmem:[#allocation5 + $0x160] sm:$0xff]  ;;  %v154_v46 = vld [vmem:[#allocation5 + $0x168] sm:$0xff]  ;;  %v7047_v48 = vcombine.low %v142_v35, %v146_v36  ;;  %v8213_v9 = vpack.c.bf16 %v74_v3, %v74_v3 }
  0x42   :  { %v7054_v49 = vcombine.high %v149_v41, %v153_v42  ;;  %v7056_v50 = vcombine.high %v150_v45, %v154_v46  ;;  %v157_v51 = vld [vmem:[#allocation5 + $0x180] sm:$0xff]  ;;  %v158_v54 = vld [vmem:[#allocation5 + $0x188] sm:$0xff]  ;;  %v7053_v56 = vcombine.low %v149_v41, %v153_v42  ;;  %v7055_v57 = vcombine.low %v150_v45, %v154_v46 }
  0x43   :  { %2874 = vmatpush1.bf16.msra.mxu0 %v7029_v26  ;;  %3038 = vmatpush1.bf16.msra.mxu1 %v7031_v27  ;;  %v161_v52 = vld [vmem:[#allocation5 + $0x1a0] sm:$0xff]  ;;  %v162_v55 = vld [vmem:[#allocation5 + $0x1a8] sm:$0xff] }
  0x44   :  { %2875 = vmatprep.subr.bf16.mxu0 %v7038_v28  ;;  %3039 = vmatprep.subr.bf16.mxu1 %v7040_v29  ;;  %v7062_v58 = vcombine.high %v157_v51, %v161_v52  ;;  %v7064_v60 = vcombine.high %v158_v54, %v162_v55  ;;  %v165_v61 = vld [vmem:[#allocation5 + $0x1c0] sm:$0xff]  ;;  %v166_v0 = vld [vmem:[#allocation5 + $0x1c8] sm:$0xff]  ;;  %v7061_v2 = vcombine.low %v157_v51, %v161_v52 }
  0x45   :  { %v169_v62 = vld [vmem:[#allocation5 + $0x1e0] sm:$0xff]  ;;  %v170_v1 = vld [vmem:[#allocation5 + $0x1e8] sm:$0xff]  ;;  %v7063_v4 = vcombine.low %v158_v54, %v162_v55  ;;  %2901 = vmatprep.mubr.bf16.mxu0 %v8213_v9  ;;  %3065 = vmatprep.mubr.bf16.mxu1 %v8213_v9 }
  0x46   :  { %v7070_v5 = vcombine.high %v165_v61, %v169_v62  ;;  %v7072_v6 = vcombine.high %v166_v0, %v170_v1  ;;  %v173_v7 = vld [vmem:[#allocation5 + $0x200] sm:$0xff]  ;;  %v174_v10 = vld [vmem:[#allocation5 + $0x208] sm:$0xff]  ;;  %v7069_v12 = vcombine.low %v165_v61, %v169_v62  ;;  %v7071_v13 = vcombine.low %v166_v0, %v170_v1 }
  0x47   :  { %2876 = vmatpush1.bf16.msra.mxu0 %v7037_v37  ;;  %3040 = vmatpush1.bf16.msra.mxu1 %v7039_v38  ;;  %v177_v8 = vld [vmem:[#allocation5 + $0x220] sm:$0xff]  ;;  %v178_v11 = vld [vmem:[#allocation5 + $0x228] sm:$0xff] }
  0x48   :  { %2877 = vmatprep.subr.bf16.mxu0 %v7046_v39  ;;  %3041 = vmatprep.subr.bf16.mxu1 %v7048_v40  ;;  %v7078_v14 = vcombine.high %v173_v7, %v177_v8  ;;  %v7080_v15 = vcombine.high %v174_v10, %v178_v11  ;;  %v181_v16 = vld [vmem:[#allocation5 + $0x240] sm:$0xff]  ;;  %v182_v18 = vld [vmem:[#allocation5 + $0x248] sm:$0xff]  ;;  %v7077_v20 = vcombine.low %v173_v7, %v177_v8 }
  0x49   :  { %v185_v17 = vld [vmem:[#allocation5 + $0x260] sm:$0xff]  ;;  %v186_v19 = vld [vmem:[#allocation5 + $0x268] sm:$0xff]  ;;  %v7079_v21 = vcombine.low %v174_v10, %v178_v11 }
  0x4a   :  { %v7086_v22 = vcombine.high %v181_v16, %v185_v17  ;;  %v7088_v23 = vcombine.high %v182_v18, %v186_v19  ;;  %v189_v24 = vld [vmem:[#allocation5 + $0x280] sm:$0xff]  ;;  %v190_v26 = vld [vmem:[#allocation5 + $0x288] sm:$0xff]  ;;  %v7085_v28 = vcombine.low %v181_v16, %v185_v17  ;;  %v7087_v29 = vcombine.low %v182_v18, %v186_v19 }
  0x4b   :  { %2878 = vmatpush1.bf16.msra.mxu0 %v7045_v47  ;;  %3042 = vmatpush1.bf16.msra.mxu1 %v7047_v48  ;;  %v193_v25 = vld [vmem:[#allocation5 + $0x2a0] sm:$0xff]  ;;  %v194_v27 = vld [vmem:[#allocation5 + $0x2a8] sm:$0xff] }
  0x4c   :  { %2879 = vmatprep.subr.bf16.mxu0 %v7054_v49  ;;  %3043 = vmatprep.subr.bf16.mxu1 %v7056_v50  ;;  %v7094_v30 = vcombine.high %v189_v24, %v193_v25  ;;  %v7096_v31 = vcombine.high %v190_v26, %v194_v27  ;;  %v197_v32 = vld [vmem:[#allocation5 + $0x2c0] sm:$0xff]  ;;  %v198_v34 = vld [vmem:[#allocation5 + $0x2c8] sm:$0xff]  ;;  %v7093_v36 = vcombine.low %v189_v24, %v193_v25 }
  0x4d   :  { %v201_v33 = vld [vmem:[#allocation5 + $0x2e0] sm:$0xff]  ;;  %v202_v35 = vld [vmem:[#allocation5 + $0x2e8] sm:$0xff]  ;;  %v7095_v37 = vcombine.low %v190_v26, %v194_v27  ;;  %v8226_v24 = vpack.c.bf16 %v8209_v63, %v8209_v63 }
  0x4e   :  { %v7102_v38 = vcombine.high %v197_v32, %v201_v33  ;;  %v7104_v39 = vcombine.high %v198_v34, %v202_v35  ;;  %v205_v40 = vld [vmem:[#allocation5 + $0x300] sm:$0xff]  ;;  %v206_v42 = vld [vmem:[#allocation5 + $0x308] sm:$0xff]  ;;  %v7101_v44 = vcombine.low %v197_v32, %v201_v33  ;;  %v7103_v45 = vcombine.low %v198_v34, %v202_v35 }
  0x4f   :  { %2880 = vmatpush1.bf16.msra.mxu0 %v7053_v56  ;;  %3044 = vmatpush1.bf16.msra.mxu1 %v7055_v57  ;;  %v209_v41 = vld [vmem:[#allocation5 + $0x320] sm:$0xff]  ;;  %v210_v43 = vld [vmem:[#allocation5 + $0x328] sm:$0xff] }
  0x50   :  { %2881 = vmatprep.subr.bf16.mxu0 %v7062_v58  ;;  %3045 = vmatprep.subr.bf16.mxu1 %v7064_v60  ;;  %v7110_v46 = vcombine.high %v205_v40, %v209_v41  ;;  %v7112_v47 = vcombine.high %v206_v42, %v210_v43  ;;  %v213_v48 = vld [vmem:[#allocation5 + $0x340] sm:$0xff]  ;;  %v214_v50 = vld [vmem:[#allocation5 + $0x348] sm:$0xff]  ;;  %v7109_v52 = vcombine.low %v205_v40, %v209_v41 }
  0x51   :  { %v217_v49 = vld [vmem:[#allocation5 + $0x360] sm:$0xff]  ;;  %v218_v51 = vld [vmem:[#allocation5 + $0x368] sm:$0xff]  ;;  %v7111_v54 = vcombine.low %v206_v42, %v210_v43 }
  0x52   :  { %v7118_v55 = vcombine.high %v213_v48, %v217_v49  ;;  %v7120_v56 = vcombine.high %v214_v50, %v218_v51  ;;  %v221_v57 = vld [vmem:[#allocation5 + $0x380] sm:$0xff]  ;;  %v222_v60 = vld [vmem:[#allocation5 + $0x388] sm:$0xff]  ;;  %v7117_v62 = vcombine.low %v213_v48, %v217_v49  ;;  %v7119_v0 = vcombine.low %v214_v50, %v218_v51 }
  0x53   :  { %2882 = vmatpush1.bf16.msra.mxu0 %v7061_v2  ;;  %3046 = vmatpush1.bf16.msra.mxu1 %v7063_v4  ;;  %v225_v58 = vld [vmem:[#allocation5 + $0x3a0] sm:$0xff]  ;;  %v226_v61 = vld [vmem:[#allocation5 + $0x3a8] sm:$0xff] }
  0x54   :  { %2883 = vmatprep.subr.bf16.mxu0 %v7070_v5  ;;  %3047 = vmatprep.subr.bf16.mxu1 %v7072_v6  ;;  %v7126_v1 = vcombine.high %v221_v57, %v225_v58  ;;  %v7128_v2 = vcombine.high %v222_v60, %v226_v61  ;;  %v229_v3 = vld [vmem:[#allocation5 + $0x3c0] sm:$0xff]  ;;  %v59_v5 = vcombine.high %v8205_v59, %v8205_v59  ;;  %v230_v6 = vld [vmem:[#allocation5 + $0x3c8] sm:$0xff] }
  0x55   :  { %v233_v4 = vld [vmem:[#allocation5 + $0x3e0] sm:$0xff]  ;;  %v234_v7 = vld [vmem:[#allocation5 + $0x3e8] sm:$0xff]  ;;  %v7125_v8 = vcombine.low %v221_v57, %v225_v58  ;;  %v7127_v10 = vcombine.low %v222_v60, %v226_v61 }
  0x56   :  { %v7134_v11 = vcombine.high %v229_v3, %v233_v4  ;;  %v238_v16 = vld [vmem:[#allocation5 + $0x408] sm:$0xff]  ;;  %v7133_v18 = vcombine.low %v229_v3, %v233_v4  ;;  %v7135_v59 = vcombine.low %v230_v6, %v234_v7  ;;  %v257_v32 = vld [vmem:[#allocation5 + $0x4a0] sm:$0xff] }
  0x57   :  { %2884 = vmatpush1.bf16.msra.mxu0 %v7069_v12  ;;  %3048 = vmatpush1.bf16.msra.mxu1 %v7071_v13  ;;  %v7136_v12 = vcombine.high %v230_v6, %v234_v7  ;;  %v237_v13 = vld [vmem:[#allocation5 + $0x400] sm:$0xff]  ;;  %v242_v17 = vld [vmem:[#allocation5 + $0x428] sm:$0xff] }
  0x58   :  { %2885 = vmatprep.subr.bf16.mxu0 %v7078_v14  ;;  %3049 = vmatprep.subr.bf16.mxu1 %v7080_v15  ;;  %v241_v14 = vld [vmem:[#allocation5 + $0x420] sm:$0xff]  ;;  %v8220_v15 = vrot.slane %v59_v5, %v8203_v53  ;;  %v246_v25 = vld [vmem:[#allocation5 + $0x448] sm:$0xff] }
  0x59   :  { %v7142_v19 = vcombine.high %v237_v13, %v241_v14  ;;  %v250_v26 = vld [vmem:[#allocation5 + $0x468] sm:$0xff]  ;;  %v7141_v27 = vcombine.low %v237_v13, %v241_v14  ;;  %v265_v40 = vld [vmem:[#allocation5 + $0x4e0] sm:$0xff] }
  0x5a   :  { %v254_v34 = vld [vmem:[#allocation5 + $0x488] sm:$0xff]  ;;  %v273_v48 = vld [vmem:[#allocation5 + $0x520] sm:$0xff] }
  0x5b   :  { %2886 = vmatpush1.bf16.msra.mxu0 %v7077_v20  ;;  %3050 = vmatpush1.bf16.msra.mxu1 %v7079_v21  ;;  %v7144_v20 = vcombine.high %v238_v16, %v242_v17  ;;  %v245_v21 = vld [vmem:[#allocation5 + $0x440] sm:$0xff]  ;;  %v258_v35 = vld [vmem:[#allocation5 + $0x4a8] sm:$0xff] }
  0x5c   :  { %2887 = vmatprep.subr.bf16.mxu0 %v7086_v22  ;;  %3051 = vmatprep.subr.bf16.mxu1 %v7088_v23  ;;  %v249_v22 = vld [vmem:[#allocation5 + $0x460] sm:$0xff]  ;;  %v75_v23 = vcombine.high %v8220_v15, %v8220_v15  ;;  %v262_v41 = vld [vmem:[#allocation5 + $0x4c8] sm:$0xff] }
  0x5d   :  { %v7149_v63 = vcombine.low %v245_v21, %v249_v22  ;;  %v266_v42 = vld [vmem:[#allocation5 + $0x4e8] sm:$0xff]  ;;  %v281_v57 = vld [vmem:[#allocation5 + $0x560] sm:$0xff] }
  0x5e   :  { %v8228_v33 = vpack.c.bf16 %v75_v23, %v75_v23  ;;  %v270_v49 = vld [vmem:[#allocation5 + $0x508] sm:$0xff]  ;;  %v289_v3 = vld [vmem:[#allocation5 + $0x5a0] sm:$0xff] }
  0x5f   :  { %2888 = vmatpush1.bf16.msra.mxu0 %v7085_v28  ;;  %3052 = vmatpush1.bf16.msra.mxu1 %v7087_v29  ;;  %v7143_v28 = vcombine.low %v238_v16, %v242_v17  ;;  %v7150_v29 = vcombine.high %v245_v21, %v249_v22  ;;  %v274_v50 = vld [vmem:[#allocation5 + $0x528] sm:$0xff] }
  0x60   :  { %2889 = vmatprep.subr.bf16.mxu0 %v7094_v30  ;;  %3053 = vmatprep.subr.bf16.mxu1 %v7096_v31  ;;  %v7152_v30 = vcombine.high %v246_v25, %v250_v26  ;;  %v253_v31 = vld [vmem:[#allocation5 + $0x480] sm:$0xff]  ;;  %v278_v58 = vld [vmem:[#allocation5 + $0x548] sm:$0xff] }
  0x61   :  { %v7157_v43 = vcombine.low %v253_v31, %v257_v32  ;;  %v282_v60 = vld [vmem:[#allocation5 + $0x568] sm:$0xff] }
  0x62   :  { %v286_v4 = vld [vmem:[#allocation5 + $0x588] sm:$0xff]  ;;  %v7183_v7 = vcombine.low %v278_v58, %v282_v60 }
  0x63   :  { %2890 = vmatpush1.bf16.msra.mxu0 %v7093_v36  ;;  %3054 = vmatpush1.bf16.msra.mxu1 %v7095_v37  ;;  %v7151_v36 = vcombine.low %v246_v25, %v250_v26  ;;  %v7158_v37 = vcombine.high %v253_v31, %v257_v32  ;;  %v290_v5 = vld [vmem:[#allocation5 + $0x5a8] sm:$0xff] }
  0x64   :  { %2891 = vmatprep.subr.bf16.mxu0 %v7102_v38  ;;  %3055 = vmatprep.subr.bf16.mxu1 %v7104_v39  ;;  %v7160_v38 = vcombine.high %v254_v34, %v258_v35  ;;  %v261_v39 = vld [vmem:[#allocation5 + $0x4c0] sm:$0xff]  ;;  %v294_v13 = vld [vmem:[#allocation5 + $0x5c8] sm:$0xff]  ;;  %v7191_v17 = vcombine.low %v286_v4, %v290_v5 }
  0x65   :  { %v7165_v51 = vcombine.low %v261_v39, %v265_v40  ;;  %v298_v14 = vld [vmem:[#allocation5 + $0x5e8] sm:$0xff] }
  0x66   :  { %v302_v21 = vld [vmem:[#allocation5 + $0x608] sm:$0xff]  ;;  %v7199_v25 = vcombine.low %v294_v13, %v298_v14 }
  0x67   :  { %2892 = vmatpush1.bf16.msra.mxu0 %v7101_v44  ;;  %3056 = vmatpush1.bf16.msra.mxu1 %v7103_v45  ;;  %v7159_v44 = vcombine.low %v254_v34, %v258_v35  ;;  %v7166_v45 = vcombine.high %v261_v39, %v265_v40  ;;  %v306_v22 = vld [vmem:[#allocation5 + $0x628] sm:$0xff] }
  0x68   :  { %2893 = vmatprep.subr.bf16.mxu0 %v7110_v46  ;;  %3057 = vmatprep.subr.bf16.mxu1 %v7112_v47  ;;  %v7168_v46 = vcombine.high %v262_v41, %v266_v42  ;;  %v269_v47 = vld [vmem:[#allocation5 + $0x500] sm:$0xff]  ;;  %v314_v31 = vld [vmem:[#allocation5 + $0x668] sm:$0xff]  ;;  %v7207_v34 = vcombine.low %v302_v21, %v306_v22 }
  0x69   :  { %v7173_v61 = vcombine.low %v269_v47, %v273_v48  ;;  %v322_v39 = vld [vmem:[#allocation5 + $0x6a8] sm:$0xff] }
  0x6b   :  { %2894 = vmatpush1.bf16.msra.mxu0 %v7109_v52  ;;  %3058 = vmatpush1.bf16.msra.mxu1 %v7111_v54  ;;  %v7167_v52 = vcombine.low %v262_v41, %v266_v42  ;;  %v7174_v54 = vcombine.high %v269_v47, %v273_v48  ;;  %v330_v47 = vld [vmem:[#allocation5 + $0x6e8] sm:$0xff] }
  0x6c   :  { %2895 = vmatprep.subr.bf16.mxu0 %v7118_v55  ;;  %3059 = vmatprep.subr.bf16.mxu1 %v7120_v56  ;;  %v7176_v55 = vcombine.high %v270_v49, %v274_v50  ;;  %v277_v56 = vld [vmem:[#allocation5 + $0x540] sm:$0xff] }
  0x6d   :  { %v7181_v6 = vcombine.low %v277_v56, %v281_v57 }
  0x6f   :  { %2896 = vmatpush1.bf16.msra.mxu0 %v7117_v62  ;;  %3060 = vmatpush1.bf16.msra.mxu1 %v7119_v0  ;;  %v7175_v62 = vcombine.low %v270_v49, %v274_v50  ;;  %v7182_v0 = vcombine.high %v277_v56, %v281_v57  ;;  %v338_v56 = vld [vmem:[#allocation5 + $0x728] sm:$0xff] }
  0x70   :  { %2897 = vmatprep.subr.bf16.mxu0 %v7126_v1  ;;  %3061 = vmatprep.subr.bf16.mxu1 %v7128_v2  ;;  %v7184_v1 = vcombine.high %v278_v58, %v282_v60  ;;  %v285_v2 = vld [vmem:[#allocation5 + $0x580] sm:$0xff] }
  0x71   :  { %v7189_v16 = vcombine.low %v285_v2, %v289_v3 }
  0x73   :  { %2898 = vmatpush1.bf16.msra.mxu0 %v7125_v8  ;;  %3062 = vmatpush1.bf16.msra.mxu1 %v7127_v10  ;;  %v7190_v8 = vcombine.high %v285_v2, %v289_v3  ;;  %v7192_v10 = vcombine.high %v286_v4, %v290_v5  ;;  %v346_v2 = vld [vmem:[#allocation5 + $0x768] sm:$0xff] }
  0x74   :  { %2899 = vmatprep.subr.bf16.mxu0 %v7134_v11  ;;  %3063 = vmatprep.subr.bf16.mxu1 %v7136_v12  ;;  %v293_v11 = vld [vmem:[#allocation5 + $0x5c0] sm:$0xff] }
  0x75   :  { %v297_v12 = vld [vmem:[#allocation5 + $0x5e0] sm:$0xff] }
  0x76   :  { %v7197_v23 = vcombine.low %v293_v11, %v297_v12 }
  0x77   :  { %2900 = vmatpush1.bf16.msra.mxu0 %v7133_v18  ;;  %3064 = vmatpush1.bf16.msra.mxu1 %v7135_v59  ;;  %v7198_v18 = vcombine.high %v293_v11, %v297_v12  ;;  %v7200_v59 = vcombine.high %v294_v13, %v298_v14  ;;  %v354_v11 = vld [vmem:[#allocation5 + $0x7a8] sm:$0xff] }
  0x78   :  { %2910 = vmatprep.subr.bf16.mxu0 %v7142_v19  ;;  %3074 = vmatprep.subr.bf16.mxu1 %v7144_v20  ;;  %v301_v19 = vld [vmem:[#allocation5 + $0x600] sm:$0xff] }
  0x79   :  { %v305_v20 = vld [vmem:[#allocation5 + $0x620] sm:$0xff] }
  0x7a   :  { %2902 = vmatmul.mubr.bf16.vlgmr.msra.gmra.mrb[0].mxu0 %v8226_v24  ;;  %3066 = vmatmul.mubr.bf16.vlgmr.msra.gmra.mrb[0].mxu1 %v8226_v24  ;;  %v7206_v26 = vcombine.high %v301_v19, %v305_v20  ;;  %v7205_v32 = vcombine.low %v301_v19, %v305_v20  ;;  %v362_v19 = vld [vmem:[#allocation5 + $0x7e8] sm:$0xff]  ;;  %v8234_v20 = vld [vmem:[#allocation2 + $0x8] sm:$0xff] }
  0x7b   :  { %2911 = vmatpush1.bf16.msra.mxu0 %v7141_v27  ;;  %3075 = vmatpush1.bf16.msra.mxu1 %v7143_v28  ;;  %v7208_v27 = vcombine.high %v302_v21, %v306_v22  ;;  %v309_v28 = vld [vmem:[#allocation5 + $0x640] sm:$0xff] }
  0x7c   :  { %2912 = vmatprep.subr.bf16.mxu0 %v7150_v29  ;;  %3076 = vmatprep.subr.bf16.mxu1 %v7152_v30  ;;  %v313_v29 = vld [vmem:[#allocation5 + $0x660] sm:$0xff]  ;;  %v310_v30 = vld [vmem:[#allocation5 + $0x648] sm:$0xff] }
  0x7d   :  { %2942 = vmatprep.mubr.bf16.mxu0 %v8228_v33  ;;  %3106 = vmatprep.mubr.bf16.mxu1 %v8228_v33  ;;  %v7214_v35 = vcombine.high %v309_v28, %v313_v29  ;;  %v7213_v40 = vcombine.low %v309_v28, %v313_v29  ;;  %v7215_v41 = vcombine.low %v310_v30, %v314_v31  ;;  %v366_v29 = vld [vmem:[#allocation5 + $0x808] sm:$0xff] }
  0x7e   :  { %v8238_v28 = vrot.slane %v8234_v20, %v8203_v53 }
  0x7f   :  { %2913 = vmatpush1.bf16.msra.mxu0 %v7149_v63  ;;  %3077 = vmatpush1.bf16.msra.mxu1 %v7151_v36  ;;  %v7216_v63 = vcombine.high %v310_v30, %v314_v31  ;;  %v317_v36 = vld [vmem:[#allocation5 + $0x680] sm:$0xff]  ;;  %v370_v30 = vld [vmem:[#allocation5 + $0x828] sm:$0xff] }
  0x80   :  { %2914 = vmatprep.subr.bf16.mxu0 %v7158_v37  ;;  %3078 = vmatprep.subr.bf16.mxu1 %v7160_v38  ;;  %v321_v37 = vld [vmem:[#allocation5 + $0x6a0] sm:$0xff]  ;;  %v318_v38 = vld [vmem:[#allocation5 + $0x688] sm:$0xff] }
  0x81   :  { %v7222_v42 = vcombine.high %v317_v36, %v321_v37  ;;  %v7221_v48 = vcombine.low %v317_v36, %v321_v37  ;;  %v7223_v49 = vcombine.low %v318_v38, %v322_v39  ;;  %v377_v36 = vld [vmem:[#allocation5 + $0x860] sm:$0xff]  ;;  %v91_v37 = vcombine.high %v8238_v28, %v8238_v28 }
  0x83   :  { %2915 = vmatpush1.bf16.msra.mxu0 %v7157_v43  ;;  %3079 = vmatpush1.bf16.msra.mxu1 %v7159_v44  ;;  %v7224_v43 = vcombine.high %v318_v38, %v322_v39  ;;  %v325_v44 = vld [vmem:[#allocation5 + $0x6c0] sm:$0xff]  ;;  %v8244_v38 = vpack.c.bf16 %v8220_v15, %v8220_v15  ;;  %v374_v39 = vld [vmem:[#allocation5 + $0x848] sm:$0xff] }
  0x84   :  { %2916 = vmatprep.subr.bf16.mxu0 %v7166_v45  ;;  %3080 = vmatprep.subr.bf16.mxu1 %v7168_v46  ;;  %v329_v45 = vld [vmem:[#allocation5 + $0x6e0] sm:$0xff]  ;;  %v326_v46 = vld [vmem:[#allocation5 + $0x6c8] sm:$0xff] }
  0x85   :  { %v7230_v50 = vcombine.high %v325_v44, %v329_v45  ;;  %v7229_v57 = vcombine.low %v325_v44, %v329_v45  ;;  %v7231_v58 = vcombine.low %v326_v46, %v330_v47  ;;  %v381_v45 = vld [vmem:[#allocation5 + $0x880] sm:$0xff] }
  0x87   :  { %2917 = vmatpush1.bf16.msra.mxu0 %v7165_v51  ;;  %3081 = vmatpush1.bf16.msra.mxu1 %v7167_v52  ;;  %v7232_v51 = vcombine.high %v326_v46, %v330_v47  ;;  %v333_v52 = vld [vmem:[#allocation5 + $0x700] sm:$0xff]  ;;  %v8246_v47 = vpack.c.bf16 %v91_v37, %v91_v37 }
  0x88   :  { %2918 = vmatprep.subr.bf16.mxu0 %v7174_v54  ;;  %3082 = vmatprep.subr.bf16.mxu1 %v7176_v55  ;;  %v337_v54 = vld [vmem:[#allocation5 + $0x720] sm:$0xff]  ;;  %v334_v55 = vld [vmem:[#allocation5 + $0x708] sm:$0xff] }
  0x89   :  { %v7238_v60 = vcombine.high %v333_v52, %v337_v54  ;;  %v7237_v3 = vcombine.low %v333_v52, %v337_v54  ;;  %v7239_v4 = vcombine.low %v334_v55, %v338_v56  ;;  %v385_v46 = vld [vmem:[#allocation5 + $0x8a0] sm:$0xff] }
  0x8a   :  { %v389_v54 = vld [vmem:[#allocation5 + $0x8c0] sm:$0xff] }
  0x8b   :  { %2919 = vmatpush1.bf16.msra.mxu0 %v7173_v61  ;;  %3083 = vmatpush1.bf16.msra.mxu1 %v7175_v62  ;;  %v7240_v61 = vcombine.high %v334_v55, %v338_v56  ;;  %v341_v62 = vld [vmem:[#allocation5 + $0x740] sm:$0xff]  ;;  %v390_v56 = vld [vmem:[#allocation5 + $0x8c8] sm:$0xff] }
  0x8c   :  { %2920 = vmatprep.subr.bf16.mxu0 %v7182_v0  ;;  %3084 = vmatprep.subr.bf16.mxu1 %v7184_v1  ;;  %v345_v0 = vld [vmem:[#allocation5 + $0x760] sm:$0xff]  ;;  %v342_v1 = vld [vmem:[#allocation5 + $0x748] sm:$0xff] }
  0x8d   :  { %v7246_v5 = vcombine.high %v341_v62, %v345_v0  ;;  %v7245_v12 = vcombine.low %v341_v62, %v345_v0  ;;  %v7247_v13 = vcombine.low %v342_v1, %v346_v2  ;;  %v393_v55 = vld [vmem:[#allocation5 + $0x8e0] sm:$0xff] }
  0x8e   :  { %v397_v0 = vld [vmem:[#allocation5 + $0x900] sm:$0xff] }
  0x8f   :  { %2921 = vmatpush1.bf16.msra.mxu0 %v7181_v6  ;;  %3085 = vmatpush1.bf16.msra.mxu1 %v7183_v7  ;;  %v7248_v6 = vcombine.high %v342_v1, %v346_v2  ;;  %v349_v7 = vld [vmem:[#allocation5 + $0x780] sm:$0xff]  ;;  %v398_v2 = vld [vmem:[#allocation5 + $0x908] sm:$0xff] }
  0x90   :  { %2922 = vmatprep.subr.bf16.mxu0 %v7190_v8  ;;  %3086 = vmatprep.subr.bf16.mxu1 %v7192_v10  ;;  %v353_v8 = vld [vmem:[#allocation5 + $0x7a0] sm:$0xff]  ;;  %v350_v10 = vld [vmem:[#allocation5 + $0x788] sm:$0xff] }
  0x91   :  { %v7254_v14 = vcombine.high %v349_v7, %v353_v8  ;;  %v7253_v21 = vcombine.low %v349_v7, %v353_v8  ;;  %v7255_v22 = vcombine.low %v350_v10, %v354_v11  ;;  %v401_v1 = vld [vmem:[#allocation5 + $0x920] sm:$0xff] }
  0x92   :  { %v405_v8 = vld [vmem:[#allocation5 + $0x940] sm:$0xff] }
  0x93   :  { %2923 = vmatpush1.bf16.msra.mxu0 %v7189_v16  ;;  %3087 = vmatpush1.bf16.msra.mxu1 %v7191_v17  ;;  %v7256_v16 = vcombine.high %v350_v10, %v354_v11  ;;  %v357_v17 = vld [vmem:[#allocation5 + $0x7c0] sm:$0xff]  ;;  %v406_v11 = vld [vmem:[#allocation5 + $0x948] sm:$0xff] }
  0x94   :  { %2924 = vmatprep.subr.bf16.mxu0 %v7198_v18  ;;  %3088 = vmatprep.subr.bf16.mxu1 %v7200_v59  ;;  %v361_v18 = vld [vmem:[#allocation5 + $0x7e0] sm:$0xff]  ;;  %v358_v59 = vld [vmem:[#allocation5 + $0x7c8] sm:$0xff] }
  0x95   :  { %v7261_v31 = vcombine.low %v357_v17, %v361_v18  ;;  %v409_v10 = vld [vmem:[#allocation5 + $0x960] sm:$0xff] }
  0x96   :  { %v433_v37 = vld [vmem:[#allocation5 + $0xa20] sm:$0xff] }
  0x97   :  { %2925 = vmatpush1.bf16.msra.mxu0 %v7197_v23  ;;  %3089 = vmatpush1.bf16.msra.mxu1 %v7199_v25  ;;  %v7262_v23 = vcombine.high %v357_v17, %v361_v18  ;;  %v7264_v25 = vcombine.high %v358_v59, %v362_v19  ;;  %v413_v18 = vld [vmem:[#allocation5 + $0x980] sm:$0xff] }
  0x98   :  { %2926 = vmatprep.subr.bf16.mxu0 %v7206_v26  ;;  %3090 = vmatprep.subr.bf16.mxu1 %v7208_v27  ;;  %v365_v26 = vld [vmem:[#allocation5 + $0x800] sm:$0xff] }
  0x99   :  { %v369_v27 = vld [vmem:[#allocation5 + $0x820] sm:$0xff] }
  0x9b   :  { %2927 = vmatpush1.bf16.msra.mxu0 %v7205_v32  ;;  %3091 = vmatpush1.bf16.msra.mxu1 %v7207_v34  ;;  %v7263_v32 = vcombine.low %v358_v59, %v362_v19  ;;  %v7270_v34 = vcombine.high %v365_v26, %v369_v27  ;;  %v417_v59 = vld [vmem:[#allocation5 + $0x9a0] sm:$0xff]  ;;  %v414_v19 = vld [vmem:[#allocation5 + $0x988] sm:$0xff] }
  0x9c   :  { %2928 = vmatprep.subr.bf16.mxu0 %v7214_v35  ;;  %3092 = vmatprep.subr.bf16.mxu1 %v7216_v63  ;;  %v7272_v35 = vcombine.high %v366_v29, %v370_v30  ;;  %v373_v63 = vld [vmem:[#allocation5 + $0x840] sm:$0xff] }
  0x9d   :  { %v7277_v15 = vcombine.low %v373_v63, %v377_v36 }
  0x9f   :  { %2929 = vmatpush1.bf16.msra.mxu0 %v7213_v40  ;;  %3093 = vmatpush1.bf16.msra.mxu1 %v7215_v41  ;;  %v378_v40 = vld [vmem:[#allocation5 + $0x868] sm:$0xff]  ;;  %v7269_v41 = vcombine.low %v365_v26, %v369_v27  ;;  %v421_v27 = vld [vmem:[#allocation5 + $0x9c0] sm:$0xff] }
  0xa0   :  { %2930 = vmatprep.subr.bf16.mxu0 %v7222_v42  ;;  %3094 = vmatprep.subr.bf16.mxu1 %v7224_v43  ;;  %v7271_v42 = vcombine.low %v366_v29, %v370_v30  ;;  %v7278_v43 = vcombine.high %v373_v63, %v377_v36  ;;  %v7280_v44 = vcombine.high %v374_v39, %v378_v40  ;;  %v425_v29 = vld [vmem:[#allocation5 + $0x9e0] sm:$0xff]  ;;  %v422_v30 = vld [vmem:[#allocation5 + $0x9c8] sm:$0xff] }
  0xa1   :  { %v429_v36 = vld [vmem:[#allocation5 + $0xa00] sm:$0xff] }
  0xa3   :  { %2931 = vmatpush1.bf16.msra.mxu0 %v7221_v48  ;;  %3095 = vmatpush1.bf16.msra.mxu1 %v7223_v49  ;;  %v382_v48 = vld [vmem:[#allocation5 + $0x888] sm:$0xff] }
  0xa4   :  { %2932 = vmatprep.subr.bf16.mxu0 %v7230_v50  ;;  %3096 = vmatprep.subr.bf16.mxu1 %v7232_v51  ;;  %v386_v49 = vld [vmem:[#allocation5 + $0x8a8] sm:$0xff]  ;;  %v7279_v50 = vcombine.low %v374_v39, %v378_v40  ;;  %v7286_v51 = vcombine.high %v381_v45, %v385_v46 }
  0xa5   :  { %v7288_v52 = vcombine.high %v382_v48, %v386_v49  ;;  %v430_v39 = vld [vmem:[#allocation5 + $0xa08] sm:$0xff] }
  0xa6   :  { %v434_v40 = vld [vmem:[#allocation5 + $0xa28] sm:$0xff] }
  0xa7   :  { %2933 = vmatpush1.bf16.msra.mxu0 %v7229_v57  ;;  %3097 = vmatpush1.bf16.msra.mxu1 %v7231_v58  ;;  %v394_v57 = vld [vmem:[#allocation5 + $0x8e8] sm:$0xff]  ;;  %v7285_v58 = vcombine.low %v381_v45, %v385_v46  ;;  %v437_v45 = vld [vmem:[#allocation5 + $0xa40] sm:$0xff] }
  0xa8   :  { %2934 = vmatprep.subr.bf16.mxu0 %v7238_v60  ;;  %3098 = vmatprep.subr.bf16.mxu1 %v7240_v61  ;;  %v7287_v60 = vcombine.low %v382_v48, %v386_v49  ;;  %v7294_v61 = vcombine.high %v389_v54, %v393_v55  ;;  %v7296_v62 = vcombine.high %v390_v56, %v394_v57  ;;  %v441_v46 = vld [vmem:[#allocation5 + $0xa60] sm:$0xff]  ;;  %v438_v48 = vld [vmem:[#allocation5 + $0xa48] sm:$0xff] }
  0xa9   :  { %v442_v49 = vld [vmem:[#allocation5 + $0xa68] sm:$0xff] }
  0xab   :  { %2935 = vmatpush1.bf16.msra.mxu0 %v7237_v3  ;;  %3099 = vmatpush1.bf16.msra.mxu1 %v7239_v4  ;;  %v402_v3 = vld [vmem:[#allocation5 + $0x928] sm:$0xff]  ;;  %v7293_v4 = vcombine.low %v389_v54, %v393_v55  ;;  %v445_v54 = vld [vmem:[#allocation5 + $0xa80] sm:$0xff] }
  0xac   :  { %2936 = vmatprep.subr.bf16.mxu0 %v7246_v5  ;;  %3100 = vmatprep.subr.bf16.mxu1 %v7248_v6  ;;  %v7295_v5 = vcombine.low %v390_v56, %v394_v57  ;;  %v7302_v6 = vcombine.high %v397_v0, %v401_v1  ;;  %v7304_v7 = vcombine.high %v398_v2, %v402_v3  ;;  %v449_v55 = vld [vmem:[#allocation5 + $0xaa0] sm:$0xff]  ;;  %v446_v56 = vld [vmem:[#allocation5 + $0xa88] sm:$0xff] }
  0xad   :  { %v450_v57 = vld [vmem:[#allocation5 + $0xaa8] sm:$0xff] }
  0xaf   :  { %2937 = vmatpush1.bf16.msra.mxu0 %v7245_v12  ;;  %3101 = vmatpush1.bf16.msra.mxu1 %v7247_v13  ;;  %v410_v12 = vld [vmem:[#allocation5 + $0x968] sm:$0xff]  ;;  %v7301_v13 = vcombine.low %v397_v0, %v401_v1  ;;  %v453_v0 = vld [vmem:[#allocation5 + $0xac0] sm:$0xff] }
  0xb0   :  { %2938 = vmatprep.subr.bf16.mxu0 %v7254_v14  ;;  %3102 = vmatprep.subr.bf16.mxu1 %v7256_v16  ;;  %v7303_v14 = vcombine.low %v398_v2, %v402_v3  ;;  %v7310_v16 = vcombine.high %v405_v8, %v409_v10  ;;  %v7312_v17 = vcombine.high %v406_v11, %v410_v12  ;;  %v457_v1 = vld [vmem:[#allocation5 + $0xae0] sm:$0xff]  ;;  %v454_v2 = vld [vmem:[#allocation5 + $0xac8] sm:$0xff] }
  0xb1   :  { %v458_v3 = vld [vmem:[#allocation5 + $0xae8] sm:$0xff] }
  0xb3   :  { %2939 = vmatpush1.bf16.msra.mxu0 %v7253_v21  ;;  %3103 = vmatpush1.bf16.msra.mxu1 %v7255_v22  ;;  %v418_v21 = vld [vmem:[#allocation5 + $0x9a8] sm:$0xff]  ;;  %v7309_v22 = vcombine.low %v405_v8, %v409_v10  ;;  %v461_v8 = vld [vmem:[#allocation5 + $0xb00] sm:$0xff] }
  0xb4   :  { %2940 = vmatprep.subr.bf16.mxu0 %v7262_v23  ;;  %3104 = vmatprep.subr.bf16.mxu1 %v7264_v25  ;;  %v7311_v23 = vcombine.low %v406_v11, %v410_v12  ;;  %v7318_v25 = vcombine.high %v413_v18, %v417_v59  ;;  %v7320_v26 = vcombine.high %v414_v19, %v418_v21  ;;  %v465_v10 = vld [vmem:[#allocation5 + $0xb20] sm:$0xff]  ;;  %v462_v11 = vld [vmem:[#allocation5 + $0xb08] sm:$0xff] }
  0xb5   :  { %v466_v12 = vld [vmem:[#allocation5 + $0xb28] sm:$0xff] }
  0xb7   :  { %2941 = vmatpush1.bf16.msra.mxu0 %v7261_v31  ;;  %3105 = vmatpush1.bf16.msra.mxu1 %v7263_v32  ;;  %v426_v31 = vld [vmem:[#allocation5 + $0x9e8] sm:$0xff]  ;;  %v7317_v32 = vcombine.low %v413_v18, %v417_v59  ;;  %v469_v18 = vld [vmem:[#allocation5 + $0xb40] sm:$0xff] }
  0xb8   :  { %2951 = vmatprep.subr.bf16.mxu0 %v7270_v34  ;;  %3115 = vmatprep.subr.bf16.mxu1 %v7272_v35  ;;  %v7319_v34 = vcombine.low %v414_v19, %v418_v21  ;;  %v7326_v35 = vcombine.high %v421_v27, %v425_v29  ;;  %v7328_v63 = vcombine.high %v422_v30, %v426_v31  ;;  %v473_v59 = vld [vmem:[#allocation5 + $0xb60] sm:$0xff]  ;;  %v470_v19 = vld [vmem:[#allocation5 + $0xb48] sm:$0xff] }
  0xb9   :  { %v474_v21 = vld [vmem:[#allocation5 + $0xb68] sm:$0xff] }
  0xba   :  { %2943 = vmatmul.mubr.bf16.vlgmr.msra.gmra.mrb[0].mxu0 %v8244_v38  ;;  %3107 = vmatmul.mubr.bf16.vlgmr.msra.gmra.mrb[0].mxu1 %v8244_v38 }
  0xbb   :  { %2952 = vmatpush1.bf16.msra.mxu0 %v7269_v41  ;;  %3116 = vmatpush1.bf16.msra.mxu1 %v7271_v42  ;;  %v7325_v41 = vcombine.low %v421_v27, %v425_v29  ;;  %v7327_v42 = vcombine.low %v422_v30, %v426_v31  ;;  %v477_v27 = vld [vmem:[#allocation5 + $0xb80] sm:$0xff]  ;;  %v478_v30 = vld [vmem:[#allocation5 + $0xb88] sm:$0xff] }
  0xbc   :  { %2953 = vmatprep.subr.bf16.mxu0 %v7278_v43  ;;  %3117 = vmatprep.subr.bf16.mxu1 %v7280_v44  ;;  %v7334_v43 = vcombine.high %v429_v36, %v433_v37  ;;  %v7336_v44 = vcombine.high %v430_v39, %v434_v40  ;;  %v481_v29 = vld [vmem:[#allocation5 + $0xba0] sm:$0xff]  ;;  %v482_v31 = vld [vmem:[#allocation5 + $0xba8] sm:$0xff] }
  0xbd   :  { %2983 = vmatprep.mubr.bf16.mxu0 %v8246_v47  ;;  %3147 = vmatprep.mubr.bf16.mxu1 %v8246_v47 }
  0xbf   :  { %2954 = vmatpush1.bf16.msra.mxu0 %v7277_v15  ;;  %3118 = vmatpush1.bf16.msra.mxu1 %v7279_v50  ;;  %v7333_v15 = vcombine.low %v429_v36, %v433_v37  ;;  %v7335_v50 = vcombine.low %v430_v39, %v434_v40  ;;  %v485_v36 = vld [vmem:[#allocation5 + $0xbc0] sm:$0xff]  ;;  %v76_v39 = vcombine.high %v8234_v20, %v8234_v20  ;;  %v486_v40 = vld [vmem:[#allocation5 + $0xbc8] sm:$0xff] }
  0xc0   :  { %2955 = vmatprep.subr.bf16.mxu0 %v7286_v51  ;;  %3119 = vmatprep.subr.bf16.mxu1 %v7288_v52  ;;  %v7342_v51 = vcombine.high %v437_v45, %v441_v46  ;;  %v7344_v52 = vcombine.high %v438_v48, %v442_v49  ;;  %v489_v37 = vld [vmem:[#allocation5 + $0xbe0] sm:$0xff] }
  0xc3   :  { %2956 = vmatpush1.bf16.msra.mxu0 %v7285_v58  ;;  %3120 = vmatpush1.bf16.msra.mxu1 %v7287_v60  ;;  %v7341_v58 = vcombine.low %v437_v45, %v441_v46  ;;  %v7343_v60 = vcombine.low %v438_v48, %v442_v49  ;;  %v493_v46 = vld [vmem:[#allocation5 + $0xc00] sm:$0xff]  ;;  %v8255_v49 = vrot.slane %v76_v39, %v8203_v53 }
  0xc4   :  { %2957 = vmatprep.subr.bf16.mxu0 %v7294_v61  ;;  %3121 = vmatprep.subr.bf16.mxu1 %v7296_v62  ;;  %v7350_v61 = vcombine.high %v445_v54, %v449_v55  ;;  %v7352_v62 = vcombine.high %v446_v56, %v450_v57  ;;  %v497_v48 = vld [vmem:[#allocation5 + $0xc20] sm:$0xff] }
  0xc7   :  { %2958 = vmatpush1.bf16.msra.mxu0 %v7293_v4  ;;  %3122 = vmatpush1.bf16.msra.mxu1 %v7295_v5  ;;  %v7349_v4 = vcombine.low %v445_v54, %v449_v55  ;;  %v7351_v5 = vcombine.low %v446_v56, %v450_v57  ;;  %v501_v55 = vld [vmem:[#allocation5 + $0xc40] sm:$0xff]  ;;  %v92_v57 = vcombine.high %v8255_v49, %v8255_v49 }
  0xc8   :  { %2959 = vmatprep.subr.bf16.mxu0 %v7302_v6  ;;  %3123 = vmatprep.subr.bf16.mxu1 %v7304_v7  ;;  %v7358_v6 = vcombine.high %v453_v0, %v457_v1  ;;  %v7360_v7 = vcombine.high %v454_v2, %v458_v3  ;;  %v505_v56 = vld [vmem:[#allocation5 + $0xc60] sm:$0xff] }
  0xcb   :  { %2960 = vmatpush1.bf16.msra.mxu0 %v7301_v13  ;;  %3124 = vmatpush1.bf16.msra.mxu1 %v7303_v14  ;;  %v7357_v13 = vcombine.low %v453_v0, %v457_v1  ;;  %v7359_v14 = vcombine.low %v454_v2, %v458_v3  ;;  %v7406_v1 = vcombine.high %v501_v55, %v505_v56  ;;  %v509_v3 = vld [vmem:[#allocation5 + $0xc80] sm:$0xff] }
  0xcc   :  { %2961 = vmatprep.subr.bf16.mxu0 %v7310_v16  ;;  %3125 = vmatprep.subr.bf16.mxu1 %v7312_v17  ;;  %v7366_v16 = vcombine.high %v461_v8, %v465_v10  ;;  %v7368_v17 = vcombine.high %v462_v11, %v466_v12 }
  0xcf   :  { %2962 = vmatpush1.bf16.msra.mxu0 %v7309_v22  ;;  %3126 = vmatpush1.bf16.msra.mxu1 %v7311_v23  ;;  %v7365_v22 = vcombine.low %v461_v8, %v465_v10  ;;  %v7367_v23 = vcombine.low %v462_v11, %v466_v12  ;;  %v517_v12 = vld [vmem:[#allocation5 + $0xcc0] sm:$0xff] }
  0xd0   :  { %2963 = vmatprep.subr.bf16.mxu0 %v7318_v25  ;;  %3127 = vmatprep.subr.bf16.mxu1 %v7320_v26  ;;  %v7374_v25 = vcombine.high %v469_v18, %v473_v59  ;;  %v7376_v26 = vcombine.high %v470_v19, %v474_v21 }
  0xd3   :  { %2964 = vmatpush1.bf16.msra.mxu0 %v7317_v32  ;;  %3128 = vmatpush1.bf16.msra.mxu1 %v7319_v34  ;;  %v7373_v32 = vcombine.low %v469_v18, %v473_v59  ;;  %v7375_v34 = vcombine.low %v470_v19, %v474_v21  ;;  %v525_v21 = vld [vmem:[#allocation5 + $0xd00] sm:$0xff] }
  0xd4   :  { %2965 = vmatprep.subr.bf16.mxu0 %v7326_v35  ;;  %3129 = vmatprep.subr.bf16.mxu1 %v7328_v63  ;;  %v7382_v35 = vcombine.high %v477_v27, %v481_v29  ;;  %v7384_v63 = vcombine.high %v478_v30, %v482_v31 }
  0xd7   :  { %2966 = vmatpush1.bf16.msra.mxu0 %v7325_v41  ;;  %3130 = vmatpush1.bf16.msra.mxu1 %v7327_v42  ;;  %v490_v41 = vld [vmem:[#allocation5 + $0xbe8] sm:$0xff]  ;;  %v7381_v42 = vcombine.low %v477_v27, %v481_v29 }
  0xd8   :  { %2967 = vmatprep.subr.bf16.mxu0 %v7334_v43  ;;  %3131 = vmatprep.subr.bf16.mxu1 %v7336_v44  ;;  %v7383_v43 = vcombine.low %v478_v30, %v482_v31  ;;  %v7390_v44 = vcombine.high %v485_v36, %v489_v37  ;;  %v7392_v45 = vcombine.high %v486_v40, %v490_v41  ;;  %v533_v31 = vld [vmem:[#allocation5 + $0xd40] sm:$0xff] }
  0xd9   :  { %v7391_v20 = vcombine.low %v486_v40, %v490_v41  ;;  %v541_v40 = vld [vmem:[#allocation5 + $0xd80] sm:$0xff] }
  0xda   :  { %v545_v41 = vld [vmem:[#allocation5 + $0xda0] sm:$0xff] }
  0xdb   :  { %2968 = vmatpush1.bf16.msra.mxu0 %v7333_v15  ;;  %3132 = vmatpush1.bf16.msra.mxu1 %v7335_v50  ;;  %v494_v15 = vld [vmem:[#allocation5 + $0xc08] sm:$0xff] }
  0xdc   :  { %2969 = vmatprep.subr.bf16.mxu0 %v7342_v51  ;;  %3133 = vmatprep.subr.bf16.mxu1 %v7344_v52  ;;  %v498_v50 = vld [vmem:[#allocation5 + $0xc28] sm:$0xff]  ;;  %v7389_v51 = vcombine.low %v485_v36, %v489_v37  ;;  %v7398_v52 = vcombine.high %v493_v46, %v497_v48 }
  0xdd   :  { %v7400_v54 = vcombine.high %v494_v15, %v498_v50  ;;  %v7399_v0 = vcombine.low %v494_v15, %v498_v50  ;;  %v553_v15 = vld [vmem:[#allocation5 + $0xde0] sm:$0xff] }
  0xdf   :  { %2970 = vmatpush1.bf16.msra.mxu0 %v7341_v58  ;;  %3134 = vmatpush1.bf16.msra.mxu1 %v7343_v60  ;;  %v8261_v58 = vpack.c.bf16 %v8238_v28, %v8238_v28  ;;  %v502_v60 = vld [vmem:[#allocation5 + $0xc48] sm:$0xff]  ;;  %v7405_v28 = vcombine.low %v501_v55, %v505_v56  ;;  %v8139_v55 = vmov 65535  }
  0xe0   :  { %2971 = vmatprep.subr.bf16.mxu0 %v7350_v61  ;;  %3135 = vmatprep.subr.bf16.mxu1 %v7352_v62  ;;  %v506_v61 = vld [vmem:[#allocation5 + $0xc68] sm:$0xff]  ;;  %v7397_v62 = vcombine.low %v493_v46, %v497_v48  ;;  %v7446_v46 = vcombine.high %v541_v40, %v545_v41  ;;  %v549_v48 = vld [vmem:[#allocation5 + $0xdc0] sm:$0xff]  ;;  %v2843_v56 = vsel %vm2841_vm1, 4294967295, %v8139_v55 }
  0xe1   :  { %v7408_v2 = vcombine.high %v502_v60, %v506_v61  ;;  %v7407_v8 = vcombine.low %v502_v60, %v506_v61  ;;  %v562_v60 = vld [vmem:[#allocation5 + $0xe28] sm:$0xff]  ;;  %v7445_v61 = vcombine.low %v541_v40, %v545_v41  ;;  %v135_v40 = vld [vmem:[#allocation5 + $0xd0] sm:$0xff] }
  0xe2   :  { %v139_v41 = vld [vmem:[#allocation5 + $0xf0] sm:$0xff] }
  0xe3   :  { %2972 = vmatpush1.bf16.msra.mxu0 %v7349_v4  ;;  %3136 = vmatpush1.bf16.msra.mxu1 %v7351_v5  ;;  %v513_v4 = vld [vmem:[#allocation5 + $0xca0] sm:$0xff]  ;;  %v8263_v5 = vpack.c.bf16 %v92_v57, %v92_v57  ;;  %v558_v57 = vld [vmem:[#allocation5 + $0xe08] sm:$0xff] }
  0xe4   :  { %2973 = vmatprep.subr.bf16.mxu0 %v7358_v6  ;;  %3137 = vmatprep.subr.bf16.mxu1 %v7360_v7  ;;  %v510_v6 = vld [vmem:[#allocation5 + $0xc88] sm:$0xff]  ;;  %v7414_v10 = vcombine.high %v509_v3, %v513_v4 }
  0xe5   :  { %v514_v7 = vld [vmem:[#allocation5 + $0xca8] sm:$0xff] }
  0xe6   :  { %v7416_v11 = vcombine.high %v510_v6, %v514_v7  ;;  %v7415_v18 = vcombine.low %v510_v6, %v514_v7  ;;  %v7453_v6 = vcombine.low %v549_v48, %v553_v15 }
  0xe7   :  { %2974 = vmatpush1.bf16.msra.mxu0 %v7357_v13  ;;  %3138 = vmatpush1.bf16.msra.mxu1 %v7359_v14  ;;  %v521_v13 = vld [vmem:[#allocation5 + $0xce0] sm:$0xff]  ;;  %v518_v14 = vld [vmem:[#allocation5 + $0xcc8] sm:$0xff] }
  0xe8   :  { %2975 = vmatprep.subr.bf16.mxu0 %v7366_v16  ;;  %3139 = vmatprep.subr.bf16.mxu1 %v7368_v17  ;;  %v522_v16 = vld [vmem:[#allocation5 + $0xce8] sm:$0xff]  ;;  %v7413_v17 = vcombine.low %v509_v3, %v513_v4  ;;  %v7422_v59 = vcombine.high %v517_v12, %v521_v13  ;;  %v8271_v3 = vsel %vm2842_vm2, %v2843_v56, 0  ;;  %v7464_v4 = vcombine.high %v558_v57, %v562_v60  ;;  %v151_v56 = vld [vmem:[#allocation5 + $0x150] sm:$0xff] }
  0xe9   :  { %v7424_v19 = vcombine.high %v518_v14, %v522_v16  ;;  %v7423_v27 = vcombine.low %v518_v14, %v522_v16  ;;  %v112_v14 = vld [vmem:[#allocation5 + $0x18] sm:$0xff] }
  0xea   :  { %v116_v16 = vld [vmem:[#allocation5 + $0x38] sm:$0xff] }
  0xeb   :  { %2976 = vmatpush1.bf16.msra.mxu0 %v7365_v22  ;;  %3140 = vmatpush1.bf16.msra.mxu1 %v7367_v23  ;;  %v529_v22 = vld [vmem:[#allocation5 + $0xd20] sm:$0xff]  ;;  %v526_v23 = vld [vmem:[#allocation5 + $0xd08] sm:$0xff] }
  0xec   :  { %2977 = vmatprep.subr.bf16.mxu0 %v7374_v25  ;;  %3141 = vmatprep.subr.bf16.mxu1 %v7376_v26  ;;  %v530_v25 = vld [vmem:[#allocation5 + $0xd28] sm:$0xff]  ;;  %v7421_v26 = vcombine.low %v517_v12, %v521_v13  ;;  %v7430_v29 = vcombine.high %v525_v21, %v529_v22  ;;  %v111_v12 = vld [vmem:[#allocation5 + $0x10] sm:$0xff] }
  0xed   :  { %v7432_v30 = vcombine.high %v526_v23, %v530_v25  ;;  %v7431_v36 = vcombine.low %v526_v23, %v530_v25  ;;  %v115_v13 = vld [vmem:[#allocation5 + $0x30] sm:$0xff]  ;;  %v8279_v23 = vpack.c.bf16 %v8255_v49, %v8255_v49  ;;  %v120_v25 = vld [vmem:[#allocation5 + $0x58] sm:$0xff] }
  0xef   :  { %2978 = vmatpush1.bf16.msra.mxu0 %v7373_v32  ;;  %3142 = vmatpush1.bf16.msra.mxu1 %v7375_v34  ;;  %v537_v32 = vld [vmem:[#allocation5 + $0xd60] sm:$0xff]  ;;  %v534_v34 = vld [vmem:[#allocation5 + $0xd48] sm:$0xff] }
  0xf0   :  { %2979 = vmatprep.subr.bf16.mxu0 %v7382_v35  ;;  %3143 = vmatprep.subr.bf16.mxu1 %v7384_v63  ;;  %v538_v35 = vld [vmem:[#allocation5 + $0xd68] sm:$0xff]  ;;  %v7429_v63 = vcombine.low %v525_v21, %v529_v22  ;;  %v7438_v37 = vcombine.high %v533_v31, %v537_v32  ;;  %v119_v21 = vld [vmem:[#allocation5 + $0x50] sm:$0xff] }
  0xf1   :  { %v7440_v39 = vcombine.high %v534_v34, %v538_v35  ;;  %v123_v22 = vld [vmem:[#allocation5 + $0x70] sm:$0xff] }
  0xf2   :  { %v7025_v49 = vcombine.low %v119_v21, %v123_v22 }
  0xf3   :  { %2980 = vmatpush1.bf16.msra.mxu0 %v7381_v42  ;;  %3144 = vmatpush1.bf16.msra.mxu1 %v7383_v43  ;;  %v542_v42 = vld [vmem:[#allocation5 + $0xd88] sm:$0xff] }
  0xf4   :  { %2981 = vmatprep.subr.bf16.mxu0 %v7390_v44  ;;  %3145 = vmatprep.subr.bf16.mxu1 %v7392_v45  ;;  %v546_v43 = vld [vmem:[#allocation5 + $0xda8] sm:$0xff]  ;;  %v7437_v44 = vcombine.low %v533_v31, %v537_v32  ;;  %v7439_v45 = vcombine.low %v534_v34, %v538_v35  ;;  %v127_v32 = vld [vmem:[#allocation5 + $0x90] sm:$0xff]  ;;  %v128_v35 = vld [vmem:[#allocation5 + $0x98] sm:$0xff] }
  0xf5   :  { %v7448_v50 = vcombine.high %v542_v42, %v546_v43  ;;  %v131_v34 = vld [vmem:[#allocation5 + $0xb0] sm:$0xff] }
  0xf7   :  { %2982 = vmatpush1.bf16.msra.mxu0 %v7389_v51  ;;  %3146 = vmatpush1.bf16.msra.mxu1 %v7391_v20  ;;  %v550_v51 = vld [vmem:[#allocation5 + $0xdc8] sm:$0xff]  ;;  %v557_v20 = vld [vmem:[#allocation5 + $0xe00] sm:$0xff] }
  0xf8   :  { %2992 = vmatprep.subr.bf16.mxu0 %v7398_v52  ;;  %3156 = vmatprep.subr.bf16.mxu1 %v7400_v54  ;;  %v561_v52 = vld [vmem:[#allocation5 + $0xe20] sm:$0xff]  ;;  %v554_v54 = vld [vmem:[#allocation5 + $0xde8] sm:$0xff] }
  0xf9   :  { %v7461_v7 = vcombine.low %v557_v20, %v561_v52 }
  0xfa   :  { %2984 = vmatmul.mubr.bf16.vlgmr.msra.gmra.mrb[0].mxu0 %v8261_v58  ;;  %3148 = vmatmul.mubr.bf16.vlgmr.msra.gmra.mrb[0].mxu1 %v8261_v58 }
  0xfb   :  { %2993 = vmatpush1.bf16.msra.mxu0 %v7397_v62  ;;  %3157 = vmatpush1.bf16.msra.mxu1 %v7399_v0  ;;  %v7447_v62 = vcombine.low %v542_v42, %v546_v43  ;;  %v7454_v0 = vcombine.high %v549_v48, %v553_v15  ;;  %v136_v42 = vld [vmem:[#allocation5 + $0xd8] sm:$0xff]  ;;  %v143_v15 = vld [vmem:[#allocation5 + $0x110] sm:$0xff] }
  0xfc   :  { %2994 = vmatprep.subr.bf16.mxu0 %v7406_v1  ;;  %3158 = vmatprep.subr.bf16.mxu1 %v7408_v2  ;;  %v7462_v1 = vcombine.high %v557_v20, %v561_v52  ;;  %v7456_v2 = vcombine.high %v550_v51, %v554_v54  ;;  %v140_v43 = vld [vmem:[#allocation5 + $0xf8] sm:$0xff]  ;;  %v7041_v52 = vcombine.low %v135_v40, %v139_v41 }
  0xfd   :  { %7469 = vmatprep.mubr.msk.bf16.mxu0 %vm2837_vm0, %v8263_v5  ;;  %7470 = vmatprep.mubr.msk.bf16.mxu1 %vm2837_vm0, %v8263_v5  ;;  %v7044_v48 = vcombine.high %v136_v42, %v140_v43  ;;  %v148_v20 = vld [vmem:[#allocation5 + $0x138] sm:$0xff] }
  0xff   :  { %2995 = vmatpush1.bf16.msra.mxu0 %v7405_v28  ;;  %3159 = vmatpush1.bf16.msra.mxu1 %v7407_v8  ;;  %v7455_v28 = vcombine.low %v550_v51, %v554_v54  ;;  %v2849_v8 = vand.u32 %v7462_v1, %v8271_v3  ;;  %v144_v51 = vld [vmem:[#allocation5 + $0x118] sm:$0xff]  ;;  %v7043_v54 = vcombine.low %v136_v42, %v140_v43  ;;  %v195_v42 = vld [vmem:[#allocation5 + $0x2b0] sm:$0xff] }
 0x100   :  { %2996 = vmatprep.subr.bf16.mxu0 %v7414_v10  ;;  %3160 = vmatprep.subr.bf16.mxu1 %v7416_v11  ;;  %v7463_v10 = vcombine.low %v558_v57, %v562_v60  ;;  %v2855_v11 = vand.u32 %v7464_v4, %v8271_v3  ;;  %v155_v57 = vld [vmem:[#allocation5 + $0x170] sm:$0xff]  ;;  %v152_v60 = vld [vmem:[#allocation5 + $0x158] sm:$0xff] }
 0x101   :  { %v7058_v1 = vcombine.high %v151_v56, %v155_v57  ;;  %v159_v4 = vld [vmem:[#allocation5 + $0x190] sm:$0xff]  ;;  %v192_v43 = vld [vmem:[#allocation5 + $0x298] sm:$0xff] }
 0x103   :  { %2997 = vmatpush1.bf16.msra.mxu0 %v7413_v17  ;;  %3161 = vmatpush1.bf16.msra.mxu1 %v7415_v18  ;;  %v2846_v17 = vand.u32 %v7461_v7, %v8271_v3  ;;  %v2852_v18 = vand.u32 %v7463_v10, %v8271_v3  ;;  %v160_v7 = vld [vmem:[#allocation5 + $0x198] sm:$0xff] }
 0x104   :  { %2998 = vmatprep.subr.bf16.mxu0 %v7422_v59  ;;  %3162 = vmatprep.subr.bf16.mxu1 %v7424_v19  ;;  %v7018_v59 = vcombine.high %v111_v12, %v115_v13  ;;  %v7020_v19 = vcombine.high %v112_v14, %v116_v16 }
 0x107   :  { %2999 = vmatpush1.bf16.msra.mxu0 %v7421_v26  ;;  %3163 = vmatpush1.bf16.msra.mxu1 %v7423_v27  ;;  %v124_v26 = vld [vmem:[#allocation5 + $0x78] sm:$0xff]  ;;  %v7017_v27 = vcombine.low %v111_v12, %v115_v13  ;;  %v167_v13 = vld [vmem:[#allocation5 + $0x1d0] sm:$0xff] }
 0x108   :  { %3000 = vmatprep.subr.bf16.mxu0 %v7430_v29  ;;  %3164 = vmatprep.subr.bf16.mxu1 %v7432_v30  ;;  %v7019_v29 = vcombine.low %v112_v14, %v116_v16  ;;  %v7026_v30 = vcombine.high %v119_v21, %v123_v22  ;;  %v7028_v31 = vcombine.high %v120_v25, %v124_v26  ;;  %v171_v14 = vld [vmem:[#allocation5 + $0x1f0] sm:$0xff]  ;;  %v168_v16 = vld [vmem:[#allocation5 + $0x1d8] sm:$0xff] }
 0x109   :  { %v175_v22 = vld [vmem:[#allocation5 + $0x210] sm:$0xff] }
 0x10b   :  { %3001 = vmatpush1.bf16.msra.mxu0 %v7429_v63  ;;  %3165 = vmatpush1.bf16.msra.mxu1 %v7431_v36  ;;  %v132_v63 = vld [vmem:[#allocation5 + $0xb8] sm:$0xff]  ;;  %v7027_v36 = vcombine.low %v120_v25, %v124_v26  ;;  %v179_v25 = vld [vmem:[#allocation5 + $0x230] sm:$0xff] }
 0x10c   :  { %3002 = vmatprep.subr.bf16.mxu0 %v7438_v37  ;;  %3166 = vmatprep.subr.bf16.mxu1 %v7440_v39  ;;  %v7034_v37 = vcombine.high %v127_v32, %v131_v34  ;;  %v7036_v39 = vcombine.high %v128_v35, %v132_v63  ;;  %v176_v26 = vld [vmem:[#allocation5 + $0x218] sm:$0xff] }
 0x10f   :  { %3003 = vmatpush1.bf16.msra.mxu0 %v7437_v44  ;;  %3167 = vmatpush1.bf16.msra.mxu1 %v7439_v45  ;;  %v7033_v44 = vcombine.low %v127_v32, %v131_v34  ;;  %v7035_v45 = vcombine.low %v128_v35, %v132_v63  ;;  %v183_v34 = vld [vmem:[#allocation5 + $0x250] sm:$0xff]  ;;  %v184_v63 = vld [vmem:[#allocation5 + $0x258] sm:$0xff] }
 0x110   :  { %3004 = vmatprep.subr.bf16.mxu0 %v7446_v46  ;;  %3168 = vmatprep.subr.bf16.mxu1 %v7448_v50  ;;  %v7042_v46 = vcombine.high %v135_v40, %v139_v41  ;;  %v147_v50 = vld [vmem:[#allocation5 + $0x130] sm:$0xff] }
 0x111   :  { %v7050_v55 = vcombine.high %v143_v15, %v147_v50  ;;  %v187_v35 = vld [vmem:[#allocation5 + $0x270] sm:$0xff] }
 0x112   :  { %v191_v41 = vld [vmem:[#allocation5 + $0x290] sm:$0xff] }
 0x113   :  { %3005 = vmatpush1.bf16.msra.mxu0 %v7445_v61  ;;  %3169 = vmatpush1.bf16.msra.mxu1 %v7447_v62  ;;  %v156_v61 = vld [vmem:[#allocation5 + $0x178] sm:$0xff]  ;;  %v7049_v62 = vcombine.low %v143_v15, %v147_v50  ;;  %v199_v50 = vld [vmem:[#allocation5 + $0x2d0] sm:$0xff] }
 0x114   :  { %3006 = vmatprep.subr.bf16.mxu0 %v7454_v0  ;;  %3170 = vmatprep.subr.bf16.mxu1 %v7456_v2  ;;  %v7051_v0 = vcombine.low %v144_v51, %v148_v20  ;;  %v7060_v2 = vcombine.high %v152_v60, %v156_v61  ;;  %v7059_v10 = vcombine.low %v152_v60, %v156_v61  ;;  %v211_v60 = vld [vmem:[#allocation5 + $0x330] sm:$0xff]  ;;  %v208_v61 = vld [vmem:[#allocation5 + $0x318] sm:$0xff] }
 0x117   :  { %3007 = vmatpush1.bf16.msra.mxu0 %v7453_v6  ;;  %3171 = vmatpush1.bf16.msra.mxu1 %v7455_v28  ;;  %v163_v6 = vld [vmem:[#allocation5 + $0x1b0] sm:$0xff]  ;;  %v164_v28 = vld [vmem:[#allocation5 + $0x1b8] sm:$0xff] }
 0x118   :  { %3008 = vmatprep.subr.bf16.mxu0 %v2849_v8  ;;  %3172 = vmatprep.subr.bf16.mxu1 %v2855_v11  ;;  %v7057_v8 = vcombine.low %v151_v56, %v155_v57  ;;  %v7066_v11 = vcombine.high %v159_v4, %v163_v6  ;;  %v7068_v12 = vcombine.high %v160_v7, %v164_v28  ;;  %v207_v57 = vld [vmem:[#allocation5 + $0x310] sm:$0xff] }
 0x11b   :  { %3009 = vmatpush1.bf16.msra.mxu0 %v2846_v17  ;;  %3173 = vmatpush1.bf16.msra.mxu1 %v2852_v18  ;;  %v172_v17 = vld [vmem:[#allocation5 + $0x1f8] sm:$0xff]  ;;  %v7065_v18 = vcombine.low %v159_v4, %v163_v6  ;;  %v215_v6 = vld [vmem:[#allocation5 + $0x350] sm:$0xff] }
 0x11c   :  { %3197 = vmatprep.subr.bf16.mxu0 %v7018_v59  ;;  %3361 = vmatprep.subr.bf16.mxu1 %v7020_v19  ;;  %v7067_v59 = vcombine.low %v160_v7, %v164_v28  ;;  %v7074_v19 = vcombine.high %v167_v13, %v171_v14  ;;  %v7076_v21 = vcombine.high %v168_v16, %v172_v17  ;;  %v219_v7 = vld [vmem:[#allocation5 + $0x370] sm:$0xff]  ;;  %v216_v28 = vld [vmem:[#allocation5 + $0x358] sm:$0xff] }
 0x11e   :  { %3025 = vmatmul.mubr.bf16.vlgmr.msra.gmra.mrb[0].mxu0 %v8279_v23  ;;  %3189 = vmatmul.mubr.bf16.vlgmr.msra.gmra.mrb[0].mxu1 %v8279_v23 }
 0x11f   :  { %3198 = vmatpush1.bf16.msra.mxu0 %v7017_v27  ;;  %3362 = vmatpush1.bf16.msra.mxu1 %v7019_v29  ;;  %v180_v27 = vld [vmem:[#allocation5 + $0x238] sm:$0xff]  ;;  %v7073_v29 = vcombine.low %v167_v13, %v171_v14  ;;  %v223_v14 = vld [vmem:[#allocation5 + $0x390] sm:$0xff] }
 0x120   :  { %3199 = vmatprep.subr.bf16.mxu0 %v7026_v30  ;;  %3363 = vmatprep.subr.bf16.mxu1 %v7028_v31  ;;  %v7075_v30 = vcombine.low %v168_v16, %v172_v17  ;;  %v7082_v31 = vcombine.high %v175_v22, %v179_v25  ;;  %v7084_v32 = vcombine.high %v176_v26, %v180_v27  ;;  %v227_v16 = vld [vmem:[#allocation5 + $0x3b0] sm:$0xff]  ;;  %v224_v17 = vld [vmem:[#allocation5 + $0x398] sm:$0xff] }
 0x121   :  { %3229 = vmatprep.mubr.bf16.mxu0 %v8213_v9  ;;  %3393 = vmatprep.mubr.bf16.mxu1 %v8213_v9  ;;  %v7052_v9 = vcombine.high %v144_v51, %v148_v20  ;;  %v203_v51 = vld [vmem:[#allocation5 + $0x2f0] sm:$0xff]  ;;  %v200_v20 = vld [vmem:[#allocation5 + $0x2d8] sm:$0xff] }
 0x123   :  { %3200 = vmatpush1.bf16.msra.mxu0 %v7025_v49  ;;  %3364 = vmatpush1.bf16.msra.mxu1 %v7027_v36  ;;  %v188_v49 = vld [vmem:[#allocation5 + $0x278] sm:$0xff]  ;;  %v7081_v36 = vcombine.low %v175_v22, %v179_v25  ;;  %v231_v25 = vld [vmem:[#allocation5 + $0x3d0] sm:$0xff] }
 0x124   :  { %3201 = vmatprep.subr.bf16.mxu0 %v7034_v37  ;;  %3365 = vmatprep.subr.bf16.mxu1 %v7036_v39  ;;  %v7083_v37 = vcombine.low %v176_v26, %v180_v27  ;;  %v7090_v39 = vcombine.high %v183_v34, %v187_v35  ;;  %v7092_v40 = vcombine.high %v184_v63, %v188_v49  ;;  %v235_v26 = vld [vmem:[#allocation5 + $0x3f0] sm:$0xff]  ;;  %v232_v27 = vld [vmem:[#allocation5 + $0x3d8] sm:$0xff] }
 0x127   :  { %3202 = vmatpush1.bf16.msra.mxu0 %v7033_v44  ;;  %3366 = vmatpush1.bf16.msra.mxu1 %v7035_v45  ;;  %v196_v44 = vld [vmem:[#allocation5 + $0x2b8] sm:$0xff]  ;;  %v7089_v45 = vcombine.low %v183_v34, %v187_v35  ;;  %v239_v35 = vld [vmem:[#allocation5 + $0x410] sm:$0xff] }
 0x128   :  { %3203 = vmatprep.subr.bf16.mxu0 %v7042_v46  ;;  %3367 = vmatprep.subr.bf16.mxu1 %v7044_v48  ;;  %v7091_v46 = vcombine.low %v184_v63, %v188_v49  ;;  %v7098_v48 = vcombine.high %v191_v41, %v195_v42  ;;  %v7100_v15 = vcombine.high %v192_v43, %v196_v44  ;;  %v243_v63 = vld [vmem:[#allocation5 + $0x430] sm:$0xff]  ;;  %v240_v49 = vld [vmem:[#allocation5 + $0x418] sm:$0xff] }
 0x12b   :  { %3204 = vmatpush1.bf16.msra.mxu0 %v7041_v52  ;;  %3368 = vmatpush1.bf16.msra.mxu1 %v7043_v54  ;;  %v204_v52 = vld [vmem:[#allocation5 + $0x2f8] sm:$0xff]  ;;  %v7097_v54 = vcombine.low %v191_v41, %v195_v42  ;;  %v247_v42 = vld [vmem:[#allocation5 + $0x450] sm:$0xff] }
 0x12c   :  { %3205 = vmatprep.subr.bf16.mxu0 %v7050_v55  ;;  %3369 = vmatprep.subr.bf16.mxu1 %v7052_v9  ;;  %v7099_v55 = vcombine.low %v192_v43, %v196_v44  ;;  %v7106_v9 = vcombine.high %v199_v50, %v203_v51  ;;  %v7108_v56 = vcombine.high %v200_v20, %v204_v52  ;;  %v251_v43 = vld [vmem:[#allocation5 + $0x470] sm:$0xff]  ;;  %v248_v44 = vld [vmem:[#allocation5 + $0x458] sm:$0xff] }
 0x12f   :  { %3206 = vmatpush1.bf16.msra.mxu0 %v7049_v62  ;;  %3370 = vmatpush1.bf16.msra.mxu1 %v7051_v0  ;;  %v212_v62 = vld [vmem:[#allocation5 + $0x338] sm:$0xff]  ;;  %v7105_v0 = vcombine.low %v199_v50, %v203_v51  ;;  %v255_v51 = vld [vmem:[#allocation5 + $0x490] sm:$0xff] }
 0x130   :  { %3207 = vmatprep.subr.bf16.mxu0 %v7058_v1  ;;  %3371 = vmatprep.subr.bf16.mxu1 %v7060_v2  ;;  %v7107_v1 = vcombine.low %v200_v20, %v204_v52  ;;  %v7114_v2 = vcombine.high %v207_v57, %v211_v60  ;;  %v7116_v4 = vcombine.high %v208_v61, %v212_v62  ;;  %v259_v20 = vld [vmem:[#allocation5 + $0x4b0] sm:$0xff]  ;;  %v256_v52 = vld [vmem:[#allocation5 + $0x498] sm:$0xff] }
 0x133   :  { %3208 = vmatpush1.bf16.msra.mxu0 %v7057_v8  ;;  %3372 = vmatpush1.bf16.msra.mxu1 %v7059_v10  ;;  %v220_v8 = vld [vmem:[#allocation5 + $0x378] sm:$0xff]  ;;  %v7113_v10 = vcombine.low %v207_v57, %v211_v60  ;;  %v263_v60 = vld [vmem:[#allocation5 + $0x4d0] sm:$0xff] }
 0x134   :  { %3209 = vmatprep.subr.bf16.mxu0 %v7066_v11  ;;  %3373 = vmatprep.subr.bf16.mxu1 %v7068_v12  ;;  %v7115_v11 = vcombine.low %v208_v61, %v212_v62  ;;  %v7122_v12 = vcombine.high %v215_v6, %v219_v7  ;;  %v7124_v13 = vcombine.high %v216_v28, %v220_v8  ;;  %v267_v61 = vld [vmem:[#allocation5 + $0x4f0] sm:$0xff]  ;;  %v264_v62 = vld [vmem:[#allocation5 + $0x4d8] sm:$0xff] }
 0x137   :  { %3210 = vmatpush1.bf16.msra.mxu0 %v7065_v18  ;;  %3374 = vmatpush1.bf16.msra.mxu1 %v7067_v59  ;;  %v228_v18 = vld [vmem:[#allocation5 + $0x3b8] sm:$0xff]  ;;  %v7121_v59 = vcombine.low %v215_v6, %v219_v7  ;;  %v271_v6 = vld [vmem:[#allocation5 + $0x510] sm:$0xff] }
 0x138   :  { %3211 = vmatprep.subr.bf16.mxu0 %v7074_v19  ;;  %3375 = vmatprep.subr.bf16.mxu1 %v7076_v21  ;;  %v7123_v19 = vcombine.low %v216_v28, %v220_v8  ;;  %v7130_v21 = vcombine.high %v223_v14, %v227_v16  ;;  %v7132_v22 = vcombine.high %v224_v17, %v228_v18  ;;  %v275_v7 = vld [vmem:[#allocation5 + $0x530] sm:$0xff]  ;;  %v272_v28 = vld [vmem:[#allocation5 + $0x518] sm:$0xff] }
 0x139   :  { %v276_v8 = vld [vmem:[#allocation5 + $0x538] sm:$0xff] }
 0x13b   :  { %3212 = vmatpush1.bf16.msra.mxu0 %v7073_v29  ;;  %3376 = vmatpush1.bf16.msra.mxu1 %v7075_v30  ;;  %v236_v29 = vld [vmem:[#allocation5 + $0x3f8] sm:$0xff]  ;;  %v7129_v30 = vcombine.low %v223_v14, %v227_v16  ;;  %v283_v14 = vld [vmem:[#allocation5 + $0x570] sm:$0xff] }
 0x13c   :  { %3213 = vmatprep.subr.bf16.mxu0 %v7082_v31  ;;  %3377 = vmatprep.subr.bf16.mxu1 %v7084_v32  ;;  %v7131_v31 = vcombine.low %v224_v17, %v228_v18  ;;  %v7138_v32 = vcombine.high %v231_v25, %v235_v26  ;;  %v7140_v34 = vcombine.high %v232_v27, %v236_v29  ;;  %v280_v16 = vld [vmem:[#allocation5 + $0x558] sm:$0xff] }
 0x13d   :  { %v284_v17 = vld [vmem:[#allocation5 + $0x578] sm:$0xff]  ;;  %v7177_v18 = vcombine.low %v271_v6, %v275_v7 }
 0x13f   :  { %3214 = vmatpush1.bf16.msra.mxu0 %v7081_v36  ;;  %3378 = vmatpush1.bf16.msra.mxu1 %v7083_v37  ;;  %v244_v36 = vld [vmem:[#allocation5 + $0x438] sm:$0xff]  ;;  %v7137_v37 = vcombine.low %v231_v25, %v235_v26  ;;  %v291_v25 = vld [vmem:[#allocation5 + $0x5b0] sm:$0xff] }
 0x140   :  { %3215 = vmatprep.subr.bf16.mxu0 %v7090_v39  ;;  %3379 = vmatprep.subr.bf16.mxu1 %v7092_v40  ;;  %v7139_v39 = vcombine.low %v232_v27, %v236_v29  ;;  %v7146_v40 = vcombine.high %v239_v35, %v243_v63  ;;  %v7148_v41 = vcombine.high %v240_v49, %v244_v36  ;;  %v288_v26 = vld [vmem:[#allocation5 + $0x598] sm:$0xff] }
 0x141   :  { %v292_v27 = vld [vmem:[#allocation5 + $0x5b8] sm:$0xff] }
 0x143   :  { %3216 = vmatpush1.bf16.msra.mxu0 %v7089_v45  ;;  %3380 = vmatpush1.bf16.msra.mxu1 %v7091_v46  ;;  %v252_v45 = vld [vmem:[#allocation5 + $0x478] sm:$0xff]  ;;  %v7145_v46 = vcombine.low %v239_v35, %v243_v63  ;;  %v299_v35 = vld [vmem:[#allocation5 + $0x5f0] sm:$0xff] }
 0x144   :  { %3217 = vmatprep.subr.bf16.mxu0 %v7098_v48  ;;  %3381 = vmatprep.subr.bf16.mxu1 %v7100_v15  ;;  %v7147_v48 = vcombine.low %v240_v49, %v244_v36  ;;  %v7154_v15 = vcombine.high %v247_v42, %v251_v43  ;;  %v7156_v50 = vcombine.high %v248_v44, %v252_v45  ;;  %v296_v63 = vld [vmem:[#allocation5 + $0x5d8] sm:$0xff] }
 0x145   :  { %v300_v49 = vld [vmem:[#allocation5 + $0x5f8] sm:$0xff] }
 0x147   :  { %3218 = vmatpush1.bf16.msra.mxu0 %v7097_v54  ;;  %3382 = vmatpush1.bf16.msra.mxu1 %v7099_v55  ;;  %v260_v54 = vld [vmem:[#allocation5 + $0x4b8] sm:$0xff]  ;;  %v7153_v55 = vcombine.low %v247_v42, %v251_v43  ;;  %v307_v42 = vld [vmem:[#allocation5 + $0x630] sm:$0xff] }
 0x148   :  { %3219 = vmatprep.subr.bf16.mxu0 %v7106_v9  ;;  %3383 = vmatprep.subr.bf16.mxu1 %v7108_v56  ;;  %v7155_v9 = vcombine.low %v248_v44, %v252_v45  ;;  %v7162_v56 = vcombine.high %v255_v51, %v259_v20  ;;  %v7164_v57 = vcombine.high %v256_v52, %v260_v54  ;;  %v304_v43 = vld [vmem:[#allocation5 + $0x618] sm:$0xff] }
 0x149   :  { %v308_v44 = vld [vmem:[#allocation5 + $0x638] sm:$0xff] }
 0x14b   :  { %3220 = vmatpush1.bf16.msra.mxu0 %v7105_v0  ;;  %3384 = vmatpush1.bf16.msra.mxu1 %v7107_v1  ;;  %v268_v0 = vld [vmem:[#allocation5 + $0x4f8] sm:$0xff]  ;;  %v7161_v1 = vcombine.low %v255_v51, %v259_v20  ;;  %v315_v51 = vld [vmem:[#allocation5 + $0x670] sm:$0xff] }
 0x14c   :  { %3221 = vmatprep.subr.bf16.mxu0 %v7114_v2  ;;  %3385 = vmatprep.subr.bf16.mxu1 %v7116_v4  ;;  %v7170_v2 = vcombine.high %v263_v60, %v267_v61  ;;  %v7172_v4 = vcombine.high %v264_v62, %v268_v0  ;;  %v312_v20 = vld [vmem:[#allocation5 + $0x658] sm:$0xff] }
 0x14f   :  { %3222 = vmatpush1.bf16.msra.mxu0 %v7113_v10  ;;  %3386 = vmatpush1.bf16.msra.mxu1 %v7115_v11  ;;  %v7169_v10 = vcombine.low %v263_v60, %v267_v61  ;;  %v7171_v11 = vcombine.low %v264_v62, %v268_v0  ;;  %v323_v60 = vld [vmem:[#allocation5 + $0x6b0] sm:$0xff]  ;;  %v320_v61 = vld [vmem:[#allocation5 + $0x698] sm:$0xff] }
 0x150   :  { %3223 = vmatprep.subr.bf16.mxu0 %v7122_v12  ;;  %3387 = vmatprep.subr.bf16.mxu1 %v7124_v13  ;;  %v7178_v12 = vcombine.high %v271_v6, %v275_v7  ;;  %v279_v13 = vld [vmem:[#allocation5 + $0x550] sm:$0xff]  ;;  %v324_v62 = vld [vmem:[#allocation5 + $0x6b8] sm:$0xff] }
 0x151   :  { %v7185_v29 = vcombine.low %v279_v13, %v283_v14  ;;  %v331_v6 = vld [vmem:[#allocation5 + $0x6f0] sm:$0xff]  ;;  %v328_v7 = vld [vmem:[#allocation5 + $0x6d8] sm:$0xff] }
 0x153   :  { %3224 = vmatpush1.bf16.msra.mxu0 %v7121_v59  ;;  %3388 = vmatpush1.bf16.msra.mxu1 %v7123_v19  ;;  %v7179_v59 = vcombine.low %v272_v28, %v276_v8  ;;  %v7186_v19 = vcombine.high %v279_v13, %v283_v14  ;;  %v339_v13 = vld [vmem:[#allocation5 + $0x730] sm:$0xff]  ;;  %v336_v14 = vld [vmem:[#allocation5 + $0x718] sm:$0xff] }
 0x154   :  { %3225 = vmatprep.subr.bf16.mxu0 %v7130_v21  ;;  %3389 = vmatprep.subr.bf16.mxu1 %v7132_v22  ;;  %v7188_v21 = vcombine.high %v280_v16, %v284_v17  ;;  %v287_v22 = vld [vmem:[#allocation5 + $0x590] sm:$0xff] }
 0x155   :  { %v7193_v36 = vcombine.low %v287_v22, %v291_v25 }
 0x157   :  { %3226 = vmatpush1.bf16.msra.mxu0 %v7129_v30  ;;  %3390 = vmatpush1.bf16.msra.mxu1 %v7131_v31  ;;  %v7187_v30 = vcombine.low %v280_v16, %v284_v17  ;;  %v7194_v31 = vcombine.high %v287_v22, %v291_v25  ;;  %v340_v16 = vld [vmem:[#allocation5 + $0x738] sm:$0xff]  ;;  %v347_v22 = vld [vmem:[#allocation5 + $0x770] sm:$0xff] }
 0x158   :  { %3227 = vmatprep.subr.bf16.mxu0 %v7138_v32  ;;  %3391 = vmatprep.subr.bf16.mxu1 %v7140_v34  ;;  %v7196_v32 = vcombine.high %v288_v26, %v292_v27  ;;  %v295_v34 = vld [vmem:[#allocation5 + $0x5d0] sm:$0xff]  ;;  %v344_v25 = vld [vmem:[#allocation5 + $0x758] sm:$0xff] }
 0x159   :  { %v7201_v45 = vcombine.low %v295_v34, %v299_v35 }
 0x15b   :  { %3228 = vmatpush1.bf16.msra.mxu0 %v7137_v37  ;;  %3392 = vmatpush1.bf16.msra.mxu1 %v7139_v39  ;;  %v7195_v37 = vcombine.low %v288_v26, %v292_v27  ;;  %v7202_v39 = vcombine.high %v295_v34, %v299_v35  ;;  %v348_v26 = vld [vmem:[#allocation5 + $0x778] sm:$0xff]  ;;  %v355_v34 = vld [vmem:[#allocation5 + $0x7b0] sm:$0xff] }
 0x15c   :  { %3238 = vmatprep.subr.bf16.mxu0 %v7146_v40  ;;  %3402 = vmatprep.subr.bf16.mxu1 %v7148_v41  ;;  %v7204_v40 = vcombine.high %v296_v63, %v300_v49  ;;  %v303_v41 = vld [vmem:[#allocation5 + $0x610] sm:$0xff]  ;;  %v352_v35 = vld [vmem:[#allocation5 + $0x798] sm:$0xff] }
 0x15e   :  { %3230 = vmatmul.mubr.bf16.vlgmr.msra.gmra.mrb[4].mxu0 %v8226_v24  ;;  %3394 = vmatmul.mubr.bf16.vlgmr.msra.gmra.mrb[4].mxu1 %v8226_v24  ;;  %v7163_v24 = vcombine.low %v256_v52, %v260_v54  ;;  %v316_v52 = vld [vmem:[#allocation5 + $0x678] sm:$0xff]  ;;  %v7209_v54 = vcombine.low %v303_v41, %v307_v42 }
 0x15f   :  { %3239 = vmatpush1.bf16.msra.mxu0 %v7145_v46  ;;  %3403 = vmatpush1.bf16.msra.mxu1 %v7147_v48  ;;  %v7203_v46 = vcombine.low %v296_v63, %v300_v49  ;;  %v7210_v48 = vcombine.high %v303_v41, %v307_v42  ;;  %v356_v63 = vld [vmem:[#allocation5 + $0x7b8] sm:$0xff]  ;;  %v363_v41 = vld [vmem:[#allocation5 + $0x7f0] sm:$0xff] }
 0x160   :  { %3240 = vmatprep.subr.bf16.mxu0 %v7154_v15  ;;  %3404 = vmatprep.subr.bf16.mxu1 %v7156_v50  ;;  %v7212_v15 = vcombine.high %v304_v43, %v308_v44  ;;  %v311_v50 = vld [vmem:[#allocation5 + $0x650] sm:$0xff]  ;;  %v360_v42 = vld [vmem:[#allocation5 + $0x7d8] sm:$0xff] }
 0x161   :  { %3270 = vmatprep.mubr.bf16.mxu0 %v8228_v33  ;;  %3434 = vmatprep.mubr.bf16.mxu1 %v8228_v33  ;;  %v7180_v33 = vcombine.high %v272_v28, %v276_v8  ;;  %v7217_v0 = vcombine.low %v311_v50, %v315_v51  ;;  %v332_v28 = vld [vmem:[#allocation5 + $0x6f8] sm:$0xff] }
 0x163   :  { %3241 = vmatpush1.bf16.msra.mxu0 %v7153_v55  ;;  %3405 = vmatpush1.bf16.msra.mxu1 %v7155_v9  ;;  %v7211_v55 = vcombine.low %v304_v43, %v308_v44  ;;  %v7218_v9 = vcombine.high %v311_v50, %v315_v51  ;;  %v364_v43 = vld [vmem:[#allocation5 + $0x7f8] sm:$0xff]  ;;  %v371_v50 = vld [vmem:[#allocation5 + $0x830] sm:$0xff] }
 0x164   :  { %3242 = vmatprep.subr.bf16.mxu0 %v7162_v56  ;;  %3406 = vmatprep.subr.bf16.mxu1 %v7164_v57  ;;  %v7220_v56 = vcombine.high %v312_v20, %v316_v52  ;;  %v319_v57 = vld [vmem:[#allocation5 + $0x690] sm:$0xff]  ;;  %v368_v51 = vld [vmem:[#allocation5 + $0x818] sm:$0xff] }
 0x165   :  { %v7225_v8 = vcombine.low %v319_v57, %v323_v60 }
 0x167   :  { %3243 = vmatpush1.bf16.msra.mxu0 %v7161_v1  ;;  %3407 = vmatpush1.bf16.msra.mxu1 %v7163_v24  ;;  %v7219_v1 = vcombine.low %v312_v20, %v316_v52  ;;  %v7226_v24 = vcombine.high %v319_v57, %v323_v60  ;;  %v372_v20 = vld [vmem:[#allocation5 + $0x838] sm:$0xff]  ;;  %v379_v57 = vld [vmem:[#allocation5 + $0x870] sm:$0xff] }
 0x168   :  { %3244 = vmatprep.subr.bf16.mxu0 %v7170_v2  ;;  %3408 = vmatprep.subr.bf16.mxu1 %v7172_v4  ;;  %v7228_v2 = vcombine.high %v320_v61, %v324_v62  ;;  %v327_v4 = vld [vmem:[#allocation5 + $0x6d0] sm:$0xff]  ;;  %v376_v60 = vld [vmem:[#allocation5 + $0x858] sm:$0xff] }
 0x169   :  { %v7233_v17 = vcombine.low %v327_v4, %v331_v6 }
 0x16b   :  { %3245 = vmatpush1.bf16.msra.mxu0 %v7169_v10  ;;  %3409 = vmatpush1.bf16.msra.mxu1 %v7171_v11  ;;  %v7227_v10 = vcombine.low %v320_v61, %v324_v62  ;;  %v7234_v11 = vcombine.high %v327_v4, %v331_v6  ;;  %v380_v61 = vld [vmem:[#allocation5 + $0x878] sm:$0xff]  ;;  %v387_v4 = vld [vmem:[#allocation5 + $0x8b0] sm:$0xff] }
 0x16c   :  { %3246 = vmatprep.subr.bf16.mxu0 %v7178_v12  ;;  %3410 = vmatprep.subr.bf16.mxu1 %v7180_v33  ;;  %v7236_v12 = vcombine.high %v328_v7, %v332_v28  ;;  %v335_v33 = vld [vmem:[#allocation5 + $0x710] sm:$0xff]  ;;  %v384_v6 = vld [vmem:[#allocation5 + $0x898] sm:$0xff] }
 0x16d   :  { %v7241_v27 = vcombine.low %v335_v33, %v339_v13 }
 0x16f   :  { %3247 = vmatpush1.bf16.msra.mxu0 %v7177_v18  ;;  %3411 = vmatpush1.bf16.msra.mxu1 %v7179_v59  ;;  %v7235_v18 = vcombine.low %v328_v7, %v332_v28  ;;  %v7242_v59 = vcombine.high %v335_v33, %v339_v13  ;;  %v388_v7 = vld [vmem:[#allocation5 + $0x8b8] sm:$0xff]  ;;  %v395_v33 = vld [vmem:[#allocation5 + $0x8f0] sm:$0xff] }
 0x170   :  { %3248 = vmatprep.subr.bf16.mxu0 %v7186_v19  ;;  %3412 = vmatprep.subr.bf16.mxu1 %v7188_v21  ;;  %v7244_v19 = vcombine.high %v336_v14, %v340_v16  ;;  %v343_v21 = vld [vmem:[#allocation5 + $0x750] sm:$0xff]  ;;  %v392_v13 = vld [vmem:[#allocation5 + $0x8d8] sm:$0xff] }
 0x171   :  { %v7249_v49 = vcombine.low %v343_v21, %v347_v22 }
 0x173   :  { %3249 = vmatpush1.bf16.msra.mxu0 %v7185_v29  ;;  %3413 = vmatpush1.bf16.msra.mxu1 %v7187_v30  ;;  %v7243_v29 = vcombine.low %v336_v14, %v340_v16  ;;  %v7250_v30 = vcombine.high %v343_v21, %v347_v22  ;;  %v396_v14 = vld [vmem:[#allocation5 + $0x8f8] sm:$0xff] }
 0x174   :  { %3250 = vmatprep.subr.bf16.mxu0 %v7194_v31  ;;  %3414 = vmatprep.subr.bf16.mxu1 %v7196_v32  ;;  %v7252_v31 = vcombine.high %v344_v25, %v348_v26  ;;  %v351_v32 = vld [vmem:[#allocation5 + $0x790] sm:$0xff]  ;;  %v400_v21 = vld [vmem:[#allocation5 + $0x918] sm:$0xff] }
 0x175   :  { %v7257_v44 = vcombine.low %v351_v32, %v355_v34  ;;  %v404_v22 = vld [vmem:[#allocation5 + $0x938] sm:$0xff] }
 0x177   :  { %3251 = vmatpush1.bf16.msra.mxu0 %v7193_v36  ;;  %3415 = vmatpush1.bf16.msra.mxu1 %v7195_v37  ;;  %v7251_v36 = vcombine.low %v344_v25, %v348_v26  ;;  %v7258_v37 = vcombine.high %v351_v32, %v355_v34  ;;  %v7299_v26 = vcombine.low %v392_v13, %v396_v14  ;;  %v412_v32 = vld [vmem:[#allocation5 + $0x978] sm:$0xff] }
 0x178   :  { %3252 = vmatprep.subr.bf16.mxu0 %v7202_v39  ;;  %3416 = vmatprep.subr.bf16.mxu1 %v7204_v40  ;;  %v7260_v39 = vcombine.high %v352_v35, %v356_v63  ;;  %v359_v40 = vld [vmem:[#allocation5 + $0x7d0] sm:$0xff] }
 0x179   :  { %v7265_v52 = vcombine.low %v359_v40, %v363_v41 }
 0x17b   :  { %3253 = vmatpush1.bf16.msra.mxu0 %v7201_v45  ;;  %3417 = vmatpush1.bf16.msra.mxu1 %v7203_v46  ;;  %v7259_v45 = vcombine.low %v352_v35, %v356_v63  ;;  %v7266_v46 = vcombine.high %v359_v40, %v363_v41  ;;  %v7307_v35 = vcombine.low %v400_v21, %v404_v22  ;;  %v420_v40 = vld [vmem:[#allocation5 + $0x9b8] sm:$0xff] }
 0x17c   :  { %3254 = vmatprep.subr.bf16.mxu0 %v7210_v48  ;;  %3418 = vmatprep.subr.bf16.mxu1 %v7212_v15  ;;  %v7268_v48 = vcombine.high %v360_v42, %v364_v43  ;;  %v367_v15 = vld [vmem:[#allocation5 + $0x810] sm:$0xff] }
 0x17d   :  { %v7273_v62 = vcombine.low %v367_v15, %v371_v50 }
 0x17f   :  { %3255 = vmatpush1.bf16.msra.mxu0 %v7209_v54  ;;  %3419 = vmatpush1.bf16.msra.mxu1 %v7211_v55  ;;  %v7267_v54 = vcombine.low %v360_v42, %v364_v43  ;;  %v7274_v55 = vcombine.high %v367_v15, %v371_v50  ;;  %v428_v15 = vld [vmem:[#allocation5 + $0x9f8] sm:$0xff] }
 0x180   :  { %3256 = vmatprep.subr.bf16.mxu0 %v7218_v9  ;;  %3420 = vmatprep.subr.bf16.mxu1 %v7220_v56  ;;  %v7276_v9 = vcombine.high %v368_v51, %v372_v20  ;;  %v375_v56 = vld [vmem:[#allocation5 + $0x850] sm:$0xff] }
 0x181   :  { %v7281_v28 = vcombine.low %v375_v56, %v379_v57 }
 0x183   :  { %3257 = vmatpush1.bf16.msra.mxu0 %v7217_v0  ;;  %3421 = vmatpush1.bf16.msra.mxu1 %v7219_v1  ;;  %v7275_v0 = vcombine.low %v368_v51, %v372_v20  ;;  %v7282_v1 = vcombine.high %v375_v56, %v379_v57  ;;  %v436_v56 = vld [vmem:[#allocation5 + $0xa38] sm:$0xff] }
 0x184   :  { %3258 = vmatprep.subr.bf16.mxu0 %v7226_v24  ;;  %3422 = vmatprep.subr.bf16.mxu1 %v7228_v2  ;;  %v7284_v24 = vcombine.high %v376_v60, %v380_v61  ;;  %v383_v2 = vld [vmem:[#allocation5 + $0x890] sm:$0xff] }
 0x185   :  { %v7289_v16 = vcombine.low %v383_v2, %v387_v4 }
 0x187   :  { %3259 = vmatpush1.bf16.msra.mxu0 %v7225_v8  ;;  %3423 = vmatpush1.bf16.msra.mxu1 %v7227_v10  ;;  %v7283_v8 = vcombine.low %v376_v60, %v380_v61  ;;  %v7290_v10 = vcombine.high %v383_v2, %v387_v4  ;;  %v444_v2 = vld [vmem:[#allocation5 + $0xa78] sm:$0xff] }
 0x188   :  { %3260 = vmatprep.subr.bf16.mxu0 %v7234_v11  ;;  %3424 = vmatprep.subr.bf16.mxu1 %v7236_v12  ;;  %v7292_v11 = vcombine.high %v384_v6, %v388_v7  ;;  %v391_v12 = vld [vmem:[#allocation5 + $0x8d0] sm:$0xff] }
 0x189   :  { %v7297_v25 = vcombine.low %v391_v12, %v395_v33 }
 0x18b   :  { %3261 = vmatpush1.bf16.msra.mxu0 %v7233_v17  ;;  %3425 = vmatpush1.bf16.msra.mxu1 %v7235_v18  ;;  %v7298_v17 = vcombine.high %v391_v12, %v395_v33  ;;  %v7300_v18 = vcombine.high %v392_v13, %v396_v14  ;;  %v452_v12 = vld [vmem:[#allocation5 + $0xab8] sm:$0xff] }
 0x18c   :  { %3262 = vmatprep.subr.bf16.mxu0 %v7242_v59  ;;  %3426 = vmatprep.subr.bf16.mxu1 %v7244_v19  ;;  %v399_v59 = vld [vmem:[#allocation5 + $0x910] sm:$0xff] }
 0x18d   :  { %v403_v19 = vld [vmem:[#allocation5 + $0x930] sm:$0xff] }
 0x18e   :  { %v7305_v34 = vcombine.low %v399_v59, %v403_v19 }
 0x18f   :  { %3263 = vmatpush1.bf16.msra.mxu0 %v7241_v27  ;;  %3427 = vmatpush1.bf16.msra.mxu1 %v7243_v29  ;;  %v7306_v27 = vcombine.high %v399_v59, %v403_v19  ;;  %v407_v29 = vld [vmem:[#allocation5 + $0x950] sm:$0xff]  ;;  %v460_v59 = vld [vmem:[#allocation5 + $0xaf8] sm:$0xff] }
 0x190   :  { %3264 = vmatprep.subr.bf16.mxu0 %v7250_v30  ;;  %3428 = vmatprep.subr.bf16.mxu1 %v7252_v31  ;;  %v411_v30 = vld [vmem:[#allocation5 + $0x970] sm:$0xff]  ;;  %v408_v31 = vld [vmem:[#allocation5 + $0x958] sm:$0xff] }
 0x191   :  { %v7314_v63 = vcombine.high %v407_v29, %v411_v30  ;;  %v7313_v41 = vcombine.low %v407_v29, %v411_v30  ;;  %v7315_v42 = vcombine.low %v408_v31, %v412_v32  ;;  %v468_v29 = vld [vmem:[#allocation5 + $0xb38] sm:$0xff] }
 0x193   :  { %3265 = vmatpush1.bf16.msra.mxu0 %v7249_v49  ;;  %3429 = vmatpush1.bf16.msra.mxu1 %v7251_v36  ;;  %v7316_v49 = vcombine.high %v408_v31, %v412_v32  ;;  %v415_v36 = vld [vmem:[#allocation5 + $0x990] sm:$0xff] }
 0x194   :  { %3266 = vmatprep.subr.bf16.mxu0 %v7258_v37  ;;  %3430 = vmatprep.subr.bf16.mxu1 %v7260_v39  ;;  %v419_v37 = vld [vmem:[#allocation5 + $0x9b0] sm:$0xff]  ;;  %v416_v39 = vld [vmem:[#allocation5 + $0x998] sm:$0xff] }
 0x195   :  { %v7322_v43 = vcombine.high %v415_v36, %v419_v37  ;;  %v7321_v50 = vcombine.low %v415_v36, %v419_v37  ;;  %v7323_v51 = vcombine.low %v416_v39, %v420_v40  ;;  %v476_v36 = vld [vmem:[#allocation5 + $0xb78] sm:$0xff] }
 0x197   :  { %3267 = vmatpush1.bf16.msra.mxu0 %v7257_v44  ;;  %3431 = vmatpush1.bf16.msra.mxu1 %v7259_v45  ;;  %v7324_v44 = vcombine.high %v416_v39, %v420_v40  ;;  %v423_v45 = vld [vmem:[#allocation5 + $0x9d0] sm:$0xff] }
 0x198   :  { %3268 = vmatprep.subr.bf16.mxu0 %v7266_v46  ;;  %3432 = vmatprep.subr.bf16.mxu1 %v7268_v48  ;;  %v427_v46 = vld [vmem:[#allocation5 + $0x9f0] sm:$0xff]  ;;  %v424_v48 = vld [vmem:[#allocation5 + $0x9d8] sm:$0xff] }
 0x199   :  { %v7330_v20 = vcombine.high %v423_v45, %v427_v46  ;;  %v7329_v57 = vcombine.low %v423_v45, %v427_v46  ;;  %v7331_v60 = vcombine.low %v424_v48, %v428_v15  ;;  %v484_v45 = vld [vmem:[#allocation5 + $0xbb8] sm:$0xff] }
 0x19b   :  { %3269 = vmatpush1.bf16.msra.mxu0 %v7265_v52  ;;  %3433 = vmatpush1.bf16.msra.mxu1 %v7267_v54  ;;  %v7332_v52 = vcombine.high %v424_v48, %v428_v15  ;;  %v431_v54 = vld [vmem:[#allocation5 + $0xa10] sm:$0xff] }
 0x19c   :  { %3279 = vmatprep.subr.bf16.mxu0 %v7274_v55  ;;  %3443 = vmatprep.subr.bf16.mxu1 %v7276_v9  ;;  %v435_v55 = vld [vmem:[#allocation5 + $0xa30] sm:$0xff]  ;;  %v432_v9 = vld [vmem:[#allocation5 + $0xa18] sm:$0xff] }
 0x19d   :  { %v7338_v61 = vcombine.high %v431_v54, %v435_v55  ;;  %v7337_v4 = vcombine.low %v431_v54, %v435_v55  ;;  %v492_v54 = vld [vmem:[#allocation5 + $0xbf8] sm:$0xff] }
 0x19e   :  { %3271 = vmatmul.mubr.bf16.vlgmr.msra.gmra.mrb[4].mxu0 %v8244_v38  ;;  %3435 = vmatmul.mubr.bf16.vlgmr.msra.gmra.mrb[4].mxu1 %v8244_v38  ;;  %v7291_v38 = vcombine.low %v384_v6, %v388_v7  ;;  %v7339_v6 = vcombine.low %v432_v9, %v436_v56 }
 0x19f   :  { %3280 = vmatpush1.bf16.msra.mxu0 %v7273_v62  ;;  %3444 = vmatpush1.bf16.msra.mxu1 %v7275_v0  ;;  %v7340_v62 = vcombine.high %v432_v9, %v436_v56  ;;  %v439_v0 = vld [vmem:[#allocation5 + $0xa50] sm:$0xff] }
 0x1a0   :  { %3281 = vmatprep.subr.bf16.mxu0 %v7282_v1  ;;  %3445 = vmatprep.subr.bf16.mxu1 %v7284_v24  ;;  %v443_v1 = vld [vmem:[#allocation5 + $0xa70] sm:$0xff]  ;;  %v440_v24 = vld [vmem:[#allocation5 + $0xa58] sm:$0xff] }
 0x1a1   :  { %3311 = vmatprep.mubr.bf16.mxu0 %v8246_v47  ;;  %3475 = vmatprep.mubr.bf16.mxu1 %v8246_v47  ;;  %v7308_v47 = vcombine.high %v400_v21, %v404_v22  ;;  %v7346_v7 = vcombine.high %v439_v0, %v443_v1  ;;  %v7345_v33 = vcombine.low %v439_v0, %v443_v1  ;;  %v500_v0 = vld [vmem:[#allocation5 + $0xc38] sm:$0xff] }
 0x1a2   :  { %v7347_v13 = vcombine.low %v440_v24, %v444_v2 }
 0x1a3   :  { %3282 = vmatpush1.bf16.msra.mxu0 %v7281_v28  ;;  %3446 = vmatpush1.bf16.msra.mxu1 %v7283_v8  ;;  %v7348_v28 = vcombine.high %v440_v24, %v444_v2  ;;  %v447_v8 = vld [vmem:[#allocation5 + $0xa90] sm:$0xff] }
 0x1a4   :  { %3283 = vmatprep.subr.bf16.mxu0 %v7290_v10  ;;  %3447 = vmatprep.subr.bf16.mxu1 %v7292_v11  ;;  %v451_v10 = vld [vmem:[#allocation5 + $0xab0] sm:$0xff]  ;;  %v448_v11 = vld [vmem:[#allocation5 + $0xa98] sm:$0xff] }
 0x1a5   :  { %v7354_v14 = vcombine.high %v447_v8, %v451_v10  ;;  %v7353_v19 = vcombine.low %v447_v8, %v451_v10  ;;  %v7355_v21 = vcombine.low %v448_v11, %v452_v12  ;;  %v508_v8 = vld [vmem:[#allocation5 + $0xc78] sm:$0xff] }
 0x1a7   :  { %3284 = vmatpush1.bf16.msra.mxu0 %v7289_v16  ;;  %3448 = vmatpush1.bf16.msra.mxu1 %v7291_v38  ;;  %v7356_v16 = vcombine.high %v448_v11, %v452_v12  ;;  %v455_v38 = vld [vmem:[#allocation5 + $0xad0] sm:$0xff] }
 0x1a8   :  { %3285 = vmatprep.subr.bf16.mxu0 %v7298_v17  ;;  %3449 = vmatprep.subr.bf16.mxu1 %v7300_v18  ;;  %v459_v17 = vld [vmem:[#allocation5 + $0xaf0] sm:$0xff]  ;;  %v456_v18 = vld [vmem:[#allocation5 + $0xad8] sm:$0xff] }
 0x1a9   :  { %v7362_v22 = vcombine.high %v455_v38, %v459_v17  ;;  %v7361_v30 = vcombine.low %v455_v38, %v459_v17  ;;  %v7363_v31 = vcombine.low %v456_v18, %v460_v59  ;;  %v516_v38 = vld [vmem:[#allocation5 + $0xcb8] sm:$0xff] }
 0x1ab   :  { %3286 = vmatpush1.bf16.msra.mxu0 %v7297_v25  ;;  %3450 = vmatpush1.bf16.msra.mxu1 %v7299_v26  ;;  %v7364_v25 = vcombine.high %v456_v18, %v460_v59  ;;  %v463_v26 = vld [vmem:[#allocation5 + $0xb10] sm:$0xff] }
 0x1ac   :  { %3287 = vmatprep.subr.bf16.mxu0 %v7306_v27  ;;  %3451 = vmatprep.subr.bf16.mxu1 %v7308_v47  ;;  %v467_v27 = vld [vmem:[#allocation5 + $0xb30] sm:$0xff]  ;;  %v464_v47 = vld [vmem:[#allocation5 + $0xb18] sm:$0xff] }
 0x1ad   :  { %v7370_v32 = vcombine.high %v463_v26, %v467_v27  ;;  %v7369_v37 = vcombine.low %v463_v26, %v467_v27  ;;  %v7371_v39 = vcombine.low %v464_v47, %v468_v29  ;;  %v524_v26 = vld [vmem:[#allocation5 + $0xcf8] sm:$0xff] }
 0x1af   :  { %3288 = vmatpush1.bf16.msra.mxu0 %v7305_v34  ;;  %3452 = vmatpush1.bf16.msra.mxu1 %v7307_v35  ;;  %v7372_v34 = vcombine.high %v464_v47, %v468_v29  ;;  %v471_v35 = vld [vmem:[#allocation5 + $0xb50] sm:$0xff] }
 0x1b0   :  { %3289 = vmatprep.subr.bf16.mxu0 %v7314_v63  ;;  %3453 = vmatprep.subr.bf16.mxu1 %v7316_v49  ;;  %v475_v63 = vld [vmem:[#allocation5 + $0xb70] sm:$0xff]  ;;  %v472_v49 = vld [vmem:[#allocation5 + $0xb58] sm:$0xff] }
 0x1b1   :  { %v7378_v40 = vcombine.high %v471_v35, %v475_v63  ;;  %v7377_v46 = vcombine.low %v471_v35, %v475_v63  ;;  %v7379_v48 = vcombine.low %v472_v49, %v476_v36 }
 0x1b3   :  { %3290 = vmatpush1.bf16.msra.mxu0 %v7313_v41  ;;  %3454 = vmatpush1.bf16.msra.mxu1 %v7315_v42  ;;  %v7380_v41 = vcombine.high %v472_v49, %v476_v36  ;;  %v479_v42 = vld [vmem:[#allocation5 + $0xb90] sm:$0xff] }
 0x1b4   :  { %3291 = vmatprep.subr.bf16.mxu0 %v7322_v43  ;;  %3455 = vmatprep.subr.bf16.mxu1 %v7324_v44  ;;  %v483_v43 = vld [vmem:[#allocation5 + $0xbb0] sm:$0xff]  ;;  %v480_v44 = vld [vmem:[#allocation5 + $0xb98] sm:$0xff] }
 0x1b5   :  { %v7386_v15 = vcombine.high %v479_v42, %v483_v43  ;;  %v7385_v55 = vcombine.low %v479_v42, %v483_v43  ;;  %v7387_v9 = vcombine.low %v480_v44, %v484_v45  ;;  %v535_v36 = vld [vmem:[#allocation5 + $0xd50] sm:$0xff] }
 0x1b7   :  { %3292 = vmatpush1.bf16.msra.mxu0 %v7321_v50  ;;  %3456 = vmatpush1.bf16.msra.mxu1 %v7323_v51  ;;  %v7388_v50 = vcombine.high %v480_v44, %v484_v45  ;;  %v487_v51 = vld [vmem:[#allocation5 + $0xbd0] sm:$0xff] }
 0x1b8   :  { %3293 = vmatprep.subr.bf16.mxu0 %v7330_v20  ;;  %3457 = vmatprep.subr.bf16.mxu1 %v7332_v52  ;;  %v491_v20 = vld [vmem:[#allocation5 + $0xbf0] sm:$0xff]  ;;  %v488_v52 = vld [vmem:[#allocation5 + $0xbd8] sm:$0xff] }
 0x1b9   :  { %v7394_v56 = vcombine.high %v487_v51, %v491_v20  ;;  %v7393_v1 = vcombine.low %v487_v51, %v491_v20  ;;  %v7395_v24 = vcombine.low %v488_v52, %v492_v54  ;;  %v543_v45 = vld [vmem:[#allocation5 + $0xd90] sm:$0xff] }
 0x1bb   :  { %3294 = vmatpush1.bf16.msra.mxu0 %v7329_v57  ;;  %3458 = vmatpush1.bf16.msra.mxu1 %v7331_v60  ;;  %v7396_v57 = vcombine.high %v488_v52, %v492_v54  ;;  %v495_v60 = vld [vmem:[#allocation5 + $0xc10] sm:$0xff] }
 0x1bc   :  { %3295 = vmatprep.subr.bf16.mxu0 %v7338_v61  ;;  %3459 = vmatprep.subr.bf16.mxu1 %v7340_v62  ;;  %v499_v61 = vld [vmem:[#allocation5 + $0xc30] sm:$0xff]  ;;  %v496_v62 = vld [vmem:[#allocation5 + $0xc18] sm:$0xff] }
 0x1bd   :  { %v7402_v2 = vcombine.high %v495_v60, %v499_v61  ;;  %v7401_v10 = vcombine.low %v495_v60, %v499_v61  ;;  %v7403_v11 = vcombine.low %v496_v62, %v500_v0  ;;  %v551_v52 = vld [vmem:[#allocation5 + $0xdd0] sm:$0xff] }
 0x1be   :  { %v555_v54 = vld [vmem:[#allocation5 + $0xdf0] sm:$0xff] }
 0x1bf   :  { %3296 = vmatpush1.bf16.msra.mxu0 %v7337_v4  ;;  %3460 = vmatpush1.bf16.msra.mxu1 %v7339_v6  ;;  %v7404_v4 = vcombine.high %v496_v62, %v500_v0  ;;  %v503_v6 = vld [vmem:[#allocation5 + $0xc50] sm:$0xff]  ;;  %v556_v0 = vld [vmem:[#allocation5 + $0xdf8] sm:$0xff] }
 0x1c0   :  { %3297 = vmatprep.subr.bf16.mxu0 %v7346_v7  ;;  %3461 = vmatprep.subr.bf16.mxu1 %v7348_v28  ;;  %v507_v7 = vld [vmem:[#allocation5 + $0xc70] sm:$0xff]  ;;  %v504_v28 = vld [vmem:[#allocation5 + $0xc58] sm:$0xff] }
 0x1c1   :  { %v7410_v12 = vcombine.high %v503_v6, %v507_v7  ;;  %v7409_v17 = vcombine.low %v503_v6, %v507_v7  ;;  %v7411_v18 = vcombine.low %v504_v28, %v508_v8  ;;  %v563_v60 = vld [vmem:[#allocation5 + $0xe30] sm:$0xff] }
 0x1c3   :  { %3298 = vmatpush1.bf16.msra.mxu0 %v7345_v33  ;;  %3462 = vmatpush1.bf16.msra.mxu1 %v7347_v13  ;;  %v7412_v33 = vcombine.high %v504_v28, %v508_v8  ;;  %v511_v13 = vld [vmem:[#allocation5 + $0xc90] sm:$0xff] }
 0x1c4   :  { %3299 = vmatprep.subr.bf16.mxu0 %v7354_v14  ;;  %3463 = vmatprep.subr.bf16.mxu1 %v7356_v16  ;;  %v515_v14 = vld [vmem:[#allocation5 + $0xcb0] sm:$0xff]  ;;  %v512_v16 = vld [vmem:[#allocation5 + $0xc98] sm:$0xff] }
 0x1c5   :  { %v7418_v59 = vcombine.high %v511_v13, %v515_v14  ;;  %v7417_v27 = vcombine.low %v511_v13, %v515_v14  ;;  %v7457_v14 = vcombine.low %v551_v52, %v555_v54 }
 0x1c7   :  { %3300 = vmatpush1.bf16.msra.mxu0 %v7353_v19  ;;  %3464 = vmatpush1.bf16.msra.mxu1 %v7355_v21  ;;  %v7420_v19 = vcombine.high %v512_v16, %v516_v38  ;;  %v519_v21 = vld [vmem:[#allocation5 + $0xcd0] sm:$0xff] }
 0x1c8   :  { %3301 = vmatprep.subr.bf16.mxu0 %v7362_v22  ;;  %3465 = vmatprep.subr.bf16.mxu1 %v7364_v25  ;;  %v523_v22 = vld [vmem:[#allocation5 + $0xcf0] sm:$0xff]  ;;  %v520_v25 = vld [vmem:[#allocation5 + $0xcd8] sm:$0xff] }
 0x1c9   :  { %v7426_v47 = vcombine.high %v519_v21, %v523_v22  ;;  %v7428_v29 = vcombine.high %v520_v25, %v524_v26  ;;  %v7425_v35 = vcombine.low %v519_v21, %v523_v22  ;;  %v7427_v63 = vcombine.low %v520_v25, %v524_v26  ;;  %v3537_v21 = vld [vmem:[#allocation7 + $0x20] sm:$0xff]  ;;  %v3534_v22 = vld [vmem:[#allocation7 + $0x8] sm:$0xff] }
 0x1ca   :  { %v3538_v25 = vld [vmem:[#allocation7 + $0x28] sm:$0xff] }
 0x1cb   :  { %3302 = vmatpush1.bf16.msra.mxu0 %v7361_v30  ;;  %3466 = vmatpush1.bf16.msra.mxu1 %v7363_v31  ;;  %v527_v30 = vld [vmem:[#allocation5 + $0xd10] sm:$0xff] }
 0x1cc   :  { %3303 = vmatprep.subr.bf16.mxu0 %v7370_v32  ;;  %3467 = vmatprep.subr.bf16.mxu1 %v7372_v34  ;;  %v531_v31 = vld [vmem:[#allocation5 + $0xd30] sm:$0xff]  ;;  %v528_v32 = vld [vmem:[#allocation5 + $0xd18] sm:$0xff] }
 0x1cd   :  { %v532_v34 = vld [vmem:[#allocation5 + $0xd38] sm:$0xff]  ;;  %v7434_v49 = vcombine.high %v527_v30, %v531_v31 }
 0x1ce   :  { %v7435_v42 = vcombine.low %v528_v32, %v532_v34 }
 0x1cf   :  { %3304 = vmatpush1.bf16.msra.mxu0 %v7369_v37  ;;  %3468 = vmatpush1.bf16.msra.mxu1 %v7371_v39  ;;  %v539_v37 = vld [vmem:[#allocation5 + $0xd70] sm:$0xff]  ;;  %v536_v39 = vld [vmem:[#allocation5 + $0xd58] sm:$0xff] }
 0x1d0   :  { %3305 = vmatprep.subr.bf16.mxu0 %v7378_v40  ;;  %3469 = vmatprep.subr.bf16.mxu1 %v7380_v41  ;;  %v540_v40 = vld [vmem:[#allocation5 + $0xd78] sm:$0xff]  ;;  %v7433_v41 = vcombine.low %v527_v30, %v531_v31  ;;  %v7442_v43 = vcombine.high %v535_v36, %v539_v37  ;;  %v3545_v30 = vld [vmem:[#allocation7 + $0x60] sm:$0xff] }
 0x1d1   :  { %v7444_v44 = vcombine.high %v536_v39, %v540_v40  ;;  %v7443_v51 = vcombine.low %v536_v39, %v540_v40  ;;  %v3550_v39 = vld [vmem:[#allocation7 + $0x88] sm:$0xff] }
 0x1d2   :  { %v3554_v40 = vld [vmem:[#allocation7 + $0xa8] sm:$0xff] }
 0x1d3   :  { %3306 = vmatpush1.bf16.msra.mxu0 %v7377_v46  ;;  %3470 = vmatpush1.bf16.msra.mxu1 %v7379_v48  ;;  %v547_v46 = vld [vmem:[#allocation5 + $0xdb0] sm:$0xff]  ;;  %v544_v48 = vld [vmem:[#allocation5 + $0xd98] sm:$0xff] }
 0x1d4   :  { %3307 = vmatprep.subr.bf16.mxu0 %v7386_v15  ;;  %3471 = vmatprep.subr.bf16.mxu1 %v7388_v50  ;;  %v548_v15 = vld [vmem:[#allocation5 + $0xdb8] sm:$0xff]  ;;  %v7441_v50 = vcombine.low %v535_v36, %v539_v37  ;;  %v7450_v20 = vcombine.high %v543_v45, %v547_v46  ;;  %v7449_v6 = vcombine.low %v543_v45, %v547_v46  ;;  %v3557_v45 = vld [vmem:[#allocation7 + $0xc0] sm:$0xff] }
 0x1d5   :  { %v7451_v8 = vcombine.low %v544_v48, %v548_v15  ;;  %v3561_v46 = vld [vmem:[#allocation7 + $0xe0] sm:$0xff] }
 0x1d7   :  { %3308 = vmatpush1.bf16.msra.mxu0 %v7385_v55  ;;  %3472 = vmatpush1.bf16.msra.mxu1 %v7387_v9  ;;  %v7452_v9 = vcombine.high %v544_v48, %v548_v15  ;;  %v3558_v48 = vld [vmem:[#allocation7 + $0xc8] sm:$0xff] }
 0x1d8   :  { %3309 = vmatprep.subr.bf16.mxu0 %v7394_v56  ;;  %3473 = vmatprep.subr.bf16.mxu1 %v7396_v57  ;;  %v552_v56 = vld [vmem:[#allocation5 + $0xdd8] sm:$0xff]  ;;  %v559_v57 = vld [vmem:[#allocation5 + $0xe10] sm:$0xff]  ;;  %v3562_v15 = vld [vmem:[#allocation7 + $0xe8] sm:$0xff] }
 0x1db   :  { %3310 = vmatpush1.bf16.msra.mxu0 %v7393_v1  ;;  %3474 = vmatpush1.bf16.msra.mxu1 %v7395_v24  ;;  %v560_v1 = vld [vmem:[#allocation5 + $0xe18] sm:$0xff] }
 0x1dc   :  { %3320 = vmatprep.subr.bf16.mxu0 %v7402_v2  ;;  %3484 = vmatprep.subr.bf16.mxu1 %v7404_v4  ;;  %v564_v24 = vld [vmem:[#allocation5 + $0xe38] sm:$0xff] }
 0x1dd   :  { %v7468_v13 = vcombine.high %v560_v1, %v564_v24 }
 0x1de   :  { %3312 = vmatmul.mubr.bf16.vlgmr.msra.gmra.mrb[4].mxu0 %v8261_v58  ;;  %3476 = vmatmul.mubr.bf16.vlgmr.msra.gmra.mrb[4].mxu1 %v8261_v58  ;;  %v7419_v58 = vcombine.low %v512_v16, %v516_v38  ;;  %v7465_v16 = vcombine.low %v559_v57, %v563_v60  ;;  %v7459_v38 = vcombine.low %v552_v56, %v556_v0 }
 0x1df   :  { %3321 = vmatpush1.bf16.msra.mxu0 %v7401_v10  ;;  %3485 = vmatpush1.bf16.msra.mxu1 %v7403_v11  ;;  %v7458_v10 = vcombine.high %v551_v52, %v555_v54  ;;  %v7466_v11 = vcombine.high %v559_v57, %v563_v60  ;;  %v3565_v52 = vld [vmem:[#allocation7 + $0x100] sm:$0xff]  ;;  %v7497_v57 = vcombine.low %v3557_v45, %v3561_v46 }
 0x1e0   :  { %3322 = vmatprep.subr.bf16.mxu0 %v7410_v12  ;;  %3486 = vmatprep.subr.bf16.mxu1 %v7412_v33  ;;  %v7460_v33 = vcombine.high %v552_v56, %v556_v0  ;;  %v2858_v26 = vand.u32 %v7465_v16, %v8271_v3  ;;  %v3569_v54 = vld [vmem:[#allocation7 + $0x120] sm:$0xff]  ;;  %v3570_v56 = vld [vmem:[#allocation7 + $0x128] sm:$0xff]  ;;  %v7499_v60 = vcombine.low %v3558_v48, %v3562_v15 }
 0x1e1   :  { %7471 = vmatprep.mubr.msk.bf16.mxu0 %vm2837_vm0, %v8263_v5  ;;  %7472 = vmatprep.mubr.msk.bf16.mxu1 %vm2837_vm0, %v8263_v5  ;;  %v7436_v5 = vcombine.high %v528_v32, %v532_v34  ;;  %v3542_v32 = vld [vmem:[#allocation7 + $0x48] sm:$0xff] }
 0x1e2   :  { %v3546_v34 = vld [vmem:[#allocation7 + $0x68] sm:$0xff] }
 0x1e3   :  { %3323 = vmatpush1.bf16.msra.mxu0 %v7409_v17  ;;  %3487 = vmatpush1.bf16.msra.mxu1 %v7411_v18  ;;  %v2861_v17 = vand.u32 %v7466_v11, %v8271_v3  ;;  %v7467_v18 = vcombine.low %v560_v1, %v564_v24  ;;  %v7484_v37 = vcombine.high %v3542_v32, %v3546_v34  ;;  %v3573_v1 = vld [vmem:[#allocation7 + $0x140] sm:$0xff] }
 0x1e4   :  { %3324 = vmatprep.subr.bf16.mxu0 %v7418_v59  ;;  %3488 = vmatprep.subr.bf16.mxu1 %v7420_v19  ;;  %v2867_v59 = vand.u32 %v7468_v13, %v8271_v3  ;;  %v3533_v19 = vld [vmem:[#allocation7] sm:$0xff]  ;;  %v3586_v13 = vld [vmem:[#allocation7 + $0x1a8] sm:$0xff] }
 0x1e5   :  { %v7473_v31 = vcombine.low %v3533_v19, %v3537_v21  ;;  %v3577_v24 = vld [vmem:[#allocation7 + $0x160] sm:$0xff] }
 0x1e6   :  { %v3581_v11 = vld [vmem:[#allocation7 + $0x180] sm:$0xff] }
 0x1e7   :  { %3325 = vmatpush1.bf16.msra.mxu0 %v7417_v27  ;;  %3489 = vmatpush1.bf16.msra.mxu1 %v7419_v58  ;;  %v2864_v27 = vand.u32 %v7467_v18, %v8271_v3  ;;  %v7474_v58 = vcombine.high %v3533_v19, %v3537_v21  ;;  %v3589_v18 = vld [vmem:[#allocation7 + $0x1c0] sm:$0xff]  ;;  %v3590_v19 = vld [vmem:[#allocation7 + $0x1c8] sm:$0xff] }
 0x1e8   :  { %3326 = vmatprep.subr.bf16.mxu0 %v7426_v47  ;;  %3490 = vmatprep.subr.bf16.mxu1 %v7428_v29  ;;  %v7476_v47 = vcombine.high %v3534_v22, %v3538_v25  ;;  %v3541_v29 = vld [vmem:[#allocation7 + $0x40] sm:$0xff]  ;;  %v3594_v21 = vld [vmem:[#allocation7 + $0x1e8] sm:$0xff] }
 0x1eb   :  { %3327 = vmatpush1.bf16.msra.mxu0 %v7425_v35  ;;  %3491 = vmatpush1.bf16.msra.mxu1 %v7427_v63  ;;  %v7475_v35 = vcombine.low %v3534_v22, %v3538_v25  ;;  %v7482_v63 = vcombine.high %v3541_v29, %v3545_v30 }
 0x1ec   :  { %3328 = vmatprep.subr.bf16.mxu0 %v7434_v49  ;;  %3492 = vmatprep.subr.bf16.mxu1 %v7436_v5  ;;  %v3549_v49 = vld [vmem:[#allocation7 + $0x80] sm:$0xff] }
 0x1ed   :  { %v3553_v5 = vld [vmem:[#allocation7 + $0xa0] sm:$0xff] }
 0x1ef   :  { %3329 = vmatpush1.bf16.msra.mxu0 %v7433_v41  ;;  %3493 = vmatpush1.bf16.msra.mxu1 %v7435_v42  ;;  %v7481_v41 = vcombine.low %v3541_v29, %v3545_v30  ;;  %v7483_v42 = vcombine.low %v3542_v32, %v3546_v34  ;;  %v3598_v29 = vld [vmem:[#allocation7 + $0x208] sm:$0xff]  ;;  %v7531_v32 = vcombine.low %v3590_v19, %v3594_v21 }
 0x1f0   :  { %3330 = vmatprep.subr.bf16.mxu0 %v7442_v43  ;;  %3494 = vmatprep.subr.bf16.mxu1 %v7444_v44  ;;  %v7490_v43 = vcombine.high %v3549_v49, %v3553_v5  ;;  %v7492_v44 = vcombine.high %v3550_v39, %v3554_v40  ;;  %v3602_v30 = vld [vmem:[#allocation7 + $0x228] sm:$0xff] }
 0x1f1   :  { %v8299_v55 = vpop.f32.mrb[0].mxu0  ;;  %v8301_v61 = vpop.f32.mrb[0].mxu1 }
 0x1f2   :  { %v3028_v62 = vpop.f32.mrb[1].mxu0  ;;  %v8303_v2 = vpop.f32.mrb[1].mxu1 }
 0x1f3   :  { %v3030_v4 = vpop.f32.mrb[2].mxu0  ;;  %3331 = vmatpush1.bf16.msra.mxu0 %v7441_v50  ;;  %v3194_v7 = vpop.f32.mrb[2].mxu1  ;;  %3495 = vmatpush1.bf16.msra.mxu1 %v7443_v51  ;;  %v8309_v36 = vpack.c.bf16 %v3028_v62, %v3028_v62  ;;  %v7489_v50 = vcombine.low %v3549_v49, %v3553_v5  ;;  %v7498_v51 = vcombine.high %v3557_v45, %v3561_v46  ;;  %v3609_v49 = vld [vmem:[#allocation7 + $0x260] sm:$0xff]  ;;  %v3606_v5 = vld [vmem:[#allocation7 + $0x248] sm:$0xff] }
 0x1f4   :  { %v3031_v28 = vpop.f32.mrb[3].mxu0  ;;  %3332 = vmatprep.subr.bf16.mxu0 %v7450_v20  ;;  %v3195_v12 = vpop.f32.mrb[3].mxu1  ;;  %3496 = vmatprep.subr.bf16.mxu1 %v7452_v9  ;;  %v7500_v20 = vcombine.high %v3558_v48, %v3562_v15  ;;  %v3566_v9 = vld [vmem:[#allocation7 + $0x108] sm:$0xff]  ;;  %v7506_v62 = vcombine.high %v3565_v52, %v3569_v54  ;;  %v7505_v7 = vcombine.low %v3565_v52, %v3569_v54 }
 0x1f5   :  { %v7508_v0 = vcombine.high %v3566_v9, %v3570_v56  ;;  %v3574_v4 = vld [vmem:[#allocation7 + $0x148] sm:$0xff]  ;;  %v7507_v28 = vcombine.low %v3566_v9, %v3570_v56  ;;  %v3585_v12 = vld [vmem:[#allocation7 + $0x1a0] sm:$0xff] }
 0x1f6   :  { %v7521_v22 = vcombine.low %v3581_v11, %v3585_v12  ;;  %v3614_v45 = vld [vmem:[#allocation7 + $0x288] sm:$0xff] }
 0x1f7   :  { %3333 = vmatpush1.bf16.msra.mxu0 %v7449_v6  ;;  %3497 = vmatpush1.bf16.msra.mxu1 %v7451_v8  ;;  %v3578_v6 = vld [vmem:[#allocation7 + $0x168] sm:$0xff]  ;;  %v7514_v8 = vcombine.high %v3573_v1, %v3577_v24 }
 0x1f8   :  { %3334 = vmatprep.subr.bf16.mxu0 %v7458_v10  ;;  %3498 = vmatprep.subr.bf16.mxu1 %v7460_v33  ;;  %v7516_v10 = vcombine.high %v3574_v4, %v3578_v6  ;;  %v3582_v33 = vld [vmem:[#allocation7 + $0x188] sm:$0xff]  ;;  %v7515_v16 = vcombine.low %v3574_v4, %v3578_v6 }
 0x1f9   :  { %v7523_v25 = vcombine.low %v3582_v33, %v3586_v13  ;;  %v3618_v46 = vld [vmem:[#allocation7 + $0x2a8] sm:$0xff] }
 0x1fa   :  { %v3622_v52 = vld [vmem:[#allocation7 + $0x2c8] sm:$0xff]  ;;  %v7555_v56 = vcombine.low %v3614_v45, %v3618_v46 }
 0x1fb   :  { %3335 = vmatpush1.bf16.msra.mxu0 %v7457_v14  ;;  %3499 = vmatpush1.bf16.msra.mxu1 %v7459_v38  ;;  %v7513_v14 = vcombine.low %v3573_v1, %v3577_v24  ;;  %v7522_v38 = vcombine.high %v3581_v11, %v3585_v12  ;;  %v3626_v54 = vld [vmem:[#allocation7 + $0x2e8] sm:$0xff] }
 0x1fc   :  { %3336 = vmatprep.subr.bf16.mxu0 %v2861_v17  ;;  %3500 = vmatprep.subr.bf16.mxu1 %v2867_v59  ;;  %v7524_v17 = vcombine.high %v3582_v33, %v3586_v13  ;;  %v3593_v59 = vld [vmem:[#allocation7 + $0x1e0] sm:$0xff]  ;;  %v3630_v1 = vld [vmem:[#allocation7 + $0x308] sm:$0xff]  ;;  %v7563_v6 = vcombine.low %v3622_v52, %v3626_v54 }
 0x1fd   :  { %v3634_v24 = vld [vmem:[#allocation7 + $0x328] sm:$0xff] }
 0x1fe   :  { %v3638_v11 = vld [vmem:[#allocation7 + $0x348] sm:$0xff]  ;;  %v7571_v13 = vcombine.low %v3630_v1, %v3634_v24 }
 0x1ff   :  { %3337 = vmatpush1.bf16.msra.mxu0 %v2858_v26  ;;  %3501 = vmatpush1.bf16.msra.mxu1 %v2864_v27  ;;  %v7530_v26 = vcombine.high %v3589_v18, %v3593_v59  ;;  %v7532_v27 = vcombine.high %v3590_v19, %v3594_v21  ;;  %v3642_v12 = vld [vmem:[#allocation7 + $0x368] sm:$0xff] }
 0x200   :  { %6288 = vmatprep.subr.bf16.mxu0 %v7474_v58  ;;  %6452 = vmatprep.subr.bf16.mxu1 %v7476_v47  ;;  %v3597_v58 = vld [vmem:[#allocation7 + $0x200] sm:$0xff]  ;;  %v7579_v21 = vcombine.low %v3638_v11, %v3642_v12 }
 0x201   :  { %v3601_v47 = vld [vmem:[#allocation7 + $0x220] sm:$0xff] }
 0x202   :  { %3353 = vmatmul.mubr.bf16.vlgmr.msra.gmra.mrb[4].mxu0 %v8279_v23  ;;  %3517 = vmatmul.mubr.bf16.vlgmr.msra.gmra.mrb[4].mxu1 %v8279_v23  ;;  %v7491_v23 = vcombine.low %v3550_v39, %v3554_v40  ;;  %v7538_v34 = vcombine.high %v3597_v58, %v3601_v47  ;;  %v7537_v39 = vcombine.low %v3597_v58, %v3601_v47  ;;  %v3654_v58 = vld [vmem:[#allocation7 + $0x3c8] sm:$0xff] }
 0x203   :  { %6289 = vmatpush1.bf16.msra.mxu0 %v7473_v31  ;;  %6320 = vmatprep.mubr.bf16.mxu0 %v8309_v36  ;;  %v7529_v31 = vcombine.low %v3589_v18, %v3593_v59  ;;  %v7539_v40 = vcombine.low %v3598_v29, %v3602_v30  ;;  %v3646_v18 = vld [vmem:[#allocation7 + $0x388] sm:$0xff] }
 0x204   :  { %6453 = vmatpush1.bf16.msra.mxu1 %v7475_v35  ;;  %6484 = vmatprep.mubr.bf16.mxu1 %v8309_v36  ;;  %v7540_v35 = vcombine.high %v3598_v29, %v3602_v30  ;;  %v3650_v59 = vld [vmem:[#allocation7 + $0x3a8] sm:$0xff] }
 0x205   :  { %6290 = vmatprep.subr.bf16.mxu0 %v7482_v63  ;;  %6454 = vmatprep.subr.bf16.mxu1 %v7484_v37  ;;  %v3605_v63 = vld [vmem:[#allocation7 + $0x240] sm:$0xff]  ;;  %v3610_v37 = vld [vmem:[#allocation7 + $0x268] sm:$0xff]  ;;  %v7587_v30 = vcombine.low %v3646_v18, %v3650_v59 }
 0x206   :  { %v7545_v48 = vcombine.low %v3605_v63, %v3609_v49  ;;  %v7547_v15 = vcombine.low %v3606_v5, %v3610_v37  ;;  %v3658_v47 = vld [vmem:[#allocation7 + $0x3e8] sm:$0xff] }
 0x207   :  { %6291 = vmatpush1.bf16.msra.mxu0 %v7481_v41  ;;  %v7546_v41 = vcombine.high %v3605_v63, %v3609_v49  ;;  %v3662_v63 = vld [vmem:[#allocation7 + $0x408] sm:$0xff] }
 0x208   :  { %6455 = vmatpush1.bf16.msra.mxu1 %v7483_v42  ;;  %6292 = vmatprep.subr.bf16.mxu0 %v7490_v43  ;;  %v7548_v42 = vcombine.high %v3606_v5, %v3610_v37  ;;  %v3613_v43 = vld [vmem:[#allocation7 + $0x280] sm:$0xff]  ;;  %v3666_v49 = vld [vmem:[#allocation7 + $0x428] sm:$0xff]  ;;  %v7595_v37 = vcombine.low %v3654_v58, %v3658_v47 }
 0x209   :  { %6456 = vmatprep.subr.bf16.mxu1 %v7492_v44  ;;  %v3617_v44 = vld [vmem:[#allocation7 + $0x2a0] sm:$0xff] }
 0x20a   :  { %v7553_v9 = vcombine.low %v3613_v43, %v3617_v44 }
 0x20b   :  { %6293 = vmatpush1.bf16.msra.mxu0 %v7489_v50  ;;  %v7554_v50 = vcombine.high %v3613_v43, %v3617_v44  ;;  %v3670_v44 = vld [vmem:[#allocation7 + $0x448] sm:$0xff] }
 0x20c   :  { %6457 = vmatpush1.bf16.msra.mxu1 %v7491_v23  ;;  %6294 = vmatprep.subr.bf16.mxu0 %v7498_v51  ;;  %v7556_v23 = vcombine.high %v3614_v45, %v3618_v46  ;;  %v3621_v51 = vld [vmem:[#allocation7 + $0x2c0] sm:$0xff]  ;;  %v3674_v45 = vld [vmem:[#allocation7 + $0x468] sm:$0xff]  ;;  %v8317_v46 = vpack.c.bf16 %v8299_v55, %v8299_v55 }
 0x20d   :  { %6458 = vmatprep.subr.bf16.mxu1 %v7500_v20  ;;  %v3625_v20 = vld [vmem:[#allocation7 + $0x2e0] sm:$0xff] }
 0x20e   :  { %v7561_v4 = vcombine.low %v3621_v51, %v3625_v20 }
 0x20f   :  { %6295 = vmatpush1.bf16.msra.mxu0 %v7497_v57  ;;  %v7562_v57 = vcombine.high %v3621_v51, %v3625_v20  ;;  %v8321_v51 = vpack.c.bf16 %v8303_v2, %v8303_v2  ;;  %v7612_v20 = vcombine.high %v3670_v44, %v3674_v45  ;;  %v3685_v2 = vld [vmem:[#allocation7 + $0x4c0] sm:$0xff] }
 0x210   :  { %6459 = vmatpush1.bf16.msra.mxu1 %v7499_v60  ;;  %6296 = vmatprep.subr.bf16.mxu0 %v7506_v62  ;;  %v7564_v60 = vcombine.high %v3622_v52, %v3626_v54  ;;  %v3629_v62 = vld [vmem:[#allocation7 + $0x300] sm:$0xff]  ;;  %v3678_v52 = vld [vmem:[#allocation7 + $0x488] sm:$0xff] }
 0x211   :  { %6460 = vmatprep.subr.bf16.mxu1 %v7508_v0  ;;  %v3633_v0 = vld [vmem:[#allocation7 + $0x320] sm:$0xff]  ;;  %v3682_v54 = vld [vmem:[#allocation7 + $0x4a8] sm:$0xff] }
 0x212   :  { %v7569_v33 = vcombine.low %v3629_v62, %v3633_v0 }
 0x213   :  { %6297 = vmatpush1.bf16.msra.mxu0 %v7505_v7  ;;  %v7570_v7 = vcombine.high %v3629_v62, %v3633_v0  ;;  %v3686_v62 = vld [vmem:[#allocation7 + $0x4c8] sm:$0xff] }
 0x214   :  { %6461 = vmatpush1.bf16.msra.mxu1 %v7507_v28  ;;  %6298 = vmatprep.subr.bf16.mxu0 %v7514_v8  ;;  %v7572_v28 = vcombine.high %v3630_v1, %v3634_v24  ;;  %v3637_v8 = vld [vmem:[#allocation7 + $0x340] sm:$0xff]  ;;  %v3690_v0 = vld [vmem:[#allocation7 + $0x4e8] sm:$0xff]  ;;  %v7619_v24 = vcombine.low %v3678_v52, %v3682_v54 }
 0x215   :  { %6462 = vmatprep.subr.bf16.mxu1 %v7516_v10  ;;  %v3641_v10 = vld [vmem:[#allocation7 + $0x360] sm:$0xff] }
 0x216   :  { %v7577_v19 = vcombine.low %v3637_v8, %v3641_v10 }
 0x217   :  { %6299 = vmatpush1.bf16.msra.mxu0 %v7513_v14  ;;  %v7578_v14 = vcombine.high %v3637_v8, %v3641_v10  ;;  %v3694_v8 = vld [vmem:[#allocation7 + $0x508] sm:$0xff] }
 0x218   :  { %6463 = vmatpush1.bf16.msra.mxu1 %v7515_v16  ;;  %6300 = vmatprep.subr.bf16.mxu0 %v7522_v38  ;;  %v7580_v16 = vcombine.high %v3638_v11, %v3642_v12  ;;  %v3645_v38 = vld [vmem:[#allocation7 + $0x380] sm:$0xff]  ;;  %v3698_v10 = vld [vmem:[#allocation7 + $0x528] sm:$0xff]  ;;  %v7627_v12 = vcombine.low %v3686_v62, %v3690_v0 }
 0x219   :  { %6464 = vmatprep.subr.bf16.mxu1 %v7524_v17  ;;  %v3649_v17 = vld [vmem:[#allocation7 + $0x3a0] sm:$0xff] }
 0x21a   :  { %v7585_v29 = vcombine.low %v3645_v38, %v3649_v17 }
 0x21b   :  { %6301 = vmatpush1.bf16.msra.mxu0 %v7521_v22  ;;  %v7586_v22 = vcombine.high %v3645_v38, %v3649_v17  ;;  %v3702_v38 = vld [vmem:[#allocation7 + $0x548] sm:$0xff] }
 0x21c   :  { %6465 = vmatpush1.bf16.msra.mxu1 %v7523_v25  ;;  %6302 = vmatprep.subr.bf16.mxu0 %v7530_v26  ;;  %v7588_v25 = vcombine.high %v3646_v18, %v3650_v59  ;;  %v3653_v26 = vld [vmem:[#allocation7 + $0x3c0] sm:$0xff]  ;;  %v3706_v17 = vld [vmem:[#allocation7 + $0x568] sm:$0xff]  ;;  %v7635_v59 = vcombine.low %v3694_v8, %v3698_v10 }
 0x21d   :  { %6466 = vmatprep.subr.bf16.mxu1 %v7532_v27  ;;  %v3657_v27 = vld [vmem:[#allocation7 + $0x3e0] sm:$0xff] }
 0x21e   :  { %v7593_v5 = vcombine.low %v3653_v26, %v3657_v27 }
 0x21f   :  { %6303 = vmatpush1.bf16.msra.mxu0 %v7529_v31  ;;  %v7594_v31 = vcombine.high %v3653_v26, %v3657_v27  ;;  %v3710_v26 = vld [vmem:[#allocation7 + $0x588] sm:$0xff] }
 0x220   :  { %6467 = vmatpush1.bf16.msra.mxu1 %v7531_v32  ;;  %6304 = vmatprep.subr.bf16.mxu0 %v7538_v34  ;;  %v7596_v32 = vcombine.high %v3654_v58, %v3658_v47  ;;  %v3661_v34 = vld [vmem:[#allocation7 + $0x400] sm:$0xff]  ;;  %v3714_v27 = vld [vmem:[#allocation7 + $0x5a8] sm:$0xff]  ;;  %v7643_v47 = vcombine.low %v3702_v38, %v3706_v17 }
 0x221   :  { %6468 = vmatprep.subr.bf16.mxu1 %v7540_v35  ;;  %v3665_v35 = vld [vmem:[#allocation7 + $0x420] sm:$0xff] }
 0x222   :  { %v7601_v43 = vcombine.low %v3661_v34, %v3665_v35 }
 0x223   :  { %6305 = vmatpush1.bf16.msra.mxu0 %v7537_v39  ;;  %v7602_v39 = vcombine.high %v3661_v34, %v3665_v35  ;;  %v3718_v34 = vld [vmem:[#allocation7 + $0x5c8] sm:$0xff] }
 0x224   :  { %6469 = vmatpush1.bf16.msra.mxu1 %v7539_v40  ;;  %6306 = vmatprep.subr.bf16.mxu0 %v7546_v41  ;;  %v7604_v40 = vcombine.high %v3662_v63, %v3666_v49  ;;  %v3669_v41 = vld [vmem:[#allocation7 + $0x440] sm:$0xff]  ;;  %v3722_v35 = vld [vmem:[#allocation7 + $0x5e8] sm:$0xff] }
 0x225   :  { %6470 = vmatprep.subr.bf16.mxu1 %v7548_v42  ;;  %v3673_v42 = vld [vmem:[#allocation7 + $0x460] sm:$0xff] }
 0x226   :  { %v7609_v55 = vcombine.low %v3669_v41, %v3673_v42 }
 0x227   :  { %6307 = vmatpush1.bf16.msra.mxu0 %v7545_v48  ;;  %v7603_v48 = vcombine.low %v3662_v63, %v3666_v49  ;;  %v7651_v49 = vcombine.low %v3710_v26, %v3714_v27 }
 0x228   :  { %6471 = vmatpush1.bf16.msra.mxu1 %v7547_v15  ;;  %6308 = vmatprep.subr.bf16.mxu0 %v7554_v50  ;;  %v7610_v15 = vcombine.high %v3669_v41, %v3673_v42  ;;  %v3677_v50 = vld [vmem:[#allocation7 + $0x480] sm:$0xff]  ;;  %v3726_v41 = vld [vmem:[#allocation7 + $0x608] sm:$0xff] }
 0x229   :  { %6472 = vmatprep.subr.bf16.mxu1 %v7556_v23  ;;  %v3681_v23 = vld [vmem:[#allocation7 + $0x4a0] sm:$0xff]  ;;  %v3730_v42 = vld [vmem:[#allocation7 + $0x628] sm:$0xff] }
 0x22a   :  { %v7617_v1 = vcombine.low %v3677_v50, %v3681_v23 }
 0x22b   :  { %6309 = vmatpush1.bf16.msra.mxu0 %v7553_v9  ;;  %v7611_v9 = vcombine.low %v3670_v44, %v3674_v45  ;;  %v7659_v44 = vcombine.low %v3718_v34, %v3722_v35 }
 0x22c   :  { %6473 = vmatpush1.bf16.msra.mxu1 %v7555_v56  ;;  %6310 = vmatprep.subr.bf16.mxu0 %v7562_v57  ;;  %v7618_v56 = vcombine.high %v3677_v50, %v3681_v23  ;;  %v7620_v57 = vcombine.high %v3678_v52, %v3682_v54  ;;  %v3737_v50 = vld [vmem:[#allocation7 + $0x660] sm:$0xff]  ;;  %v3734_v23 = vld [vmem:[#allocation7 + $0x648] sm:$0xff]  ;;  %v7667_v54 = vcombine.low %v3726_v41, %v3730_v42 }
 0x22d   :  { %6474 = vmatprep.subr.bf16.mxu1 %v7564_v60  ;;  %v3689_v60 = vld [vmem:[#allocation7 + $0x4e0] sm:$0xff] }
 0x22e   :  { %v7625_v11 = vcombine.low %v3685_v2, %v3689_v60 }
 0x22f   :  { %6311 = vmatpush1.bf16.msra.mxu0 %v7561_v4  ;;  %v7626_v4 = vcombine.high %v3685_v2, %v3689_v60  ;;  %v3742_v2 = vld [vmem:[#allocation7 + $0x688] sm:$0xff] }
 0x230   :  { %6475 = vmatpush1.bf16.msra.mxu1 %v7563_v6  ;;  %6312 = vmatprep.subr.bf16.mxu0 %v7570_v7  ;;  %v7628_v6 = vcombine.high %v3686_v62, %v3690_v0  ;;  %v3693_v7 = vld [vmem:[#allocation7 + $0x500] sm:$0xff]  ;;  %v3746_v60 = vld [vmem:[#allocation7 + $0x6a8] sm:$0xff] }
 0x231   :  { %6476 = vmatprep.subr.bf16.mxu1 %v7572_v28  ;;  %v3697_v28 = vld [vmem:[#allocation7 + $0x520] sm:$0xff] }
 0x232   :  { %v7633_v18 = vcombine.low %v3693_v7, %v3697_v28 }
 0x233   :  { %6313 = vmatpush1.bf16.msra.mxu0 %v7569_v33  ;;  %v7634_v33 = vcombine.high %v3693_v7, %v3697_v28  ;;  %v3750_v7 = vld [vmem:[#allocation7 + $0x6c8] sm:$0xff] }
 0x234   :  { %6477 = vmatpush1.bf16.msra.mxu1 %v7571_v13  ;;  %6314 = vmatprep.subr.bf16.mxu0 %v7578_v14  ;;  %v7636_v13 = vcombine.high %v3694_v8, %v3698_v10  ;;  %v3701_v14 = vld [vmem:[#allocation7 + $0x540] sm:$0xff]  ;;  %v3754_v28 = vld [vmem:[#allocation7 + $0x6e8] sm:$0xff]  ;;  %v7683_v10 = vcombine.low %v3742_v2, %v3746_v60 }
 0x235   :  { %6478 = vmatprep.subr.bf16.mxu1 %v7580_v16  ;;  %v3705_v16 = vld [vmem:[#allocation7 + $0x560] sm:$0xff] }
 0x236   :  { %v7641_v58 = vcombine.low %v3701_v14, %v3705_v16 }
 0x237   :  { %6315 = vmatpush1.bf16.msra.mxu0 %v7577_v19  ;;  %v7642_v19 = vcombine.high %v3701_v14, %v3705_v16  ;;  %v3758_v14 = vld [vmem:[#allocation7 + $0x708] sm:$0xff] }
 0x238   :  { %6479 = vmatpush1.bf16.msra.mxu1 %v7579_v21  ;;  %6316 = vmatprep.subr.bf16.mxu0 %v7586_v22  ;;  %v7644_v21 = vcombine.high %v3702_v38, %v3706_v17  ;;  %v3709_v22 = vld [vmem:[#allocation7 + $0x580] sm:$0xff]  ;;  %v3762_v16 = vld [vmem:[#allocation7 + $0x728] sm:$0xff]  ;;  %v7691_v17 = vcombine.low %v3750_v7, %v3754_v28 }
 0x239   :  { %6480 = vmatprep.subr.bf16.mxu1 %v7588_v25  ;;  %v3713_v25 = vld [vmem:[#allocation7 + $0x5a0] sm:$0xff] }
 0x23a   :  { %v7649_v63 = vcombine.low %v3709_v22, %v3713_v25 }
 0x23b   :  { %6317 = vmatpush1.bf16.msra.mxu0 %v7585_v29  ;;  %v7650_v29 = vcombine.high %v3709_v22, %v3713_v25  ;;  %v3766_v22 = vld [vmem:[#allocation7 + $0x748] sm:$0xff] }
 0x23c   :  { %6481 = vmatpush1.bf16.msra.mxu1 %v7587_v30  ;;  %6318 = vmatprep.subr.bf16.mxu0 %v7594_v31  ;;  %v7652_v30 = vcombine.high %v3710_v26, %v3714_v27  ;;  %v3717_v31 = vld [vmem:[#allocation7 + $0x5c0] sm:$0xff]  ;;  %v3770_v25 = vld [vmem:[#allocation7 + $0x768] sm:$0xff]  ;;  %v7699_v27 = vcombine.low %v3758_v14, %v3762_v16 }
 0x23d   :  { %6482 = vmatprep.subr.bf16.mxu1 %v7596_v32  ;;  %v3721_v32 = vld [vmem:[#allocation7 + $0x5e0] sm:$0xff] }
 0x23f   :  { %6319 = vmatpush1.bf16.msra.mxu0 %v7593_v5  ;;  %v7658_v5 = vcombine.high %v3717_v31, %v3721_v32 }
 0x240   :  { %6483 = vmatpush1.bf16.msra.mxu1 %v7595_v37  ;;  %6329 = vmatprep.subr.bf16.mxu0 %v7602_v39  ;;  %v7660_v37 = vcombine.high %v3718_v34, %v3722_v35  ;;  %v3725_v39 = vld [vmem:[#allocation7 + $0x600] sm:$0xff]  ;;  %v7707_v35 = vcombine.low %v3766_v22, %v3770_v25 }
 0x241   :  { %6493 = vmatprep.subr.bf16.mxu1 %v7604_v40  ;;  %v3729_v40 = vld [vmem:[#allocation7 + $0x620] sm:$0xff] }
 0x242   :  { %6321 = vmatmul.mubr.bf16.vlgmr.msra.gmra.mrb[8].mxu0 %v8317_v46  ;;  %v7666_v45 = vcombine.high %v3725_v39, %v3729_v40  ;;  %v7665_v52 = vcombine.low %v3725_v39, %v3729_v40  ;;  %v3782_v39 = vld [vmem:[#allocation7 + $0x7c8] sm:$0xff] }
 0x243   :  { %6485 = vmatmul.mubr.bf16.vlgmr.msra.gmra.mrb[8].mxu1 %v8317_v46  ;;  %6330 = vmatpush1.bf16.msra.mxu0 %v7601_v43  ;;  %v7657_v43 = vcombine.low %v3717_v31, %v3721_v32  ;;  %v3774_v31 = vld [vmem:[#allocation7 + $0x788] sm:$0xff] }
 0x244   :  { %6361 = vmatprep.mubr.bf16.mxu0 %v8321_v51  ;;  %6494 = vmatpush1.bf16.msra.mxu1 %v7603_v48  ;;  %v7668_v48 = vcombine.high %v3726_v41, %v3730_v42  ;;  %v3778_v32 = vld [vmem:[#allocation7 + $0x7a8] sm:$0xff] }
 0x245   :  { %6525 = vmatprep.mubr.bf16.mxu1 %v8321_v51  ;;  %6331 = vmatprep.subr.bf16.mxu0 %v7610_v15  ;;  %v3733_v15 = vld [vmem:[#allocation7 + $0x640] sm:$0xff]  ;;  %v3786_v40 = vld [vmem:[#allocation7 + $0x7e8] sm:$0xff]  ;;  %v7715_v42 = vcombine.low %v3774_v31, %v3778_v32 }
 0x246   :  { %6495 = vmatprep.subr.bf16.mxu1 %v7612_v20  ;;  %v3738_v20 = vld [vmem:[#allocation7 + $0x668] sm:$0xff]  ;;  %v7673_v62 = vcombine.low %v3733_v15, %v3737_v50 }
 0x247   :  { %6332 = vmatpush1.bf16.msra.mxu0 %v7609_v55  ;;  %v7674_v55 = vcombine.high %v3733_v15, %v3737_v50  ;;  %v7675_v0 = vcombine.low %v3734_v23, %v3738_v20  ;;  %v3790_v15 = vld [vmem:[#allocation7 + $0x808] sm:$0xff] }
 0x248   :  { %6496 = vmatpush1.bf16.msra.mxu1 %v7611_v9  ;;  %6333 = vmatprep.subr.bf16.mxu0 %v7618_v56  ;;  %v7676_v9 = vcombine.high %v3734_v23, %v3738_v20  ;;  %v3741_v56 = vld [vmem:[#allocation7 + $0x680] sm:$0xff]  ;;  %v3794_v50 = vld [vmem:[#allocation7 + $0x828] sm:$0xff]  ;;  %v7723_v20 = vcombine.low %v3782_v39, %v3786_v40 }
 0x249   :  { %6497 = vmatprep.subr.bf16.mxu1 %v7620_v57  ;;  %v3745_v57 = vld [vmem:[#allocation7 + $0x6a0] sm:$0xff] }
 0x24a   :  { %v7681_v8 = vcombine.low %v3741_v56, %v3745_v57 }
 0x24b   :  { %6334 = vmatpush1.bf16.msra.mxu0 %v7617_v1  ;;  %v7682_v1 = vcombine.high %v3741_v56, %v3745_v57  ;;  %v3798_v56 = vld [vmem:[#allocation7 + $0x848] sm:$0xff] }
 0x24c   :  { %6498 = vmatpush1.bf16.msra.mxu1 %v7619_v24  ;;  %6335 = vmatprep.subr.bf16.mxu0 %v7626_v4  ;;  %v7684_v24 = vcombine.high %v3742_v2, %v3746_v60  ;;  %v3749_v4 = vld [vmem:[#allocation7 + $0x6c0] sm:$0xff]  ;;  %v3802_v57 = vld [vmem:[#allocation7 + $0x868] sm:$0xff]  ;;  %v8329_v60 = vpack.c.bf16 %v8301_v61, %v8301_v61 }
 0x24d   :  { %6499 = vmatprep.subr.bf16.mxu1 %v7628_v6  ;;  %v3753_v6 = vld [vmem:[#allocation7 + $0x6e0] sm:$0xff]  ;;  %v7739_v61 = vcombine.low %v3798_v56, %v3802_v57 }
 0x24e   :  { %v7689_v38 = vcombine.low %v3749_v4, %v3753_v6 }
 0x24f   :  { %6336 = vmatpush1.bf16.msra.mxu0 %v7625_v11  ;;  %v7690_v11 = vcombine.high %v3749_v4, %v3753_v6  ;;  %v3809_v4 = vld [vmem:[#allocation7 + $0x8a0] sm:$0xff]  ;;  %v3806_v6 = vld [vmem:[#allocation7 + $0x888] sm:$0xff] }
 0x250   :  { %6500 = vmatpush1.bf16.msra.mxu1 %v7627_v12  ;;  %6337 = vmatprep.subr.bf16.mxu0 %v7634_v33  ;;  %v7692_v12 = vcombine.high %v3750_v7, %v3754_v28  ;;  %v3757_v33 = vld [vmem:[#allocation7 + $0x700] sm:$0xff]  ;;  %v3810_v7 = vld [vmem:[#allocation7 + $0x8a8] sm:$0xff] }
 0x251   :  { %6501 = vmatprep.subr.bf16.mxu1 %v7636_v13  ;;  %v3761_v13 = vld [vmem:[#allocation7 + $0x720] sm:$0xff] }
 0x252   :  { %v7697_v26 = vcombine.low %v3757_v33, %v3761_v13 }
 0x253   :  { %6338 = vmatpush1.bf16.msra.mxu0 %v7633_v18  ;;  %v7698_v18 = vcombine.high %v3757_v33, %v3761_v13  ;;  %v3814_v33 = vld [vmem:[#allocation7 + $0x8c8] sm:$0xff] }
 0x254   :  { %6502 = vmatpush1.bf16.msra.mxu1 %v7635_v59  ;;  %6339 = vmatprep.subr.bf16.mxu0 %v7642_v19  ;;  %v7700_v59 = vcombine.high %v3758_v14, %v3762_v16  ;;  %v3765_v19 = vld [vmem:[#allocation7 + $0x740] sm:$0xff]  ;;  %v3818_v13 = vld [vmem:[#allocation7 + $0x8e8] sm:$0xff]  ;;  %v7747_v16 = vcombine.low %v3806_v6, %v3810_v7 }
 0x255   :  { %6503 = vmatprep.subr.bf16.mxu1 %v7644_v21  ;;  %v3769_v21 = vld [vmem:[#allocation7 + $0x760] sm:$0xff] }
 0x256   :  { %v7705_v34 = vcombine.low %v3765_v19, %v3769_v21 }
 0x257   :  { %6340 = vmatpush1.bf16.msra.mxu0 %v7641_v58  ;;  %v7706_v58 = vcombine.high %v3765_v19, %v3769_v21  ;;  %v3822_v19 = vld [vmem:[#allocation7 + $0x908] sm:$0xff] }
 0x258   :  { %6504 = vmatpush1.bf16.msra.mxu1 %v7643_v47  ;;  %6341 = vmatprep.subr.bf16.mxu0 %v7650_v29  ;;  %v7708_v47 = vcombine.high %v3766_v22, %v3770_v25  ;;  %v3773_v29 = vld [vmem:[#allocation7 + $0x780] sm:$0xff]  ;;  %v3826_v21 = vld [vmem:[#allocation7 + $0x928] sm:$0xff]  ;;  %v7755_v25 = vcombine.low %v3814_v33, %v3818_v13 }
 0x259   :  { %6505 = vmatprep.subr.bf16.mxu1 %v7652_v30  ;;  %v3777_v30 = vld [vmem:[#allocation7 + $0x7a0] sm:$0xff] }
 0x25a   :  { %v7713_v41 = vcombine.low %v3773_v29, %v3777_v30 }
 0x25b   :  { %6342 = vmatpush1.bf16.msra.mxu0 %v7649_v63  ;;  %v7714_v63 = vcombine.high %v3773_v29, %v3777_v30  ;;  %v3830_v29 = vld [vmem:[#allocation7 + $0x948] sm:$0xff] }
 0x25c   :  { %6506 = vmatpush1.bf16.msra.mxu1 %v7651_v49  ;;  %6343 = vmatprep.subr.bf16.mxu0 %v7658_v5  ;;  %v7716_v49 = vcombine.high %v3774_v31, %v3778_v32  ;;  %v3781_v5 = vld [vmem:[#allocation7 + $0x7c0] sm:$0xff]  ;;  %v3834_v30 = vld [vmem:[#allocation7 + $0x968] sm:$0xff]  ;;  %v7763_v32 = vcombine.low %v3822_v19, %v3826_v21 }
 0x25d   :  { %6507 = vmatprep.subr.bf16.mxu1 %v7660_v37  ;;  %v3785_v37 = vld [vmem:[#allocation7 + $0x7e0] sm:$0xff] }
 0x25e   :  { %v7721_v23 = vcombine.low %v3781_v5, %v3785_v37 }
 0x25f   :  { %6344 = vmatpush1.bf16.msra.mxu0 %v7657_v43  ;;  %v7722_v43 = vcombine.high %v3781_v5, %v3785_v37  ;;  %v3838_v5 = vld [vmem:[#allocation7 + $0x988] sm:$0xff] }
 0x260   :  { %6508 = vmatpush1.bf16.msra.mxu1 %v7659_v44  ;;  %6345 = vmatprep.subr.bf16.mxu0 %v7666_v45  ;;  %v7724_v44 = vcombine.high %v3782_v39, %v3786_v40  ;;  %v3789_v45 = vld [vmem:[#allocation7 + $0x800] sm:$0xff]  ;;  %v3842_v37 = vld [vmem:[#allocation7 + $0x9a8] sm:$0xff]  ;;  %v7771_v40 = vcombine.low %v3830_v29, %v3834_v30 }
 0x261   :  { %6509 = vmatprep.subr.bf16.mxu1 %v7668_v48  ;;  %v3793_v48 = vld [vmem:[#allocation7 + $0x820] sm:$0xff] }
 0x262   :  { %v7729_v2 = vcombine.low %v3789_v45, %v3793_v48 }
 0x263   :  { %6346 = vmatpush1.bf16.msra.mxu0 %v7665_v52  ;;  %v7730_v52 = vcombine.high %v3789_v45, %v3793_v48  ;;  %v3846_v45 = vld [vmem:[#allocation7 + $0x9c8] sm:$0xff] }
 0x264   :  { %6510 = vmatpush1.bf16.msra.mxu1 %v7667_v54  ;;  %6347 = vmatprep.subr.bf16.mxu0 %v7674_v55  ;;  %v7732_v54 = vcombine.high %v3790_v15, %v3794_v50  ;;  %v3797_v55 = vld [vmem:[#allocation7 + $0x840] sm:$0xff]  ;;  %v3850_v48 = vld [vmem:[#allocation7 + $0x9e8] sm:$0xff] }
 0x265   :  { %6511 = vmatprep.subr.bf16.mxu1 %v7676_v9  ;;  %v3801_v9 = vld [vmem:[#allocation7 + $0x860] sm:$0xff] }
 0x266   :  { %v7737_v28 = vcombine.low %v3797_v55, %v3801_v9 }
 0x267   :  { %6348 = vmatpush1.bf16.msra.mxu0 %v7673_v62  ;;  %v7731_v62 = vcombine.low %v3790_v15, %v3794_v50  ;;  %v7779_v50 = vcombine.low %v3838_v5, %v3842_v37 }
 0x268   :  { %6512 = vmatpush1.bf16.msra.mxu1 %v7675_v0  ;;  %6349 = vmatprep.subr.bf16.mxu0 %v7682_v1  ;;  %v7738_v0 = vcombine.high %v3797_v55, %v3801_v9  ;;  %v7740_v1 = vcombine.high %v3798_v56, %v3802_v57  ;;  %v3854_v55 = vld [vmem:[#allocation7 + $0xa08] sm:$0xff]  ;;  %v7787_v57 = vcombine.low %v3846_v45, %v3850_v48 }
 0x269   :  { %6513 = vmatprep.subr.bf16.mxu1 %v7684_v24  ;;  %v3805_v24 = vld [vmem:[#allocation7 + $0x880] sm:$0xff]  ;;  %v3858_v9 = vld [vmem:[#allocation7 + $0xa28] sm:$0xff] }
 0x26a   :  { %v7745_v14 = vcombine.low %v3805_v24, %v3809_v4 }
 0x26b   :  { %6350 = vmatpush1.bf16.msra.mxu0 %v7681_v8  ;;  %v7746_v8 = vcombine.high %v3805_v24, %v3809_v4  ;;  %v3862_v24 = vld [vmem:[#allocation7 + $0xa48] sm:$0xff] }
 0x26c   :  { %6514 = vmatpush1.bf16.msra.mxu1 %v7683_v10  ;;  %6351 = vmatprep.subr.bf16.mxu0 %v7690_v11  ;;  %v7748_v10 = vcombine.high %v3806_v6, %v3810_v7  ;;  %v3813_v11 = vld [vmem:[#allocation7 + $0x8c0] sm:$0xff]  ;;  %v3866_v4 = vld [vmem:[#allocation7 + $0xa68] sm:$0xff]  ;;  %v7795_v7 = vcombine.low %v3854_v55, %v3858_v9 }
 0x26d   :  { %6515 = vmatprep.subr.bf16.mxu1 %v7692_v12  ;;  %v3817_v12 = vld [vmem:[#allocation7 + $0x8e0] sm:$0xff] }
 0x26e   :  { %v7753_v22 = vcombine.low %v3813_v11, %v3817_v12 }
 0x26f   :  { %6352 = vmatpush1.bf16.msra.mxu0 %v7689_v38  ;;  %v7754_v38 = vcombine.high %v3813_v11, %v3817_v12  ;;  %v3870_v11 = vld [vmem:[#allocation7 + $0xa88] sm:$0xff] }
 0x270   :  { %6516 = vmatpush1.bf16.msra.mxu1 %v7691_v17  ;;  %6353 = vmatprep.subr.bf16.mxu0 %v7698_v18  ;;  %v7756_v17 = vcombine.high %v3814_v33, %v3818_v13  ;;  %v3821_v18 = vld [vmem:[#allocation7 + $0x900] sm:$0xff]  ;;  %v3874_v12 = vld [vmem:[#allocation7 + $0xaa8] sm:$0xff]  ;;  %v7803_v13 = vcombine.low %v3862_v24, %v3866_v4 }
 0x271   :  { %6517 = vmatprep.subr.bf16.mxu1 %v7700_v59  ;;  %v3825_v59 = vld [vmem:[#allocation7 + $0x920] sm:$0xff] }
 0x272   :  { %v7761_v31 = vcombine.low %v3821_v18, %v3825_v59 }
 0x273   :  { %6354 = vmatpush1.bf16.msra.mxu0 %v7697_v26  ;;  %v7762_v26 = vcombine.high %v3821_v18, %v3825_v59  ;;  %v3878_v18 = vld [vmem:[#allocation7 + $0xac8] sm:$0xff] }
 0x274   :  { %6518 = vmatpush1.bf16.msra.mxu1 %v7699_v27  ;;  %6355 = vmatprep.subr.bf16.mxu0 %v7706_v58  ;;  %v7764_v27 = vcombine.high %v3822_v19, %v3826_v21  ;;  %v3829_v58 = vld [vmem:[#allocation7 + $0x940] sm:$0xff]  ;;  %v3882_v59 = vld [vmem:[#allocation7 + $0xae8] sm:$0xff]  ;;  %v7811_v21 = vcombine.low %v3870_v11, %v3874_v12 }
 0x275   :  { %6519 = vmatprep.subr.bf16.mxu1 %v7708_v47  ;;  %v3833_v47 = vld [vmem:[#allocation7 + $0x960] sm:$0xff] }
 0x276   :  { %v7769_v39 = vcombine.low %v3829_v58, %v3833_v47 }
 0x277   :  { %6356 = vmatpush1.bf16.msra.mxu0 %v7705_v34  ;;  %v7770_v34 = vcombine.high %v3829_v58, %v3833_v47  ;;  %v3886_v58 = vld [vmem:[#allocation7 + $0xb08] sm:$0xff] }
 0x278   :  { %6520 = vmatpush1.bf16.msra.mxu1 %v7707_v35  ;;  %6357 = vmatprep.subr.bf16.mxu0 %v7714_v63  ;;  %v7772_v35 = vcombine.high %v3830_v29, %v3834_v30  ;;  %v3837_v63 = vld [vmem:[#allocation7 + $0x980] sm:$0xff]  ;;  %v3890_v47 = vld [vmem:[#allocation7 + $0xb28] sm:$0xff]  ;;  %v7819_v30 = vcombine.low %v3878_v18, %v3882_v59 }
 0x279   :  { %6521 = vmatprep.subr.bf16.mxu1 %v7716_v49  ;;  %v3841_v49 = vld [vmem:[#allocation7 + $0x9a0] sm:$0xff] }
 0x27a   :  { %v7777_v15 = vcombine.low %v3837_v63, %v3841_v49 }
 0x27b   :  { %6358 = vmatpush1.bf16.msra.mxu0 %v7713_v41  ;;  %v7778_v41 = vcombine.high %v3837_v63, %v3841_v49  ;;  %v3894_v63 = vld [vmem:[#allocation7 + $0xb48] sm:$0xff] }
 0x27c   :  { %6522 = vmatpush1.bf16.msra.mxu1 %v7715_v42  ;;  %6359 = vmatprep.subr.bf16.mxu0 %v7722_v43  ;;  %v7780_v42 = vcombine.high %v3838_v5, %v3842_v37  ;;  %v3845_v43 = vld [vmem:[#allocation7 + $0x9c0] sm:$0xff]  ;;  %v3898_v49 = vld [vmem:[#allocation7 + $0xb68] sm:$0xff]  ;;  %v7827_v37 = vcombine.low %v3886_v58, %v3890_v47 }
 0x27d   :  { %6523 = vmatprep.subr.bf16.mxu1 %v7724_v44  ;;  %v3849_v44 = vld [vmem:[#allocation7 + $0x9e0] sm:$0xff] }
 0x27e   :  { %v7785_v56 = vcombine.low %v3845_v43, %v3849_v44 }
 0x27f   :  { %6360 = vmatpush1.bf16.msra.mxu0 %v7721_v23  ;;  %v7786_v23 = vcombine.high %v3845_v43, %v3849_v44  ;;  %v3902_v43 = vld [vmem:[#allocation7 + $0xb88] sm:$0xff] }
 0x280   :  { %6524 = vmatpush1.bf16.msra.mxu1 %v7723_v20  ;;  %6370 = vmatprep.subr.bf16.mxu0 %v7730_v52  ;;  %v7788_v20 = vcombine.high %v3846_v45, %v3850_v48  ;;  %v3853_v52 = vld [vmem:[#allocation7 + $0xa00] sm:$0xff]  ;;  %v3906_v44 = vld [vmem:[#allocation7 + $0xba8] sm:$0xff]  ;;  %v7835_v48 = vcombine.low %v3894_v63, %v3898_v49 }
 0x281   :  { %6534 = vmatprep.subr.bf16.mxu1 %v7732_v54  ;;  %v3857_v54 = vld [vmem:[#allocation7 + $0xa20] sm:$0xff] }
 0x282   :  { %6362 = vmatmul.mubr.bf16.vlgmr.msra.gmra.mrb[8].mxu0 %v8329_v60  ;;  %v7793_v6 = vcombine.low %v3853_v52, %v3857_v54 }
 0x283   :  { %6526 = vmatmul.mubr.bf16.vlgmr.msra.gmra.mrb[8].mxu1 %v8329_v60  ;;  %6371 = vmatpush1.bf16.msra.mxu0 %v7729_v2  ;;  %v7794_v2 = vcombine.high %v3853_v52, %v3857_v54  ;;  %v3910_v52 = vld [vmem:[#allocation7 + $0xbc8] sm:$0xff] }
 0x284   :  { %6535 = vmatpush1.bf16.msra.mxu1 %v7731_v62  ;;  %6372 = vmatprep.subr.bf16.mxu0 %v7738_v0  ;;  %v7796_v62 = vcombine.high %v3854_v55, %v3858_v9  ;;  %v3861_v0 = vld [vmem:[#allocation7 + $0xa40] sm:$0xff]  ;;  %v3914_v54 = vld [vmem:[#allocation7 + $0xbe8] sm:$0xff]  ;;  %v7843_v9 = vcombine.low %v3902_v43, %v3906_v44 }
 0x285   :  { %6536 = vmatprep.subr.bf16.mxu1 %v7740_v1  ;;  %v3865_v1 = vld [vmem:[#allocation7 + $0xa60] sm:$0xff] }
 0x286   :  { %v7801_v33 = vcombine.low %v3861_v0, %v3865_v1 }
 0x287   :  { %6373 = vmatpush1.bf16.msra.mxu0 %v7737_v28  ;;  %v7802_v28 = vcombine.high %v3861_v0, %v3865_v1  ;;  %v3918_v0 = vld [vmem:[#allocation7 + $0xc08] sm:$0xff] }
 0x288   :  { %6537 = vmatpush1.bf16.msra.mxu1 %v7739_v61  ;;  %6374 = vmatprep.subr.bf16.mxu0 %v7746_v8  ;;  %v7804_v61 = vcombine.high %v3862_v24, %v3866_v4  ;;  %v3869_v8 = vld [vmem:[#allocation7 + $0xa80] sm:$0xff]  ;;  %v3922_v1 = vld [vmem:[#allocation7 + $0xc28] sm:$0xff]  ;;  %v7851_v4 = vcombine.low %v3910_v52, %v3914_v54 }
 0x289   :  { %6538 = vmatprep.subr.bf16.mxu1 %v7748_v10  ;;  %v3873_v10 = vld [vmem:[#allocation7 + $0xaa0] sm:$0xff] }
 0x28a   :  { %v7809_v19 = vcombine.low %v3869_v8, %v3873_v10 }
 0x28b   :  { %6375 = vmatpush1.bf16.msra.mxu0 %v7745_v14  ;;  %v7810_v14 = vcombine.high %v3869_v8, %v3873_v10 }
 0x28c   :  { %6539 = vmatpush1.bf16.msra.mxu1 %v7747_v16  ;;  %6376 = vmatprep.subr.bf16.mxu0 %v7754_v38  ;;  %v7812_v16 = vcombine.high %v3870_v11, %v3874_v12  ;;  %v3877_v38 = vld [vmem:[#allocation7 + $0xac0] sm:$0xff]  ;;  %v3926_v12 = vld [vmem:[#allocation7 + $0xc48] sm:$0xff] }
 0x28d   :  { %6540 = vmatprep.subr.bf16.mxu1 %v7756_v17  ;;  %v3881_v17 = vld [vmem:[#allocation7 + $0xae0] sm:$0xff] }
 0x28e   :  { %v7817_v29 = vcombine.low %v3877_v38, %v3881_v17  ;;  %v3929_v11 = vld [vmem:[#allocation7 + $0xc60] sm:$0xff] }
 0x28f   :  { %6377 = vmatpush1.bf16.msra.mxu0 %v7753_v22  ;;  %v7818_v22 = vcombine.high %v3877_v38, %v3881_v17  ;;  %v7859_v17 = vcombine.low %v3918_v0, %v3922_v1 }
 0x290   :  { %6541 = vmatpush1.bf16.msra.mxu1 %v7755_v25  ;;  %6378 = vmatprep.subr.bf16.mxu0 %v7762_v26  ;;  %v7820_v25 = vcombine.high %v3878_v18, %v3882_v59  ;;  %v3885_v26 = vld [vmem:[#allocation7 + $0xb00] sm:$0xff] }
 0x291   :  { %6542 = vmatprep.subr.bf16.mxu1 %v7764_v27  ;;  %v3889_v27 = vld [vmem:[#allocation7 + $0xb20] sm:$0xff] }
 0x292   :  { %v7825_v5 = vcombine.low %v3885_v26, %v3889_v27 }
 0x293   :  { %6379 = vmatpush1.bf16.msra.mxu0 %v7761_v31  ;;  %v7826_v31 = vcombine.high %v3885_v26, %v3889_v27  ;;  %v3937_v27 = vld [vmem:[#allocation7 + $0xca0] sm:$0xff] }
 0x294   :  { %6543 = vmatpush1.bf16.msra.mxu1 %v7763_v32  ;;  %6380 = vmatprep.subr.bf16.mxu0 %v7770_v34  ;;  %v7828_v32 = vcombine.high %v3886_v58, %v3890_v47  ;;  %v3893_v34 = vld [vmem:[#allocation7 + $0xb40] sm:$0xff]  ;;  %v3934_v58 = vld [vmem:[#allocation7 + $0xc88] sm:$0xff] }
 0x295   :  { %6544 = vmatprep.subr.bf16.mxu1 %v7772_v35  ;;  %v3897_v35 = vld [vmem:[#allocation7 + $0xb60] sm:$0xff]  ;;  %v3938_v47 = vld [vmem:[#allocation7 + $0xca8] sm:$0xff] }
 0x296   :  { %v7833_v45 = vcombine.low %v3893_v34, %v3897_v35 }
 0x297   :  { %6381 = vmatpush1.bf16.msra.mxu0 %v7769_v39  ;;  %v7834_v39 = vcombine.high %v3893_v34, %v3897_v35  ;;  %v7876_v34 = vcombine.high %v3934_v58, %v3938_v47  ;;  %v3941_v35 = vld [vmem:[#allocation7 + $0xcc0] sm:$0xff] }
 0x298   :  { %6545 = vmatpush1.bf16.msra.mxu1 %v7771_v40  ;;  %6382 = vmatprep.subr.bf16.mxu0 %v7778_v41  ;;  %v7836_v40 = vcombine.high %v3894_v63, %v3898_v49  ;;  %v3901_v41 = vld [vmem:[#allocation7 + $0xb80] sm:$0xff]  ;;  %v3942_v49 = vld [vmem:[#allocation7 + $0xcc8] sm:$0xff] }
 0x299   :  { %6546 = vmatprep.subr.bf16.mxu1 %v7780_v42  ;;  %v3905_v42 = vld [vmem:[#allocation7 + $0xba0] sm:$0xff] }
 0x29a   :  { %v7841_v55 = vcombine.low %v3901_v41, %v3905_v42  ;;  %v3945_v63 = vld [vmem:[#allocation7 + $0xce0] sm:$0xff] }
 0x29b   :  { %6383 = vmatpush1.bf16.msra.mxu0 %v7777_v15  ;;  %v7842_v15 = vcombine.high %v3901_v41, %v3905_v42  ;;  %v3949_v42 = vld [vmem:[#allocation7 + $0xd00] sm:$0xff] }
 0x29c   :  { %6547 = vmatpush1.bf16.msra.mxu1 %v7779_v50  ;;  %6384 = vmatprep.subr.bf16.mxu0 %v7786_v23  ;;  %v7844_v50 = vcombine.high %v3902_v43, %v3906_v44  ;;  %v3909_v23 = vld [vmem:[#allocation7 + $0xbc0] sm:$0xff]  ;;  %v3950_v44 = vld [vmem:[#allocation7 + $0xd08] sm:$0xff] }
 0x29d   :  { %6548 = vmatprep.subr.bf16.mxu1 %v7788_v20  ;;  %v3913_v20 = vld [vmem:[#allocation7 + $0xbe0] sm:$0xff] }
 0x29e   :  { %v7849_v24 = vcombine.low %v3909_v23, %v3913_v20  ;;  %v3953_v43 = vld [vmem:[#allocation7 + $0xd20] sm:$0xff] }
 0x29f   :  { %6385 = vmatpush1.bf16.msra.mxu0 %v7785_v56  ;;  %v7850_v56 = vcombine.high %v3909_v23, %v3913_v20  ;;  %v3957_v20 = vld [vmem:[#allocation7 + $0xd40] sm:$0xff] }
 0x2a0   :  { %6549 = vmatpush1.bf16.msra.mxu1 %v7787_v57  ;;  %6386 = vmatprep.subr.bf16.mxu0 %v7794_v2  ;;  %v7852_v57 = vcombine.high %v3910_v52, %v3914_v54  ;;  %v3917_v2 = vld [vmem:[#allocation7 + $0xc00] sm:$0xff]  ;;  %v3958_v54 = vld [vmem:[#allocation7 + $0xd48] sm:$0xff] }
 0x2a1   :  { %6550 = vmatprep.subr.bf16.mxu1 %v7796_v62  ;;  %v3921_v62 = vld [vmem:[#allocation7 + $0xc20] sm:$0xff] }
 0x2a2   :  { %v7857_v38 = vcombine.low %v3917_v2, %v3921_v62  ;;  %v3961_v52 = vld [vmem:[#allocation7 + $0xd60] sm:$0xff] }
 0x2a3   :  { %6387 = vmatpush1.bf16.msra.mxu0 %v7793_v6  ;;  %v7858_v6 = vcombine.high %v3917_v2, %v3921_v62  ;;  %v3965_v62 = vld [vmem:[#allocation7 + $0xd80] sm:$0xff] }
 0x2a4   :  { %6551 = vmatpush1.bf16.msra.mxu1 %v7795_v7  ;;  %6388 = vmatprep.subr.bf16.mxu0 %v7802_v28  ;;  %v7860_v7 = vcombine.high %v3918_v0, %v3922_v1  ;;  %v3969_v0 = vld [vmem:[#allocation7 + $0xda0] sm:$0xff]  ;;  %v3966_v1 = vld [vmem:[#allocation7 + $0xd88] sm:$0xff] }
 0x2a5   :  { %6552 = vmatprep.subr.bf16.mxu1 %v7804_v61  ;;  %v3925_v61 = vld [vmem:[#allocation7 + $0xc40] sm:$0xff] }
 0x2a7   :  { %6389 = vmatpush1.bf16.msra.mxu0 %v7801_v33  ;;  %v3930_v33 = vld [vmem:[#allocation7 + $0xc68] sm:$0xff] }
 0x2a8   :  { %6553 = vmatpush1.bf16.msra.mxu1 %v7803_v13  ;;  %6390 = vmatprep.subr.bf16.mxu0 %v7810_v14  ;;  %v7868_v26 = vcombine.high %v3926_v12, %v3930_v33 }
 0x2a9   :  { %6554 = vmatprep.subr.bf16.mxu1 %v7812_v16 }
 0x2ab   :  { %6391 = vmatpush1.bf16.msra.mxu0 %v7809_v19 }
 0x2ac   :  { %6555 = vmatpush1.bf16.msra.mxu1 %v7811_v21  ;;  %6392 = vmatprep.subr.bf16.mxu0 %v7818_v22  ;;  %v3933_v21 = vld [vmem:[#allocation7 + $0xc80] sm:$0xff] }
 0x2ad   :  { %6556 = vmatprep.subr.bf16.mxu1 %v7820_v25  ;;  %v7866_v25 = vcombine.high %v3925_v61, %v3929_v11 }
 0x2af   :  { %6393 = vmatpush1.bf16.msra.mxu0 %v7817_v29 }
 0x2b0   :  { %6557 = vmatpush1.bf16.msra.mxu1 %v7819_v30  ;;  %6394 = vmatprep.subr.bf16.mxu0 %v7826_v31  ;;  %v7865_v30 = vcombine.low %v3925_v61, %v3929_v11  ;;  %v7867_v31 = vcombine.low %v3926_v12, %v3930_v33  ;;  %v7906_v61 = vcombine.high %v3965_v62, %v3969_v0  ;;  %v3974_v11 = vld [vmem:[#allocation7 + $0xdc8] sm:$0xff]  ;;  %v3981_v33 = vld [vmem:[#allocation7 + $0xe00] sm:$0xff] }
 0x2b1   :  { %6558 = vmatprep.subr.bf16.mxu1 %v7828_v32  ;;  %v7874_v32 = vcombine.high %v3933_v21, %v3937_v27  ;;  %v3978_v12 = vld [vmem:[#allocation7 + $0xde8] sm:$0xff] }
 0x2b3   :  { %6395 = vmatpush1.bf16.msra.mxu0 %v7825_v5  ;;  %v3946_v5 = vld [vmem:[#allocation7 + $0xce8] sm:$0xff] }
 0x2b4   :  { %6559 = vmatpush1.bf16.msra.mxu1 %v7827_v37  ;;  %6396 = vmatprep.subr.bf16.mxu0 %v7834_v39  ;;  %v7873_v37 = vcombine.low %v3933_v21, %v3937_v27  ;;  %v7875_v39 = vcombine.low %v3934_v58, %v3938_v47  ;;  %v7884_v41 = vcombine.high %v3942_v49, %v3946_v5 }
 0x2b5   :  { %6560 = vmatprep.subr.bf16.mxu1 %v7836_v40  ;;  %v7882_v40 = vcombine.high %v3941_v35, %v3945_v63  ;;  %v7916_v21 = vcombine.high %v3974_v11, %v3978_v12  ;;  %v7915_v27 = vcombine.low %v3974_v11, %v3978_v12 }
 0x2b7   :  { %6397 = vmatpush1.bf16.msra.mxu0 %v7833_v45  ;;  %v3954_v45 = vld [vmem:[#allocation7 + $0xd28] sm:$0xff] }
 0x2b8   :  { %6561 = vmatpush1.bf16.msra.mxu1 %v7835_v48  ;;  %6398 = vmatprep.subr.bf16.mxu0 %v7842_v15  ;;  %v7881_v48 = vcombine.low %v3941_v35, %v3945_v63  ;;  %v7883_v15 = vcombine.low %v3942_v49, %v3946_v5  ;;  %v7892_v23 = vcombine.high %v3950_v44, %v3954_v45  ;;  %v3536_v35 = vld [vmem:[#allocation7 + $0x18] sm:$0xff] }
 0x2b9   :  { %6562 = vmatprep.subr.bf16.mxu1 %v7844_v50  ;;  %v7890_v50 = vcombine.high %v3949_v42, %v3953_v43  ;;  %v3540_v63 = vld [vmem:[#allocation7 + $0x38] sm:$0xff] }
 0x2bb   :  { %6399 = vmatpush1.bf16.msra.mxu0 %v7841_v55  ;;  %v3962_v55 = vld [vmem:[#allocation7 + $0xd68] sm:$0xff] }
 0x2bc   :  { %6563 = vmatpush1.bf16.msra.mxu1 %v7843_v9  ;;  %6400 = vmatprep.subr.bf16.mxu0 %v7850_v56  ;;  %v7889_v9 = vcombine.low %v3949_v42, %v3953_v43  ;;  %v7891_v56 = vcombine.low %v3950_v44, %v3954_v45  ;;  %v7900_v2 = vcombine.high %v3958_v54, %v3962_v55  ;;  %v3544_v42 = vld [vmem:[#allocation7 + $0x58] sm:$0xff] }
 0x2bd   :  { %6564 = vmatprep.subr.bf16.mxu1 %v7852_v57  ;;  %v7898_v57 = vcombine.high %v3957_v20, %v3961_v52  ;;  %v3548_v43 = vld [vmem:[#allocation7 + $0x78] sm:$0xff] }
 0x2bf   :  { %6401 = vmatpush1.bf16.msra.mxu0 %v7849_v24  ;;  %v3970_v24 = vld [vmem:[#allocation7 + $0xda8] sm:$0xff] }
 0x2c0   :  { %6565 = vmatpush1.bf16.msra.mxu1 %v7851_v4  ;;  %6411 = vmatprep.subr.bf16.mxu0 %v7858_v6  ;;  %v7897_v4 = vcombine.low %v3957_v20, %v3961_v52  ;;  %v7899_v6 = vcombine.low %v3958_v54, %v3962_v55  ;;  %v3555_v20 = vld [vmem:[#allocation7 + $0xb0] sm:$0xff]  ;;  %v3552_v52 = vld [vmem:[#allocation7 + $0x98] sm:$0xff] }
 0x2c1   :  { %6575 = vmatprep.subr.bf16.mxu1 %v7860_v7  ;;  %v3973_v7 = vld [vmem:[#allocation7 + $0xdc0] sm:$0xff]  ;;  %v3556_v54 = vld [vmem:[#allocation7 + $0xb8] sm:$0xff] }
 0x2d5   :  { %v3354_v28 = vpop.f32.mrb[4].mxu0  ;;  %v8333_v8 = vpop.f32.mrb[4].mxu1 }
 0x2d6   :  { %v3356_v10 = vpop.f32.mrb[5].mxu0  ;;  %v3520_v14 = vpop.f32.mrb[5].mxu1  ;;  %v8337_v18 = vpack.c.bf16 %v3354_v28, %v3354_v28  ;;  %v3977_v28 = vld [vmem:[#allocation7 + $0xde0] sm:$0xff]  ;;  %v8355_v45 = vpack.c.bf16 %v8333_v8, %v8333_v8  ;;  %v7487_v8 = vcombine.low %v3544_v42, %v3548_v43 }
 0x2d7   :  { %v8335_v13 = vpack.c.bf16 %v3356_v10, %v3356_v10  ;;  %v3358_v16 = vpop.f32.mrb[6].mxu0  ;;  %v3522_v59 = vpop.f32.mrb[6].mxu1  ;;  %v8341_v29 = vpack.c.bf16 %v3520_v14, %v3520_v14  ;;  %v7908_v10 = vcombine.high %v3966_v1, %v3970_v24  ;;  %v3985_v14 = vld [vmem:[#allocation7 + $0xe20] sm:$0xff] }
 0x2d8   :  { %v3359_v19 = vpop.f32.mrb[7].mxu0  ;;  %v3523_v22 = vpop.f32.mrb[7].mxu1  ;;  %v3982_v16 = vld [vmem:[#allocation7 + $0xe08] sm:$0xff]  ;;  %v7907_v59 = vcombine.low %v3966_v1, %v3970_v24  ;;  %v7921_v58 = vcombine.low %v3981_v33, %v3985_v14  ;;  %v7495_v24 = vcombine.low %v3552_v52, %v3556_v54 }
 0x2d9   :  { %6402 = vmatprep.mubr.bf16.mxu0 %v8335_v13  ;;  %6566 = vmatprep.mubr.bf16.mxu1 %v8335_v13  ;;  %v7914_v19 = vcombine.high %v3973_v7, %v3977_v28  ;;  %v7922_v22 = vcombine.high %v3981_v33, %v3985_v14  ;;  %v3575_v14 = vld [vmem:[#allocation7 + $0x150] sm:$0xff] }
 0x2da   :  { %6403 = vmatmul.mubr.bf16.vlgmr.msra.gmra.mrb[8].mxu0 %v8337_v18  ;;  %6567 = vmatmul.mubr.bf16.vlgmr.msra.gmra.mrb[8].mxu1 %v8337_v18  ;;  %v6265_v49 = vand.u32 %v7921_v58, %v8271_v3  ;;  %v3588_v58 = vld [vmem:[#allocation7 + $0x1b8] sm:$0xff] }
 0x2db   :  { %6412 = vmatpush1.bf16.msra.mxu0 %v7857_v38  ;;  %6576 = vmatpush1.bf16.msra.mxu1 %v7859_v17  ;;  %v3986_v38 = vld [vmem:[#allocation7 + $0xe28] sm:$0xff]  ;;  %v7905_v17 = vcombine.low %v3965_v62, %v3969_v0  ;;  %v3560_v62 = vld [vmem:[#allocation7 + $0xd8] sm:$0xff] }
 0x2dc   :  { %7929 = vmatprep.mubr.msk.bf16.mxu0 %vm2837_vm0, %v8341_v29  ;;  %7930 = vmatprep.mubr.msk.bf16.mxu1 %vm2837_vm0, %v8341_v29  ;;  %v7923_v47 = vcombine.low %v3982_v16, %v3986_v38  ;;  %v3564_v0 = vld [vmem:[#allocation7 + $0xf8] sm:$0xff] }
 0x2dd   :  { %6413 = vmatprep.subr.bf16.mxu0 %v7866_v25  ;;  %6577 = vmatprep.subr.bf16.mxu1 %v7868_v26  ;;  %v7924_v25 = vcombine.high %v3982_v16, %v3986_v38  ;;  %v7913_v26 = vcombine.low %v3973_v7, %v3977_v28  ;;  %v3567_v7 = vld [vmem:[#allocation7 + $0x110] sm:$0xff]  ;;  %v7503_v11 = vcombine.low %v3560_v62, %v3564_v0  ;;  %v3576_v38 = vld [vmem:[#allocation7 + $0x158] sm:$0xff] }
 0x2de   :  { %v6271_v5 = vand.u32 %v7923_v47, %v8271_v3  ;;  %v3571_v28 = vld [vmem:[#allocation7 + $0x130] sm:$0xff] }
 0x2df   :  { %6414 = vmatpush1.bf16.msra.mxu0 %v7865_v30  ;;  %6578 = vmatpush1.bf16.msra.mxu1 %v7867_v31  ;;  %v6268_v30 = vand.u32 %v7922_v22, %v8271_v3  ;;  %v6274_v31 = vand.u32 %v7924_v25, %v8271_v3  ;;  %v7510_v12 = vcombine.high %v3567_v7, %v3571_v28  ;;  %v3579_v16 = vld [vmem:[#allocation7 + $0x170] sm:$0xff] }
 0x2e0   :  { %6415 = vmatprep.subr.bf16.mxu0 %v7874_v32  ;;  %6579 = vmatprep.subr.bf16.mxu1 %v7876_v34  ;;  %v3535_v32 = vld [vmem:[#allocation7 + $0x10] sm:$0xff]  ;;  %v7517_v47 = vcombine.low %v3575_v14, %v3579_v16 }
 0x2e1   :  { %v3539_v34 = vld [vmem:[#allocation7 + $0x30] sm:$0xff] }
 0x2e2   :  { %v7477_v44 = vcombine.low %v3535_v32, %v3539_v34  ;;  %v3583_v25 = vld [vmem:[#allocation7 + $0x190] sm:$0xff] }
 0x2e3   :  { %6416 = vmatpush1.bf16.msra.mxu0 %v7873_v37  ;;  %6580 = vmatpush1.bf16.msra.mxu1 %v7875_v39  ;;  %v7478_v37 = vcombine.high %v3535_v32, %v3539_v34  ;;  %v7480_v39 = vcombine.high %v3536_v35, %v3540_v63  ;;  %v3591_v34 = vld [vmem:[#allocation7 + $0x1d0] sm:$0xff] }
 0x2e4   :  { %6417 = vmatprep.subr.bf16.mxu0 %v7882_v40  ;;  %6581 = vmatprep.subr.bf16.mxu1 %v7884_v41  ;;  %v3543_v40 = vld [vmem:[#allocation7 + $0x50] sm:$0xff] }
 0x2e5   :  { %v3547_v41 = vld [vmem:[#allocation7 + $0x70] sm:$0xff] }
 0x2e6   :  { %v7485_v55 = vcombine.low %v3543_v40, %v3547_v41 }
 0x2e7   :  { %6418 = vmatpush1.bf16.msra.mxu0 %v7881_v48  ;;  %6582 = vmatpush1.bf16.msra.mxu1 %v7883_v15  ;;  %v7479_v48 = vcombine.low %v3536_v35, %v3540_v63  ;;  %v7486_v15 = vcombine.high %v3543_v40, %v3547_v41  ;;  %v3595_v35 = vld [vmem:[#allocation7 + $0x1f0] sm:$0xff]  ;;  %v3592_v63 = vld [vmem:[#allocation7 + $0x1d8] sm:$0xff] }
 0x2e8   :  { %6419 = vmatprep.subr.bf16.mxu0 %v7890_v50  ;;  %6583 = vmatprep.subr.bf16.mxu1 %v7892_v23  ;;  %v7488_v50 = vcombine.high %v3544_v42, %v3548_v43  ;;  %v3551_v23 = vld [vmem:[#allocation7 + $0x90] sm:$0xff]  ;;  %v3600_v43 = vld [vmem:[#allocation7 + $0x218] sm:$0xff] }
 0x2e9   :  { %v7493_v1 = vcombine.low %v3551_v23, %v3555_v20  ;;  %v3599_v41 = vld [vmem:[#allocation7 + $0x210] sm:$0xff] }
 0x2ea   :  { %v3603_v42 = vld [vmem:[#allocation7 + $0x230] sm:$0xff] }
 0x2eb   :  { %6420 = vmatpush1.bf16.msra.mxu0 %v7889_v9  ;;  %6584 = vmatpush1.bf16.msra.mxu1 %v7891_v56  ;;  %v7494_v9 = vcombine.high %v3551_v23, %v3555_v20  ;;  %v7496_v56 = vcombine.high %v3552_v52, %v3556_v54  ;;  %v3607_v20 = vld [vmem:[#allocation7 + $0x250] sm:$0xff]  ;;  %v3608_v54 = vld [vmem:[#allocation7 + $0x258] sm:$0xff] }
 0x2ec   :  { %6421 = vmatprep.subr.bf16.mxu0 %v7898_v57  ;;  %6585 = vmatprep.subr.bf16.mxu1 %v7900_v2  ;;  %v3559_v57 = vld [vmem:[#allocation7 + $0xd0] sm:$0xff] }
 0x2ed   :  { %v3563_v2 = vld [vmem:[#allocation7 + $0xf0] sm:$0xff] }
 0x2ee   :  { %v3611_v52 = vld [vmem:[#allocation7 + $0x270] sm:$0xff] }
 0x2ef   :  { %6422 = vmatpush1.bf16.msra.mxu0 %v7897_v4  ;;  %6586 = vmatpush1.bf16.msra.mxu1 %v7899_v6  ;;  %v7502_v4 = vcombine.high %v3559_v57, %v3563_v2  ;;  %v7504_v6 = vcombine.high %v3560_v62, %v3564_v0  ;;  %v3619_v62 = vld [vmem:[#allocation7 + $0x2b0] sm:$0xff]  ;;  %v3616_v0 = vld [vmem:[#allocation7 + $0x298] sm:$0xff] }
 0x2f0   :  { %6423 = vmatprep.subr.bf16.mxu0 %v7906_v61  ;;  %6587 = vmatprep.subr.bf16.mxu1 %v7908_v10  ;;  %v3572_v61 = vld [vmem:[#allocation7 + $0x138] sm:$0xff]  ;;  %v7501_v10 = vcombine.low %v3559_v57, %v3563_v2  ;;  %v3615_v2 = vld [vmem:[#allocation7 + $0x290] sm:$0xff] }
 0x2f3   :  { %6424 = vmatpush1.bf16.msra.mxu0 %v7905_v17  ;;  %6588 = vmatpush1.bf16.msra.mxu1 %v7907_v59  ;;  %v3580_v17 = vld [vmem:[#allocation7 + $0x178] sm:$0xff]  ;;  %v7509_v59 = vcombine.low %v3567_v7, %v3571_v28  ;;  %v3623_v28 = vld [vmem:[#allocation7 + $0x2d0] sm:$0xff] }
 0x2f4   :  { %6425 = vmatprep.subr.bf16.mxu0 %v7914_v19  ;;  %6589 = vmatprep.subr.bf16.mxu1 %v7916_v21  ;;  %v7518_v21 = vcombine.high %v3575_v14, %v3579_v16  ;;  %v7520_v22 = vcombine.high %v3576_v38, %v3580_v17  ;;  %v3631_v16 = vld [vmem:[#allocation7 + $0x310] sm:$0xff] }
 0x2f7   :  { %6426 = vmatpush1.bf16.msra.mxu0 %v7913_v26  ;;  %6590 = vmatpush1.bf16.msra.mxu1 %v7915_v27  ;;  %v3587_v26 = vld [vmem:[#allocation7 + $0x1b0] sm:$0xff]  ;;  %v3584_v27 = vld [vmem:[#allocation7 + $0x198] sm:$0xff] }
 0x2f8   :  { %6427 = vmatprep.subr.bf16.mxu0 %v6268_v30  ;;  %6591 = vmatprep.subr.bf16.mxu1 %v6274_v31  ;;  %v7519_v30 = vcombine.low %v3576_v38, %v3580_v17  ;;  %v7526_v31 = vcombine.high %v3583_v25, %v3587_v26  ;;  %v7528_v32 = vcombine.high %v3584_v27, %v3588_v58  ;;  %v3635_v38 = vld [vmem:[#allocation7 + $0x330] sm:$0xff]  ;;  %v3632_v17 = vld [vmem:[#allocation7 + $0x318] sm:$0xff] }
 0x2fb   :  { %6428 = vmatpush1.bf16.msra.mxu0 %v6265_v49  ;;  %6592 = vmatpush1.bf16.msra.mxu1 %v6271_v5  ;;  %v3596_v49 = vld [vmem:[#allocation7 + $0x1f8] sm:$0xff]  ;;  %v7525_v5 = vcombine.low %v3583_v25, %v3587_v26  ;;  %v3639_v26 = vld [vmem:[#allocation7 + $0x350] sm:$0xff] }
 0x2fc   :  { %6616 = vmatprep.subr.bf16.mxu0 %v7478_v37  ;;  %6780 = vmatprep.subr.bf16.mxu1 %v7480_v39  ;;  %v7527_v37 = vcombine.low %v3584_v27, %v3588_v58  ;;  %v7534_v39 = vcombine.high %v3591_v34, %v3595_v35  ;;  %v7536_v40 = vcombine.high %v3592_v63, %v3596_v49  ;;  %v3643_v27 = vld [vmem:[#allocation7 + $0x370] sm:$0xff]  ;;  %v3640_v58 = vld [vmem:[#allocation7 + $0x358] sm:$0xff] }
 0x2fe   :  { %6444 = vmatmul.mubr.bf16.vlgmr.msra.gmra.mrb[8].mxu0 %v8355_v45  ;;  %6608 = vmatmul.mubr.bf16.vlgmr.msra.gmra.mrb[8].mxu1 %v8355_v45 }
 0x2ff   :  { %6617 = vmatpush1.bf16.msra.mxu0 %v7477_v44  ;;  %6648 = vmatprep.mubr.bf16.mxu0 %v8309_v36  ;;  %v3604_v44 = vld [vmem:[#allocation7 + $0x238] sm:$0xff] }
 0x300   :  { %6781 = vmatpush1.bf16.msra.mxu1 %v7479_v48  ;;  %6812 = vmatprep.mubr.bf16.mxu1 %v8309_v36  ;;  %v3568_v36 = vld [vmem:[#allocation7 + $0x118] sm:$0xff]  ;;  %v7533_v48 = vcombine.low %v3591_v34, %v3595_v35  ;;  %v7544_v23 = vcombine.high %v3600_v43, %v3604_v44  ;;  %v3647_v35 = vld [vmem:[#allocation7 + $0x390] sm:$0xff] }
 0x301   :  { %6618 = vmatprep.subr.bf16.mxu0 %v7486_v15  ;;  %6782 = vmatprep.subr.bf16.mxu1 %v7488_v50  ;;  %v7512_v33 = vcombine.high %v3568_v36, %v3572_v61  ;;  %v7511_v19 = vcombine.low %v3568_v36, %v3572_v61  ;;  %v7535_v15 = vcombine.low %v3592_v63, %v3596_v49  ;;  %v3627_v36 = vld [vmem:[#allocation7 + $0x2f0] sm:$0xff]  ;;  %v3624_v61 = vld [vmem:[#allocation7 + $0x2d8] sm:$0xff] }
 0x302   :  { %v7542_v50 = vcombine.high %v3599_v41, %v3603_v42  ;;  %v3651_v63 = vld [vmem:[#allocation7 + $0x3b0] sm:$0xff]  ;;  %v3648_v49 = vld [vmem:[#allocation7 + $0x398] sm:$0xff] }
 0x303   :  { %6619 = vmatpush1.bf16.msra.mxu0 %v7485_v55  ;;  %v3612_v55 = vld [vmem:[#allocation7 + $0x278] sm:$0xff] }
 0x304   :  { %6783 = vmatpush1.bf16.msra.mxu1 %v7487_v8  ;;  %6620 = vmatprep.subr.bf16.mxu0 %v7494_v9  ;;  %v7541_v8 = vcombine.low %v3599_v41, %v3603_v42  ;;  %v7543_v9 = vcombine.low %v3600_v43, %v3604_v44  ;;  %v7552_v57 = vcombine.high %v3608_v54, %v3612_v55  ;;  %v3655_v42 = vld [vmem:[#allocation7 + $0x3d0] sm:$0xff]  ;;  %v3656_v44 = vld [vmem:[#allocation7 + $0x3d8] sm:$0xff] }
 0x305   :  { %6784 = vmatprep.subr.bf16.mxu1 %v7496_v56  ;;  %v7550_v56 = vcombine.high %v3607_v20, %v3611_v52  ;;  %v3659_v43 = vld [vmem:[#allocation7 + $0x3f0] sm:$0xff] }
 0x307   :  { %6621 = vmatpush1.bf16.msra.mxu0 %v7493_v1  ;;  %v3620_v1 = vld [vmem:[#allocation7 + $0x2b8] sm:$0xff] }
 0x308   :  { %6785 = vmatpush1.bf16.msra.mxu1 %v7495_v24  ;;  %6622 = vmatprep.subr.bf16.mxu0 %v7502_v4  ;;  %v7549_v24 = vcombine.low %v3607_v20, %v3611_v52  ;;  %v7551_v4 = vcombine.low %v3608_v54, %v3612_v55  ;;  %v7560_v7 = vcombine.high %v3616_v0, %v3620_v1  ;;  %v3663_v52 = vld [vmem:[#allocation7 + $0x410] sm:$0xff]  ;;  %v3664_v55 = vld [vmem:[#allocation7 + $0x418] sm:$0xff] }
 0x309   :  { %6786 = vmatprep.subr.bf16.mxu1 %v7504_v6  ;;  %v7558_v6 = vcombine.high %v3615_v2, %v3619_v62  ;;  %v3667_v54 = vld [vmem:[#allocation7 + $0x430] sm:$0xff] }
 0x30b   :  { %6623 = vmatpush1.bf16.msra.mxu0 %v7501_v10  ;;  %v3628_v10 = vld [vmem:[#allocation7 + $0x2f8] sm:$0xff] }
 0x30c   :  { %6787 = vmatpush1.bf16.msra.mxu1 %v7503_v11  ;;  %6624 = vmatprep.subr.bf16.mxu0 %v7510_v12  ;;  %v7557_v11 = vcombine.low %v3615_v2, %v3619_v62  ;;  %v7559_v12 = vcombine.low %v3616_v0, %v3620_v1  ;;  %v7568_v14 = vcombine.high %v3624_v61, %v3628_v10  ;;  %v3671_v62 = vld [vmem:[#allocation7 + $0x450] sm:$0xff] }
 0x30d   :  { %6788 = vmatprep.subr.bf16.mxu1 %v7512_v33  ;;  %v7566_v33 = vcombine.high %v3623_v28, %v3627_v36  ;;  %v3675_v0 = vld [vmem:[#allocation7 + $0x470] sm:$0xff]  ;;  %v7605_v1 = vcombine.low %v3663_v52, %v3667_v54 }
 0x30f   :  { %6625 = vmatpush1.bf16.msra.mxu0 %v7509_v59  ;;  %v3636_v59 = vld [vmem:[#allocation7 + $0x338] sm:$0xff] }
 0x310   :  { %6789 = vmatpush1.bf16.msra.mxu1 %v7511_v19  ;;  %6626 = vmatprep.subr.bf16.mxu0 %v7518_v21  ;;  %v7565_v19 = vcombine.low %v3623_v28, %v3627_v36  ;;  %v7567_v21 = vcombine.low %v3624_v61, %v3628_v10  ;;  %v7576_v25 = vcombine.high %v3632_v17, %v3636_v59  ;;  %v3679_v28 = vld [vmem:[#allocation7 + $0x490] sm:$0xff]  ;;  %v3680_v10 = vld [vmem:[#allocation7 + $0x498] sm:$0xff] }
 0x311   :  { %6790 = vmatprep.subr.bf16.mxu1 %v7520_v22  ;;  %v7574_v22 = vcombine.high %v3631_v16, %v3635_v38  ;;  %v3683_v36 = vld [vmem:[#allocation7 + $0x4b0] sm:$0xff] }
 0x313   :  { %6627 = vmatpush1.bf16.msra.mxu0 %v7517_v47  ;;  %v3644_v47 = vld [vmem:[#allocation7 + $0x378] sm:$0xff] }
 0x314   :  { %6791 = vmatpush1.bf16.msra.mxu1 %v7519_v30  ;;  %6628 = vmatprep.subr.bf16.mxu0 %v7526_v31  ;;  %v7573_v30 = vcombine.low %v3631_v16, %v3635_v38  ;;  %v7575_v31 = vcombine.low %v3632_v17, %v3636_v59  ;;  %v7584_v34 = vcombine.high %v3640_v58, %v3644_v47  ;;  %v3687_v38 = vld [vmem:[#allocation7 + $0x4d0] sm:$0xff]  ;;  %v3688_v59 = vld [vmem:[#allocation7 + $0x4d8] sm:$0xff] }
 0x315   :  { %6792 = vmatprep.subr.bf16.mxu1 %v7528_v32  ;;  %v7582_v32 = vcombine.high %v3639_v26, %v3643_v27  ;;  %v3691_v17 = vld [vmem:[#allocation7 + $0x4f0] sm:$0xff] }
 0x317   :  { %6629 = vmatpush1.bf16.msra.mxu0 %v7525_v5  ;;  %v3652_v5 = vld [vmem:[#allocation7 + $0x3b8] sm:$0xff] }
 0x318   :  { %6793 = vmatpush1.bf16.msra.mxu1 %v7527_v37  ;;  %6630 = vmatprep.subr.bf16.mxu0 %v7534_v39  ;;  %v7581_v37 = vcombine.low %v3639_v26, %v3643_v27  ;;  %v7583_v39 = vcombine.low %v3640_v58, %v3644_v47  ;;  %v7592_v41 = vcombine.high %v3648_v49, %v3652_v5  ;;  %v3695_v26 = vld [vmem:[#allocation7 + $0x510] sm:$0xff]  ;;  %v3696_v58 = vld [vmem:[#allocation7 + $0x518] sm:$0xff] }
 0x319   :  { %6794 = vmatprep.subr.bf16.mxu1 %v7536_v40  ;;  %v7590_v40 = vcombine.high %v3647_v35, %v3651_v63  ;;  %v3699_v27 = vld [vmem:[#allocation7 + $0x530] sm:$0xff]  ;;  %v3700_v47 = vld [vmem:[#allocation7 + $0x538] sm:$0xff] }
 0x31b   :  { %6631 = vmatpush1.bf16.msra.mxu0 %v7533_v48  ;;  %v3660_v48 = vld [vmem:[#allocation7 + $0x3f8] sm:$0xff] }
 0x31c   :  { %6795 = vmatpush1.bf16.msra.mxu1 %v7535_v15  ;;  %6632 = vmatprep.subr.bf16.mxu0 %v7542_v50  ;;  %v7589_v15 = vcombine.low %v3647_v35, %v3651_v63  ;;  %v7591_v50 = vcombine.low %v3648_v49, %v3652_v5  ;;  %v7600_v20 = vcombine.high %v3656_v44, %v3660_v48  ;;  %v3707_v35 = vld [vmem:[#allocation7 + $0x570] sm:$0xff]  ;;  %v3704_v63 = vld [vmem:[#allocation7 + $0x558] sm:$0xff] }
 0x31d   :  { %6796 = vmatprep.subr.bf16.mxu1 %v7544_v23  ;;  %v7598_v23 = vcombine.high %v3655_v42, %v3659_v43  ;;  %v3708_v49 = vld [vmem:[#allocation7 + $0x578] sm:$0xff]  ;;  %v7637_v5 = vcombine.low %v3695_v26, %v3699_v27 }
 0x31f   :  { %6633 = vmatpush1.bf16.msra.mxu0 %v7541_v8  ;;  %v3668_v8 = vld [vmem:[#allocation7 + $0x438] sm:$0xff] }
 0x320   :  { %6797 = vmatpush1.bf16.msra.mxu1 %v7543_v9  ;;  %6634 = vmatprep.subr.bf16.mxu0 %v7550_v56  ;;  %v7597_v9 = vcombine.low %v3655_v42, %v3659_v43  ;;  %v7599_v56 = vcombine.low %v3656_v44, %v3660_v48  ;;  %v7608_v2 = vcombine.high %v3664_v55, %v3668_v8  ;;  %v3715_v42 = vld [vmem:[#allocation7 + $0x5b0] sm:$0xff]  ;;  %v3712_v43 = vld [vmem:[#allocation7 + $0x598] sm:$0xff] }
 0x321   :  { %6798 = vmatprep.subr.bf16.mxu1 %v7552_v57  ;;  %v7606_v57 = vcombine.high %v3663_v52, %v3667_v54  ;;  %v3716_v44 = vld [vmem:[#allocation7 + $0x5b8] sm:$0xff]  ;;  %v3723_v52 = vld [vmem:[#allocation7 + $0x5f0] sm:$0xff] }
 0x322   :  { %v3720_v54 = vld [vmem:[#allocation7 + $0x5d8] sm:$0xff] }
 0x323   :  { %6635 = vmatpush1.bf16.msra.mxu0 %v7549_v24  ;;  %v3672_v24 = vld [vmem:[#allocation7 + $0x458] sm:$0xff] }
 0x324   :  { %6799 = vmatpush1.bf16.msra.mxu1 %v7551_v4  ;;  %6636 = vmatprep.subr.bf16.mxu0 %v7558_v6  ;;  %v3676_v4 = vld [vmem:[#allocation7 + $0x478] sm:$0xff]  ;;  %v7607_v6 = vcombine.low %v3664_v55, %v3668_v8 }
 0x325   :  { %6800 = vmatprep.subr.bf16.mxu1 %v7560_v7  ;;  %v7614_v7 = vcombine.high %v3671_v62, %v3675_v0  ;;  %v7616_v61 = vcombine.high %v3672_v24, %v3676_v4  ;;  %v3724_v55 = vld [vmem:[#allocation7 + $0x5f8] sm:$0xff] }
 0x327   :  { %6637 = vmatpush1.bf16.msra.mxu0 %v7557_v11  ;;  %v3684_v11 = vld [vmem:[#allocation7 + $0x4b8] sm:$0xff] }
 0x328   :  { %6801 = vmatpush1.bf16.msra.mxu1 %v7559_v12  ;;  %6638 = vmatprep.subr.bf16.mxu0 %v7566_v33  ;;  %v7613_v12 = vcombine.low %v3671_v62, %v3675_v0  ;;  %v7615_v33 = vcombine.low %v3672_v24, %v3676_v4  ;;  %v7624_v16 = vcombine.high %v3680_v10, %v3684_v11  ;;  %v3731_v62 = vld [vmem:[#allocation7 + $0x630] sm:$0xff]  ;;  %v3728_v0 = vld [vmem:[#allocation7 + $0x618] sm:$0xff] }
 0x329   :  { %6802 = vmatprep.subr.bf16.mxu1 %v7568_v14  ;;  %v7622_v14 = vcombine.high %v3679_v28, %v3683_v36  ;;  %v7663_v4 = vcombine.low %v3720_v54, %v3724_v55 }
 0x32b   :  { %6639 = vmatpush1.bf16.msra.mxu0 %v7565_v19  ;;  %v3692_v19 = vld [vmem:[#allocation7 + $0x4f8] sm:$0xff] }
 0x32c   :  { %6803 = vmatpush1.bf16.msra.mxu1 %v7567_v21  ;;  %6640 = vmatprep.subr.bf16.mxu0 %v7574_v22  ;;  %v7621_v21 = vcombine.low %v3679_v28, %v3683_v36  ;;  %v7630_v22 = vcombine.high %v3687_v38, %v3691_v17  ;;  %v3735_v28 = vld [vmem:[#allocation7 + $0x650] sm:$0xff] }
 0x32d   :  { %6804 = vmatprep.subr.bf16.mxu1 %v7576_v25  ;;  %v7632_v25 = vcombine.high %v3688_v59, %v3692_v19  ;;  %v3739_v36 = vld [vmem:[#allocation7 + $0x670] sm:$0xff] }
 0x32f   :  { %6641 = vmatpush1.bf16.msra.mxu0 %v7573_v30  ;;  %v7631_v30 = vcombine.low %v3688_v59, %v3692_v19  ;;  %v3748_v59 = vld [vmem:[#allocation7 + $0x6b8] sm:$0xff]  ;;  %v7677_v19 = vcombine.low %v3735_v28, %v3739_v36 }
 0x330   :  { %6805 = vmatpush1.bf16.msra.mxu1 %v7575_v31  ;;  %6642 = vmatprep.subr.bf16.mxu0 %v7582_v32  ;;  %v7638_v31 = vcombine.high %v3695_v26, %v3699_v27  ;;  %v7640_v32 = vcombine.high %v3696_v58, %v3700_v47  ;;  %v3755_v26 = vld [vmem:[#allocation7 + $0x6f0] sm:$0xff]  ;;  %v3752_v27 = vld [vmem:[#allocation7 + $0x6d8] sm:$0xff] }
 0x331   :  { %6806 = vmatprep.subr.bf16.mxu1 %v7584_v34  ;;  %v3703_v34 = vld [vmem:[#allocation7 + $0x550] sm:$0xff] }
 0x332   :  { %v7645_v48 = vcombine.low %v3703_v34, %v3707_v35 }
 0x333   :  { %6643 = vmatpush1.bf16.msra.mxu0 %v7581_v37  ;;  %v7639_v37 = vcombine.low %v3696_v58, %v3700_v47  ;;  %v3756_v58 = vld [vmem:[#allocation7 + $0x6f8] sm:$0xff] }
 0x334   :  { %6807 = vmatpush1.bf16.msra.mxu1 %v7583_v39  ;;  %6644 = vmatprep.subr.bf16.mxu0 %v7590_v40  ;;  %v7646_v39 = vcombine.high %v3703_v34, %v3707_v35  ;;  %v7648_v40 = vcombine.high %v3704_v63, %v3708_v49  ;;  %v3763_v34 = vld [vmem:[#allocation7 + $0x730] sm:$0xff]  ;;  %v3760_v35 = vld [vmem:[#allocation7 + $0x718] sm:$0xff] }
 0x335   :  { %6808 = vmatprep.subr.bf16.mxu1 %v7592_v41  ;;  %v3711_v41 = vld [vmem:[#allocation7 + $0x590] sm:$0xff] }
 0x336   :  { %v7653_v8 = vcombine.low %v3711_v41, %v3715_v42 }
 0x337   :  { %6645 = vmatpush1.bf16.msra.mxu0 %v7589_v15  ;;  %v7647_v15 = vcombine.low %v3704_v63, %v3708_v49  ;;  %v3764_v63 = vld [vmem:[#allocation7 + $0x738] sm:$0xff] }
 0x338   :  { %6809 = vmatpush1.bf16.msra.mxu1 %v7591_v50  ;;  %6646 = vmatprep.subr.bf16.mxu0 %v7598_v23  ;;  %v7654_v50 = vcombine.high %v3711_v41, %v3715_v42  ;;  %v7656_v23 = vcombine.high %v3712_v43, %v3716_v44  ;;  %v3771_v41 = vld [vmem:[#allocation7 + $0x770] sm:$0xff]  ;;  %v3768_v42 = vld [vmem:[#allocation7 + $0x758] sm:$0xff] }
 0x339   :  { %6810 = vmatprep.subr.bf16.mxu1 %v7600_v20  ;;  %v3719_v20 = vld [vmem:[#allocation7 + $0x5d0] sm:$0xff] }
 0x33a   :  { %v7661_v24 = vcombine.low %v3719_v20, %v3723_v52 }
 0x33b   :  { %6647 = vmatpush1.bf16.msra.mxu0 %v7597_v9  ;;  %v7655_v9 = vcombine.low %v3712_v43, %v3716_v44  ;;  %v3772_v43 = vld [vmem:[#allocation7 + $0x778] sm:$0xff] }
 0x33c   :  { %6811 = vmatpush1.bf16.msra.mxu1 %v7599_v56  ;;  %6657 = vmatprep.subr.bf16.mxu0 %v7606_v57  ;;  %v7662_v56 = vcombine.high %v3719_v20, %v3723_v52  ;;  %v7664_v57 = vcombine.high %v3720_v54, %v3724_v55  ;;  %v3779_v20 = vld [vmem:[#allocation7 + $0x7b0] sm:$0xff]  ;;  %v3776_v52 = vld [vmem:[#allocation7 + $0x798] sm:$0xff] }
 0x33d   :  { %6821 = vmatprep.subr.bf16.mxu1 %v7608_v2  ;;  %v3727_v2 = vld [vmem:[#allocation7 + $0x610] sm:$0xff]  ;;  %v3780_v54 = vld [vmem:[#allocation7 + $0x7b8] sm:$0xff] }
 0x33e   :  { %6649 = vmatmul.mubr.bf16.vlgmr.msra.gmra.mrb[12].mxu0 %v8317_v46 }
 0x33f   :  { %6813 = vmatmul.mubr.bf16.vlgmr.msra.gmra.mrb[12].mxu1 %v8317_v46  ;;  %6658 = vmatpush1.bf16.msra.mxu0 %v7605_v1  ;;  %v7623_v46 = vcombine.low %v3680_v10, %v3684_v11  ;;  %v3732_v1 = vld [vmem:[#allocation7 + $0x638] sm:$0xff]  ;;  %v7669_v11 = vcombine.low %v3727_v2, %v3731_v62 }
 0x340   :  { %6689 = vmatprep.mubr.bf16.mxu0 %v8321_v51  ;;  %6822 = vmatpush1.bf16.msra.mxu1 %v7607_v6  ;;  %v7670_v6 = vcombine.high %v3727_v2, %v3731_v62  ;;  %v3740_v10 = vld [vmem:[#allocation7 + $0x678] sm:$0xff]  ;;  %v3787_v2 = vld [vmem:[#allocation7 + $0x7f0] sm:$0xff] }
 0x341   :  { %6853 = vmatprep.mubr.bf16.mxu1 %v8321_v51  ;;  %6659 = vmatprep.subr.bf16.mxu0 %v7614_v7  ;;  %v7629_v51 = vcombine.low %v3687_v38, %v3691_v17  ;;  %v7672_v7 = vcombine.high %v3728_v0, %v3732_v1  ;;  %v3747_v38 = vld [vmem:[#allocation7 + $0x6b0] sm:$0xff]  ;;  %v3744_v17 = vld [vmem:[#allocation7 + $0x698] sm:$0xff] }
 0x342   :  { %6823 = vmatprep.subr.bf16.mxu1 %v7616_v61  ;;  %v3736_v61 = vld [vmem:[#allocation7 + $0x658] sm:$0xff] }
 0x343   :  { %6660 = vmatpush1.bf16.msra.mxu0 %v7613_v12  ;;  %v7671_v12 = vcombine.low %v3728_v0, %v3732_v1  ;;  %v3784_v62 = vld [vmem:[#allocation7 + $0x7d8] sm:$0xff] }
 0x344   :  { %6824 = vmatpush1.bf16.msra.mxu1 %v7615_v33  ;;  %6661 = vmatprep.subr.bf16.mxu0 %v7622_v14  ;;  %v7678_v33 = vcombine.high %v3735_v28, %v3739_v36  ;;  %v7680_v14 = vcombine.high %v3736_v61, %v3740_v10  ;;  %v3788_v0 = vld [vmem:[#allocation7 + $0x7f8] sm:$0xff]  ;;  %v3795_v28 = vld [vmem:[#allocation7 + $0x830] sm:$0xff] }
 0x345   :  { %6825 = vmatprep.subr.bf16.mxu1 %v7624_v16  ;;  %v3743_v16 = vld [vmem:[#allocation7 + $0x690] sm:$0xff]  ;;  %v3792_v36 = vld [vmem:[#allocation7 + $0x818] sm:$0xff] }
 0x346   :  { %v7685_v47 = vcombine.low %v3743_v16, %v3747_v38 }
 0x347   :  { %6662 = vmatpush1.bf16.msra.mxu0 %v7621_v21  ;;  %v7679_v21 = vcombine.low %v3736_v61, %v3740_v10  ;;  %v3796_v61 = vld [vmem:[#allocation7 + $0x838] sm:$0xff] }
 0x348   :  { %6826 = vmatpush1.bf16.msra.mxu1 %v7623_v46  ;;  %6663 = vmatprep.subr.bf16.mxu0 %v7630_v22  ;;  %v7686_v46 = vcombine.high %v3743_v16, %v3747_v38  ;;  %v7688_v22 = vcombine.high %v3744_v17, %v3748_v59  ;;  %v3803_v16 = vld [vmem:[#allocation7 + $0x870] sm:$0xff] }
 0x349   :  { %6827 = vmatprep.subr.bf16.mxu1 %v7632_v25  ;;  %v3751_v25 = vld [vmem:[#allocation7 + $0x6d0] sm:$0xff] }
 0x34a   :  { %v7693_v49 = vcombine.low %v3751_v25, %v3755_v26 }
 0x34b   :  { %6664 = vmatpush1.bf16.msra.mxu0 %v7629_v51  ;;  %v7687_v51 = vcombine.low %v3744_v17, %v3748_v59  ;;  %v3800_v17 = vld [vmem:[#allocation7 + $0x858] sm:$0xff] }
 0x34c   :  { %6828 = vmatpush1.bf16.msra.mxu1 %v7631_v30  ;;  %6665 = vmatprep.subr.bf16.mxu0 %v7638_v31  ;;  %v7694_v30 = vcombine.high %v3751_v25, %v3755_v26  ;;  %v7696_v31 = vcombine.high %v3752_v27, %v3756_v58  ;;  %v3804_v59 = vld [vmem:[#allocation7 + $0x878] sm:$0xff] }
 0x34d   :  { %6829 = vmatprep.subr.bf16.mxu1 %v7640_v32  ;;  %v3759_v32 = vld [vmem:[#allocation7 + $0x710] sm:$0xff]  ;;  %v7744_v25 = vcombine.high %v3800_v17, %v3804_v59  ;;  %v3808_v26 = vld [vmem:[#allocation7 + $0x898] sm:$0xff] }
 0x34e   :  { %v7701_v44 = vcombine.low %v3759_v32, %v3763_v34 }
 0x34f   :  { %6666 = vmatpush1.bf16.msra.mxu0 %v7637_v5  ;;  %v7695_v5 = vcombine.low %v3752_v27, %v3756_v58  ;;  %v3812_v27 = vld [vmem:[#allocation7 + $0x8b8] sm:$0xff] }
 0x350   :  { %6830 = vmatpush1.bf16.msra.mxu1 %v7639_v37  ;;  %6667 = vmatprep.subr.bf16.mxu0 %v7646_v39  ;;  %v7702_v37 = vcombine.high %v3759_v32, %v3763_v34  ;;  %v7704_v39 = vcombine.high %v3760_v35, %v3764_v63  ;;  %v3819_v32 = vld [vmem:[#allocation7 + $0x8f0] sm:$0xff]  ;;  %v3816_v34 = vld [vmem:[#allocation7 + $0x8d8] sm:$0xff] }
 0x351   :  { %6831 = vmatprep.subr.bf16.mxu1 %v7648_v40  ;;  %v3767_v40 = vld [vmem:[#allocation7 + $0x750] sm:$0xff] }
 0x352   :  { %v7709_v55 = vcombine.low %v3767_v40, %v3771_v41 }
 0x353   :  { %6668 = vmatpush1.bf16.msra.mxu0 %v7645_v48  ;;  %v7703_v48 = vcombine.low %v3760_v35, %v3764_v63  ;;  %v3820_v35 = vld [vmem:[#allocation7 + $0x8f8] sm:$0xff] }
 0x354   :  { %6832 = vmatpush1.bf16.msra.mxu1 %v7647_v15  ;;  %6669 = vmatprep.subr.bf16.mxu0 %v7654_v50  ;;  %v7710_v15 = vcombine.high %v3767_v40, %v3771_v41  ;;  %v7712_v50 = vcombine.high %v3768_v42, %v3772_v43  ;;  %v3824_v40 = vld [vmem:[#allocation7 + $0x918] sm:$0xff] }
 0x355   :  { %6833 = vmatprep.subr.bf16.mxu1 %v7656_v23  ;;  %v3775_v23 = vld [vmem:[#allocation7 + $0x790] sm:$0xff]  ;;  %v3828_v41 = vld [vmem:[#allocation7 + $0x938] sm:$0xff] }
 0x356   :  { %v7717_v1 = vcombine.low %v3775_v23, %v3779_v20 }
 0x357   :  { %6670 = vmatpush1.bf16.msra.mxu0 %v7653_v8  ;;  %v7711_v8 = vcombine.low %v3768_v42, %v3772_v43  ;;  %v7759_v42 = vcombine.low %v3816_v34, %v3820_v35 }
 0x358   :  { %6834 = vmatpush1.bf16.msra.mxu1 %v7655_v9  ;;  %6671 = vmatprep.subr.bf16.mxu0 %v7662_v56  ;;  %v7718_v9 = vcombine.high %v3775_v23, %v3779_v20  ;;  %v7720_v56 = vcombine.high %v3776_v52, %v3780_v54  ;;  %v3836_v23 = vld [vmem:[#allocation7 + $0x978] sm:$0xff] }
 0x359   :  { %6835 = vmatprep.subr.bf16.mxu1 %v7664_v57  ;;  %v3783_v57 = vld [vmem:[#allocation7 + $0x7d0] sm:$0xff] }
 0x35a   :  { %v7725_v10 = vcombine.low %v3783_v57, %v3787_v2 }
 0x35b   :  { %6672 = vmatpush1.bf16.msra.mxu0 %v7661_v24  ;;  %v7719_v24 = vcombine.low %v3776_v52, %v3780_v54  ;;  %v7767_v52 = vcombine.low %v3824_v40, %v3828_v41 }
 0x35c   :  { %6836 = vmatpush1.bf16.msra.mxu1 %v7663_v4  ;;  %6673 = vmatprep.subr.bf16.mxu0 %v7670_v6  ;;  %v7726_v4 = vcombine.high %v3783_v57, %v3787_v2  ;;  %v7728_v6 = vcombine.high %v3784_v62, %v3788_v0  ;;  %v3844_v57 = vld [vmem:[#allocation7 + $0x9b8] sm:$0xff] }
 0x35d   :  { %6837 = vmatprep.subr.bf16.mxu1 %v7672_v7  ;;  %v3791_v7 = vld [vmem:[#allocation7 + $0x810] sm:$0xff] }
 0x35e   :  { %v7733_v38 = vcombine.low %v3791_v7, %v3795_v28 }
 0x35f   :  { %6674 = vmatpush1.bf16.msra.mxu0 %v7669_v11  ;;  %v7727_v11 = vcombine.low %v3784_v62, %v3788_v0 }
 0x360   :  { %6838 = vmatpush1.bf16.msra.mxu1 %v7671_v12  ;;  %6675 = vmatprep.subr.bf16.mxu0 %v7678_v33  ;;  %v7734_v12 = vcombine.high %v3791_v7, %v3795_v28  ;;  %v7736_v33 = vcombine.high %v3792_v36, %v3796_v61  ;;  %v3852_v7 = vld [vmem:[#allocation7 + $0x9f8] sm:$0xff] }
 0x361   :  { %6839 = vmatprep.subr.bf16.mxu1 %v7680_v14  ;;  %v3799_v14 = vld [vmem:[#allocation7 + $0x850] sm:$0xff] }
 0x362   :  { %v7741_v58 = vcombine.low %v3799_v14, %v3803_v16 }
 0x363   :  { %6676 = vmatpush1.bf16.msra.mxu0 %v7677_v19  ;;  %v7735_v19 = vcombine.low %v3792_v36, %v3796_v61 }
 0x364   :  { %6840 = vmatpush1.bf16.msra.mxu1 %v7679_v21  ;;  %6677 = vmatprep.subr.bf16.mxu0 %v7686_v46  ;;  %v7742_v21 = vcombine.high %v3799_v14, %v3803_v16  ;;  %v3807_v46 = vld [vmem:[#allocation7 + $0x890] sm:$0xff]  ;;  %v3860_v14 = vld [vmem:[#allocation7 + $0xa38] sm:$0xff] }
 0x365   :  { %6841 = vmatprep.subr.bf16.mxu1 %v7688_v22  ;;  %v3811_v22 = vld [vmem:[#allocation7 + $0x8b0] sm:$0xff] }
 0x366   :  { %v7749_v63 = vcombine.low %v3807_v46, %v3811_v22 }
 0x367   :  { %6678 = vmatpush1.bf16.msra.mxu0 %v7685_v47  ;;  %v7743_v47 = vcombine.low %v3800_v17, %v3804_v59 }
 0x368   :  { %6842 = vmatpush1.bf16.msra.mxu1 %v7687_v51  ;;  %6679 = vmatprep.subr.bf16.mxu0 %v7694_v30  ;;  %v7750_v51 = vcombine.high %v3807_v46, %v3811_v22  ;;  %v7752_v30 = vcombine.high %v3808_v26, %v3812_v27  ;;  %v3864_v46 = vld [vmem:[#allocation7 + $0xa58] sm:$0xff] }
 0x369   :  { %6843 = vmatprep.subr.bf16.mxu1 %v7696_v31  ;;  %v3815_v31 = vld [vmem:[#allocation7 + $0x8d0] sm:$0xff]  ;;  %v3868_v22 = vld [vmem:[#allocation7 + $0xa78] sm:$0xff] }
 0x36b   :  { %6680 = vmatpush1.bf16.msra.mxu0 %v7693_v49  ;;  %v7758_v49 = vcombine.high %v3815_v31, %v3819_v32 }
 0x36c   :  { %6844 = vmatpush1.bf16.msra.mxu1 %v7695_v5  ;;  %6681 = vmatprep.subr.bf16.mxu0 %v7702_v37  ;;  %v7760_v5 = vcombine.high %v3816_v34, %v3820_v35  ;;  %v3823_v37 = vld [vmem:[#allocation7 + $0x910] sm:$0xff]  ;;  %v7807_v34 = vcombine.low %v3864_v46, %v3868_v22 }
 0x36d   :  { %6845 = vmatprep.subr.bf16.mxu1 %v7704_v39  ;;  %v3827_v39 = vld [vmem:[#allocation7 + $0x930] sm:$0xff] }
 0x36e   :  { %v7766_v43 = vcombine.high %v3823_v37, %v3827_v39  ;;  %v7765_v20 = vcombine.low %v3823_v37, %v3827_v39  ;;  %v3884_v37 = vld [vmem:[#allocation7 + $0xaf8] sm:$0xff] }
 0x36f   :  { %6682 = vmatpush1.bf16.msra.mxu0 %v7701_v44  ;;  %v7768_v44 = vcombine.high %v3824_v40, %v3828_v41 }
 0x370   :  { %6846 = vmatpush1.bf16.msra.mxu1 %v7703_v48  ;;  %6683 = vmatprep.subr.bf16.mxu0 %v7710_v15  ;;  %v3831_v48 = vld [vmem:[#allocation7 + $0x950] sm:$0xff] }
 0x371   :  { %6847 = vmatprep.subr.bf16.mxu1 %v7712_v50  ;;  %v3835_v15 = vld [vmem:[#allocation7 + $0x970] sm:$0xff]  ;;  %v3832_v50 = vld [vmem:[#allocation7 + $0x958] sm:$0xff] }
 0x372   :  { %v7774_v54 = vcombine.high %v3831_v48, %v3835_v15  ;;  %v7773_v2 = vcombine.low %v3831_v48, %v3835_v15  ;;  %v7775_v62 = vcombine.low %v3832_v50, %v3836_v23  ;;  %v3892_v48 = vld [vmem:[#allocation7 + $0xb38] sm:$0xff] }
 0x373   :  { %6684 = vmatpush1.bf16.msra.mxu0 %v7709_v55  ;;  %v7776_v55 = vcombine.high %v3832_v50, %v3836_v23 }
 0x374   :  { %6848 = vmatpush1.bf16.msra.mxu1 %v7711_v8  ;;  %6685 = vmatprep.subr.bf16.mxu0 %v7718_v9  ;;  %v3839_v8 = vld [vmem:[#allocation7 + $0x990] sm:$0xff] }
 0x375   :  { %6849 = vmatprep.subr.bf16.mxu1 %v7720_v56  ;;  %v3843_v9 = vld [vmem:[#allocation7 + $0x9b0] sm:$0xff]  ;;  %v3840_v56 = vld [vmem:[#allocation7 + $0x998] sm:$0xff] }
 0x376   :  { %v7782_v0 = vcombine.high %v3839_v8, %v3843_v9  ;;  %v7781_v28 = vcombine.low %v3839_v8, %v3843_v9  ;;  %v7783_v36 = vcombine.low %v3840_v56, %v3844_v57  ;;  %v3900_v8 = vld [vmem:[#allocation7 + $0xb78] sm:$0xff] }
 0x377   :  { %6686 = vmatpush1.bf16.msra.mxu0 %v7717_v1  ;;  %v7784_v1 = vcombine.high %v3840_v56, %v3844_v57 }
 0x378   :  { %6850 = vmatpush1.bf16.msra.mxu1 %v7719_v24  ;;  %6687 = vmatprep.subr.bf16.mxu0 %v7726_v4  ;;  %v3847_v24 = vld [vmem:[#allocation7 + $0x9d0] sm:$0xff] }
 0x379   :  { %6851 = vmatprep.subr.bf16.mxu1 %v7728_v6  ;;  %v3851_v4 = vld [vmem:[#allocation7 + $0x9f0] sm:$0xff]  ;;  %v3848_v6 = vld [vmem:[#allocation7 + $0x9d8] sm:$0xff] }
 0x37a   :  { %v7790_v61 = vcombine.high %v3847_v24, %v3851_v4  ;;  %v7789_v16 = vcombine.low %v3847_v24, %v3851_v4  ;;  %v3908_v24 = vld [vmem:[#allocation7 + $0xbb8] sm:$0xff] }
 0x37b   :  { %6688 = vmatpush1.bf16.msra.mxu0 %v7725_v10  ;;  %v7792_v10 = vcombine.high %v3848_v6, %v3852_v7 }
 0x37c   :  { %6852 = vmatpush1.bf16.msra.mxu1 %v7727_v11  ;;  %6698 = vmatprep.subr.bf16.mxu0 %v7734_v12  ;;  %v3855_v11 = vld [vmem:[#allocation7 + $0xa10] sm:$0xff] }
 0x37d   :  { %6862 = vmatprep.subr.bf16.mxu1 %v7736_v33  ;;  %v3859_v12 = vld [vmem:[#allocation7 + $0xa30] sm:$0xff]  ;;  %v3856_v33 = vld [vmem:[#allocation7 + $0xa18] sm:$0xff] }
 0x37e   :  { %6690 = vmatmul.mubr.bf16.vlgmr.msra.gmra.mrb[12].mxu0 %v8329_v60  ;;  %v7798_v17 = vcombine.high %v3855_v11, %v3859_v12  ;;  %v7800_v59 = vcombine.high %v3856_v33, %v3860_v14 }
 0x37f   :  { %6854 = vmatmul.mubr.bf16.vlgmr.msra.gmra.mrb[12].mxu1 %v8329_v60  ;;  %6699 = vmatpush1.bf16.msra.mxu0 %v7733_v38  ;;  %v7751_v60 = vcombine.low %v3808_v26, %v3812_v27  ;;  %v7791_v38 = vcombine.low %v3848_v6, %v3852_v7  ;;  %v7799_v26 = vcombine.low %v3856_v33, %v3860_v14 }
 0x380   :  { %6730 = vmatprep.mubr.bf16.mxu0 %v8335_v13  ;;  %6863 = vmatpush1.bf16.msra.mxu1 %v7735_v19  ;;  %v3863_v19 = vld [vmem:[#allocation7 + $0xa50] sm:$0xff] }
 0x381   :  { %6894 = vmatprep.mubr.bf16.mxu1 %v8335_v13  ;;  %6700 = vmatprep.subr.bf16.mxu0 %v7742_v21  ;;  %v7757_v13 = vcombine.low %v3815_v31, %v3819_v32  ;;  %v3867_v21 = vld [vmem:[#allocation7 + $0xa70] sm:$0xff]  ;;  %v3876_v31 = vld [vmem:[#allocation7 + $0xab8] sm:$0xff] }
 0x382   :  { %6864 = vmatprep.subr.bf16.mxu1 %v7744_v25  ;;  %v7797_v25 = vcombine.low %v3855_v11, %v3859_v12  ;;  %v7806_v27 = vcombine.high %v3863_v19, %v3867_v21  ;;  %v7805_v32 = vcombine.low %v3863_v19, %v3867_v21  ;;  %v3916_v11 = vld [vmem:[#allocation7 + $0xbf8] sm:$0xff] }
 0x383   :  { %6701 = vmatpush1.bf16.msra.mxu0 %v7741_v58  ;;  %v7808_v58 = vcombine.high %v3864_v46, %v3868_v22  ;;  %v3924_v19 = vld [vmem:[#allocation7 + $0xc38] sm:$0xff] }
 0x384   :  { %6865 = vmatpush1.bf16.msra.mxu1 %v7743_v47  ;;  %6702 = vmatprep.subr.bf16.mxu0 %v7750_v51  ;;  %v3871_v47 = vld [vmem:[#allocation7 + $0xa90] sm:$0xff] }
 0x385   :  { %6866 = vmatprep.subr.bf16.mxu1 %v7752_v30  ;;  %v3875_v51 = vld [vmem:[#allocation7 + $0xab0] sm:$0xff]  ;;  %v3872_v30 = vld [vmem:[#allocation7 + $0xa98] sm:$0xff] }
 0x386   :  { %v7814_v35 = vcombine.high %v3871_v47, %v3875_v51  ;;  %v7813_v39 = vcombine.low %v3871_v47, %v3875_v51  ;;  %v7815_v40 = vcombine.low %v3872_v30, %v3876_v31  ;;  %v3928_v47 = vld [vmem:[#allocation7 + $0xc58] sm:$0xff] }
 0x387   :  { %6703 = vmatpush1.bf16.msra.mxu0 %v7749_v63  ;;  %v7816_v63 = vcombine.high %v3872_v30, %v3876_v31  ;;  %v3932_v51 = vld [vmem:[#allocation7 + $0xc78] sm:$0xff] }
 0x388   :  { %6867 = vmatpush1.bf16.msra.mxu1 %v7751_v60  ;;  %6704 = vmatprep.subr.bf16.mxu0 %v7758_v49  ;;  %v3879_v60 = vld [vmem:[#allocation7 + $0xad0] sm:$0xff] }
 0x389   :  { %6868 = vmatprep.subr.bf16.mxu1 %v7760_v5  ;;  %v3883_v49 = vld [vmem:[#allocation7 + $0xaf0] sm:$0xff]  ;;  %v3880_v5 = vld [vmem:[#allocation7 + $0xad8] sm:$0xff] }
 0x38a   :  { %v7822_v41 = vcombine.high %v3879_v60, %v3883_v49  ;;  %v7821_v15 = vcombine.low %v3879_v60, %v3883_v49  ;;  %v7823_v50 = vcombine.low %v3880_v5, %v3884_v37  ;;  %v3940_v60 = vld [vmem:[#allocation7 + $0xcb8] sm:$0xff] }
 0x38b   :  { %6705 = vmatpush1.bf16.msra.mxu0 %v7757_v13  ;;  %v7824_v13 = vcombine.high %v3880_v5, %v3884_v37  ;;  %v7871_v5 = vcombine.low %v3928_v47, %v3932_v51 }
 0x38c   :  { %6869 = vmatpush1.bf16.msra.mxu1 %v7759_v42  ;;  %6706 = vmatprep.subr.bf16.mxu0 %v7766_v43  ;;  %v3887_v42 = vld [vmem:[#allocation7 + $0xb10] sm:$0xff] }
 0x38d   :  { %6870 = vmatprep.subr.bf16.mxu1 %v7768_v44  ;;  %v3891_v43 = vld [vmem:[#allocation7 + $0xb30] sm:$0xff]  ;;  %v3888_v44 = vld [vmem:[#allocation7 + $0xb18] sm:$0xff] }
 0x38e   :  { %v7830_v23 = vcombine.high %v3887_v42, %v3891_v43  ;;  %v7829_v9 = vcombine.low %v3887_v42, %v3891_v43  ;;  %v7831_v56 = vcombine.low %v3888_v44, %v3892_v48  ;;  %v3948_v42 = vld [vmem:[#allocation7 + $0xcf8] sm:$0xff] }
 0x38f   :  { %6707 = vmatpush1.bf16.msra.mxu0 %v7765_v20  ;;  %v7832_v20 = vcombine.high %v3888_v44, %v3892_v48 }
 0x390   :  { %6871 = vmatpush1.bf16.msra.mxu1 %v7767_v52  ;;  %6708 = vmatprep.subr.bf16.mxu0 %v7774_v54  ;;  %v3895_v52 = vld [vmem:[#allocation7 + $0xb50] sm:$0xff] }
 0x391   :  { %6872 = vmatprep.subr.bf16.mxu1 %v7776_v55  ;;  %v3899_v54 = vld [vmem:[#allocation7 + $0xb70] sm:$0xff]  ;;  %v3896_v55 = vld [vmem:[#allocation7 + $0xb58] sm:$0xff] }
 0x392   :  { %v7838_v57 = vcombine.high %v3895_v52, %v3899_v54  ;;  %v7837_v4 = vcombine.low %v3895_v52, %v3899_v54  ;;  %v7839_v6 = vcombine.low %v3896_v55, %v3900_v8 }
 0x393   :  { %6709 = vmatpush1.bf16.msra.mxu0 %v7773_v2  ;;  %v7840_v2 = vcombine.high %v3896_v55, %v3900_v8  ;;  %v3959_v8 = vld [vmem:[#allocation7 + $0xd50] sm:$0xff] }
 0x394   :  { %6873 = vmatpush1.bf16.msra.mxu1 %v7775_v62  ;;  %6710 = vmatprep.subr.bf16.mxu0 %v7782_v0  ;;  %v3903_v62 = vld [vmem:[#allocation7 + $0xb90] sm:$0xff] }
 0x395   :  { %6874 = vmatprep.subr.bf16.mxu1 %v7784_v1  ;;  %v3907_v0 = vld [vmem:[#allocation7 + $0xbb0] sm:$0xff]  ;;  %v3904_v1 = vld [vmem:[#allocation7 + $0xb98] sm:$0xff] }
 0x396   :  { %v7846_v7 = vcombine.high %v3903_v62, %v3907_v0  ;;  %v7845_v12 = vcombine.low %v3903_v62, %v3907_v0  ;;  %v7847_v33 = vcombine.low %v3904_v1, %v3908_v24 }
 0x397   :  { %6711 = vmatpush1.bf16.msra.mxu0 %v7781_v28  ;;  %v7848_v28 = vcombine.high %v3904_v1, %v3908_v24  ;;  %v3967_v24 = vld [vmem:[#allocation7 + $0xd90] sm:$0xff] }
 0x398   :  { %6875 = vmatpush1.bf16.msra.mxu1 %v7783_v36  ;;  %6712 = vmatprep.subr.bf16.mxu0 %v7790_v61  ;;  %v3911_v36 = vld [vmem:[#allocation7 + $0xbd0] sm:$0xff] }
 0x399   :  { %6876 = vmatprep.subr.bf16.mxu1 %v7792_v10  ;;  %v3915_v61 = vld [vmem:[#allocation7 + $0xbf0] sm:$0xff]  ;;  %v3912_v10 = vld [vmem:[#allocation7 + $0xbd8] sm:$0xff] }
 0x39a   :  { %v7854_v14 = vcombine.high %v3911_v36, %v3915_v61  ;;  %v7853_v21 = vcombine.low %v3911_v36, %v3915_v61  ;;  %v7855_v46 = vcombine.low %v3912_v10, %v3916_v11 }
 0x39b   :  { %6713 = vmatpush1.bf16.msra.mxu0 %v7789_v16  ;;  %v7856_v16 = vcombine.high %v3912_v10, %v3916_v11  ;;  %v3975_v10 = vld [vmem:[#allocation7 + $0xdd0] sm:$0xff] }
 0x39c   :  { %6877 = vmatpush1.bf16.msra.mxu1 %v7791_v38  ;;  %6714 = vmatprep.subr.bf16.mxu0 %v7798_v17  ;;  %v3919_v38 = vld [vmem:[#allocation7 + $0xc10] sm:$0xff] }
 0x39d   :  { %6878 = vmatprep.subr.bf16.mxu1 %v7800_v59  ;;  %v3923_v17 = vld [vmem:[#allocation7 + $0xc30] sm:$0xff]  ;;  %v3920_v59 = vld [vmem:[#allocation7 + $0xc18] sm:$0xff] }
 0x39e   :  { %v7862_v22 = vcombine.high %v3919_v38, %v3923_v17  ;;  %v7863_v30 = vcombine.low %v3920_v59, %v3924_v19  ;;  %v3979_v11 = vld [vmem:[#allocation7 + $0xdf0] sm:$0xff] }
 0x39f   :  { %6715 = vmatpush1.bf16.msra.mxu0 %v7797_v25  ;;  %v7864_v25 = vcombine.high %v3920_v59, %v3924_v19 }
 0x3a0   :  { %6879 = vmatpush1.bf16.msra.mxu1 %v7799_v26  ;;  %6716 = vmatprep.subr.bf16.mxu0 %v7806_v27  ;;  %v3927_v26 = vld [vmem:[#allocation7 + $0xc50] sm:$0xff] }
 0x3a1   :  { %6880 = vmatprep.subr.bf16.mxu1 %v7808_v58  ;;  %v3931_v27 = vld [vmem:[#allocation7 + $0xc70] sm:$0xff]  ;;  %v7861_v58 = vcombine.low %v3919_v38, %v3923_v17 }
 0x3a2   :  { %v7870_v31 = vcombine.high %v3927_v26, %v3931_v27  ;;  %v7869_v49 = vcombine.low %v3927_v26, %v3931_v27  ;;  %v3983_v38 = vld [vmem:[#allocation7 + $0xe10] sm:$0xff] }
 0x3a3   :  { %6717 = vmatpush1.bf16.msra.mxu0 %v7805_v32  ;;  %v3935_v32 = vld [vmem:[#allocation7 + $0xc90] sm:$0xff] }
 0x3a4   :  { %6881 = vmatpush1.bf16.msra.mxu1 %v7807_v34  ;;  %6718 = vmatprep.subr.bf16.mxu0 %v7814_v35  ;;  %v3939_v34 = vld [vmem:[#allocation7 + $0xcb0] sm:$0xff]  ;;  %v7872_v35 = vcombine.high %v3928_v47, %v3932_v51 }
 0x3a5   :  { %6882 = vmatprep.subr.bf16.mxu1 %v7816_v63  ;;  %v3936_v63 = vld [vmem:[#allocation7 + $0xc98] sm:$0xff]  ;;  %v7878_v37 = vcombine.high %v3935_v32, %v3939_v34  ;;  %v3987_v17 = vld [vmem:[#allocation7 + $0xe30] sm:$0xff] }
 0x3a6   :  { %v7879_v43 = vcombine.low %v3936_v63, %v3940_v60 }
 0x3a7   :  { %6719 = vmatpush1.bf16.msra.mxu0 %v7813_v39  ;;  %v7880_v39 = vcombine.high %v3936_v63, %v3940_v60 }
 0x3a8   :  { %6883 = vmatpush1.bf16.msra.mxu1 %v7815_v40  ;;  %6720 = vmatprep.subr.bf16.mxu0 %v7822_v41  ;;  %v3943_v40 = vld [vmem:[#allocation7 + $0xcd0] sm:$0xff] }
 0x3a9   :  { %6884 = vmatprep.subr.bf16.mxu1 %v7824_v13  ;;  %v3947_v41 = vld [vmem:[#allocation7 + $0xcf0] sm:$0xff]  ;;  %v3944_v13 = vld [vmem:[#allocation7 + $0xcd8] sm:$0xff] }
 0x3aa   :  { %v7886_v44 = vcombine.high %v3943_v40, %v3947_v41  ;;  %v7888_v48 = vcombine.high %v3944_v13, %v3948_v42  ;;  %v7887_v52 = vcombine.low %v3944_v13, %v3948_v42 }
 0x3ab   :  { %6721 = vmatpush1.bf16.msra.mxu0 %v7821_v15  ;;  %v3951_v15 = vld [vmem:[#allocation7 + $0xd10] sm:$0xff] }
 0x3ac   :  { %6885 = vmatpush1.bf16.msra.mxu1 %v7823_v50  ;;  %6722 = vmatprep.subr.bf16.mxu0 %v7830_v23  ;;  %v3955_v50 = vld [vmem:[#allocation7 + $0xd30] sm:$0xff]  ;;  %v3952_v23 = vld [vmem:[#allocation7 + $0xd18] sm:$0xff] }
 0x3ad   :  { %6886 = vmatprep.subr.bf16.mxu1 %v7832_v20  ;;  %v3956_v20 = vld [vmem:[#allocation7 + $0xd38] sm:$0xff]  ;;  %v7894_v54 = vcombine.high %v3951_v15, %v3955_v50 }
 0x3ae   :  { %v7896_v55 = vcombine.high %v3952_v23, %v3956_v20  ;;  %v7895_v62 = vcombine.low %v3952_v23, %v3956_v20 }
 0x3af   :  { %6723 = vmatpush1.bf16.msra.mxu0 %v7829_v9  ;;  %v3963_v9 = vld [vmem:[#allocation7 + $0xd70] sm:$0xff] }
 0x3b0   :  { %6887 = vmatpush1.bf16.msra.mxu1 %v7831_v56  ;;  %6724 = vmatprep.subr.bf16.mxu0 %v7838_v57  ;;  %v3960_v56 = vld [vmem:[#allocation7 + $0xd58] sm:$0xff]  ;;  %v7902_v0 = vcombine.high %v3959_v8, %v3963_v9 }
 0x3b1   :  { %6888 = vmatprep.subr.bf16.mxu1 %v7840_v2  ;;  %v3964_v57 = vld [vmem:[#allocation7 + $0xd78] sm:$0xff]  ;;  %v7893_v2 = vcombine.low %v3951_v15, %v3955_v50 }
 0x3b2   :  { %v7904_v1 = vcombine.high %v3960_v56, %v3964_v57  ;;  %v7903_v36 = vcombine.low %v3960_v56, %v3964_v57 }
 0x3b3   :  { %6725 = vmatpush1.bf16.msra.mxu0 %v7837_v4  ;;  %v3971_v4 = vld [vmem:[#allocation7 + $0xdb0] sm:$0xff] }
 0x3b4   :  { %6889 = vmatpush1.bf16.msra.mxu1 %v7839_v6  ;;  %6726 = vmatprep.subr.bf16.mxu0 %v7846_v7  ;;  %v3968_v6 = vld [vmem:[#allocation7 + $0xd98] sm:$0xff]  ;;  %v7910_v61 = vcombine.high %v3967_v24, %v3971_v4  ;;  %v7909_v47 = vcombine.low %v3967_v24, %v3971_v4 }
 0x3b5   :  { %6890 = vmatprep.subr.bf16.mxu1 %v7848_v28  ;;  %v3972_v7 = vld [vmem:[#allocation7 + $0xdb8] sm:$0xff]  ;;  %v7901_v28 = vcombine.low %v3959_v8, %v3963_v9 }
 0x3b7   :  { %6727 = vmatpush1.bf16.msra.mxu0 %v7845_v12 }
 0x3b8   :  { %6891 = vmatpush1.bf16.msra.mxu1 %v7847_v33  ;;  %6728 = vmatprep.subr.bf16.mxu0 %v7854_v14  ;;  %v7912_v14 = vcombine.high %v3968_v6, %v3972_v7 }
 0x3b9   :  { %6892 = vmatprep.subr.bf16.mxu1 %v7856_v16  ;;  %v3976_v16 = vld [vmem:[#allocation7 + $0xdd8] sm:$0xff] }
 0x3bb   :  { %6729 = vmatpush1.bf16.msra.mxu0 %v7853_v21  ;;  %v3980_v21 = vld [vmem:[#allocation7 + $0xdf8] sm:$0xff] }
 0x3bc   :  { %6893 = vmatpush1.bf16.msra.mxu1 %v7855_v46  ;;  %6739 = vmatprep.subr.bf16.mxu0 %v7862_v22  ;;  %v3984_v46 = vld [vmem:[#allocation7 + $0xe18] sm:$0xff]  ;;  %v7920_v60 = vcombine.high %v3976_v16, %v3980_v21 }
 0x3bd   :  { %6903 = vmatprep.subr.bf16.mxu1 %v7864_v25  ;;  %v3988_v22 = vld [vmem:[#allocation7 + $0xe38] sm:$0xff] }
 0x3be   :  { %6731 = vmatmul.mubr.bf16.vlgmr.msra.gmra.mrb[12].mxu0 %v8337_v18  ;;  %v7927_v13 = vcombine.low %v3984_v46, %v3988_v22 }
 0x3bf   :  { %6895 = vmatmul.mubr.bf16.vlgmr.msra.gmra.mrb[12].mxu1 %v8337_v18  ;;  %6740 = vmatpush1.bf16.msra.mxu0 %v7861_v58  ;;  %v7877_v18 = vcombine.low %v3935_v32, %v3939_v34  ;;  %v7918_v32 = vcombine.high %v3975_v10, %v3979_v11  ;;  %v7926_v34 = vcombine.high %v3983_v38, %v3987_v17 }
 0x3c0   :  { %7931 = vmatprep.mubr.msk.bf16.mxu0 %vm2837_vm0, %v8341_v29  ;;  %6904 = vmatpush1.bf16.msra.mxu1 %v7863_v30 }
 0x3c1   :  { %7932 = vmatprep.mubr.msk.bf16.mxu1 %vm2837_vm0, %v8341_v29  ;;  %6741 = vmatprep.subr.bf16.mxu0 %v7870_v31  ;;  %v7885_v29 = vcombine.low %v3943_v40, %v3947_v41  ;;  %v7911_v31 = vcombine.low %v3968_v6, %v3972_v7  ;;  %v7919_v40 = vcombine.low %v3976_v16, %v3980_v21 }
 0x3c2   :  { %6905 = vmatprep.subr.bf16.mxu1 %v7872_v35  ;;  %v6280_v41 = vand.u32 %v7926_v34, %v8271_v3 }
 0x3c3   :  { %6742 = vmatpush1.bf16.msra.mxu0 %v7869_v49  ;;  %v7928_v49 = vcombine.high %v3984_v46, %v3988_v22 }
 0x3c4   :  { %6906 = vmatpush1.bf16.msra.mxu1 %v7871_v5  ;;  %6743 = vmatprep.subr.bf16.mxu0 %v7878_v37  ;;  %v7917_v37 = vcombine.low %v3975_v10, %v3979_v11 }
 0x3c5   :  { %6907 = vmatprep.subr.bf16.mxu1 %v7880_v39  ;;  %v7925_v39 = vcombine.low %v3983_v38, %v3987_v17  ;;  %v6286_v42 = vand.u32 %v7928_v49, %v8271_v3 }
 0x3c7   :  { %6744 = vmatpush1.bf16.msra.mxu0 %v7877_v18  ;;  %v6277_v18 = vand.u32 %v7925_v39, %v8271_v3 }
 0x3c8   :  { %6908 = vmatpush1.bf16.msra.mxu1 %v7879_v43  ;;  %6745 = vmatprep.subr.bf16.mxu0 %v7886_v44  ;;  %v6283_v43 = vand.u32 %v7927_v13, %v8271_v3 }
 0x3c9   :  { %6909 = vmatprep.subr.bf16.mxu1 %v7888_v48 }
 0x3cb   :  { %6746 = vmatpush1.bf16.msra.mxu0 %v7885_v29 }
 0x3cc   :  { %6910 = vmatpush1.bf16.msra.mxu1 %v7887_v52  ;;  %6747 = vmatprep.subr.bf16.mxu0 %v7894_v54 }
 0x3cd   :  { %6911 = vmatprep.subr.bf16.mxu1 %v7896_v55 }
 0x3cf   :  { %6748 = vmatpush1.bf16.msra.mxu0 %v7893_v2 }
 0x3d0   :  { %6912 = vmatpush1.bf16.msra.mxu1 %v7895_v62  ;;  %6749 = vmatprep.subr.bf16.mxu0 %v7902_v0 }
 0x3d1   :  { %v6445_v12 = vpop.f32.mrb[8].mxu0  ;;  %v6609_v33 = vpop.f32.mrb[8].mxu1  ;;  %6913 = vmatprep.subr.bf16.mxu1 %v7904_v1 }
 0x3d2   :  { %v6447_v59 = vpop.f32.mrb[9].mxu0  ;;  %v6611_v19 = vpop.f32.mrb[9].mxu1 }
 0x3d3   :  { %v6952_v25 = vcombine.low %v6445_v12, %v6447_v59  ;;  %v6953_v26 = vcombine.low %v6609_v33, %v6611_v19  ;;  %v6449_v27 = vpop.f32.mrb[10].mxu0  ;;  %v6613_v58 = vpop.f32.mrb[10].mxu1  ;;  %6750 = vmatpush1.bf16.msra.mxu0 %v7901_v28 }
 0x3d4   :  { %6914 = vmatpush1.bf16.msra.mxu1 %v7903_v36  ;;  %v6450_v51 = vpop.f32.mrb[11].mxu0  ;;  %v6614_v30 = vpop.f32.mrb[11].mxu1  ;;  %6751 = vmatprep.subr.bf16.mxu0 %v7910_v61 }
 0x3d5   :  { %v6960_v35 = vrot.slane %v6952_v25, %v8203_v53  ;;  %v6967_v63 = vrot.slane %v6953_v26, %v8203_v53  ;;  %6915 = vmatprep.subr.bf16.mxu1 %v7912_v14 }
 0x3d7   :  { %v6968_v5 = vcombine.low %v6960_v35, %v6967_v63  ;;  %6752 = vmatpush1.bf16.msra.mxu0 %v7909_v47 }
 0x3d8   :  { %6916 = vmatpush1.bf16.msra.mxu1 %v7911_v31  ;;  %6753 = vmatprep.subr.bf16.mxu0 %v7918_v32 }
 0x3d9   :  { %6988 = vst [vmem:[#allocation8] sm:$0xff] %v6968_v5  ;;  %6917 = vmatprep.subr.bf16.mxu1 %v7920_v60 }
 0x3db   :  { %6754 = vmatpush1.bf16.msra.mxu0 %v7917_v37 }
 0x3dc   :  { %6918 = vmatpush1.bf16.msra.mxu1 %v7919_v40  ;;  %6755 = vmatprep.subr.bf16.mxu0 %v6280_v41 }
 0x3dd   :  { %6919 = vmatprep.subr.bf16.mxu1 %v6286_v42 }
 0x3df   :  { %6756 = vmatpush1.bf16.msra.mxu0 %v6277_v18 }
 0x3e0   :  { %6920 = vmatpush1.bf16.msra.mxu1 %v6283_v43 }
 0x3e2   :  { %6772 = vmatmul.mubr.bf16.vlgmr.msra.gmra.mrb[12].mxu0 %v8355_v45 }
 0x3e3   :  { %6936 = vmatmul.mubr.bf16.vlgmr.msra.gmra.mrb[12].mxu1 %v8355_v45 }
 0x4b5   :  { %v6773_v44 = vpop.f32.mrb[12].mxu0 }
 0x4b6   :  { %v6937_v48 = vpop.f32.mrb[12].mxu1  ;;  %v6775_v15 = vpop.f32.mrb[13].mxu0 }
 0x4b7   :  { %v6969_v50 = vcombine.low %v6773_v44, %v6775_v15  ;;  %v6939_v23 = vpop.f32.mrb[13].mxu1  ;;  %v6777_v20 = vpop.f32.mrb[14].mxu0 }
 0x4b8   :  { %v6970_v29 = vcombine.low %v6937_v48, %v6939_v23  ;;  %v6941_v52 = vpop.f32.mrb[14].mxu1  ;;  %v6778_v3 = vpop.f32.mrb[15].mxu0 }
 0x4b9   :  { %v6977_v54 = vrot.slane %v6969_v50, %v8203_v53  ;;  %v6942_v55 = vpop.f32.mrb[15].mxu1 }
 0x4ba   :  { %v6984_v45 = vrot.slane %v6970_v29, %v8203_v53 }
 0x4bc   :  { %v6985_v8 = vcombine.low %v6977_v54, %v6984_v45 }
 0x4be   :  { %6996 = vst.msk [vmem:[#allocation8 + $0x8] sm:$0xff] %vm6995_vm9, %v6985_v8 }
 0x4bf   :  { %8116 = shalt.err (!%p8113_p0)
}
 0x4c0   :  { %s8117_s25 = scalar_lea.hbm %s8400_s3, 256 }
 0x4c1   :  { %p8118_p1 = scmp.ne.s32.totalorder %s8400_s3, %s8117_s25  ;;  %p8121_p2 = scmp.lt.u32.totalorder %s8117_s25, %s8400_s3 }
 0x4c3   :  { %p8123_p3 = pnand %p8121_p2, %p8118_p1 }
 0x4c5   :  { %8126 = shalt.err (!%p8123_p3)
}
 0x4c6   :  { %7006 = dma.vmem_to_hbm [thread:$0]  %s7004_s21, 256, %s8400_s3, [#allocation4]  }
 0x4c7   :  { %8131 = dma.done.wait [#allocation4], 256  }
 0x4c8   :  { %8132 = vsyncadd [#allocation4], 4294967040 }
 0x4c9   :  { %7010 = vsyncpa [#allocation3], 1 }
 0x4ca   :  { %7011 = vsyncpa [#allocation6], 1 }
 0x4cb   :  { %7012 = vsyncpa [#allocation4], 1 }

</bundles_post_ra>
